<compile_context>
chip_gen: v5e
topology: v5e:2x2
jax: 0.10.0
libtpu: 0.0.40
codegen_flags: <defaults>
</compile_context>

<pallas_src>
import functools

import jax
import jax.numpy as jnp
from jax import lax
from jax.experimental import pallas as pl
from jax.experimental.pallas import tpu as pltpu
import numpy as np


def _residual_block_kernel(x_ref, w1_ref, b1_ref, w2_ref, b2_ref, o_ref,
                           *, H, W):
    M, C = x_ref.shape          # M = batch_tile * H * W rows, C channels
    cdt = x_ref.dtype           # bf16 MXU operand dtype
    f32 = jnp.float32
    log2w = W.bit_length() - 1  # W is a power of two (8x8 chess board)

    # Row-index derived boundary masks (VPU bit ops, computed once, reused by
    # both convs).  Row m <-> (b, h, w) with h = (m >> log2(W)) & (H-1),
    # w = m & (W-1).
    row = lax.broadcasted_iota(jnp.int32, (M, 1), 0)
    w_idx = row & (W - 1)
    h_idx = (row >> log2w) & (H - 1)
    w_gt0 = w_idx != 0            # column w-1 exists
    w_ltW = w_idx != (W - 1)      # column w+1 exists
    h_gt0 = h_idx != 0            # row h-1 exists
    h_ltH = h_idx != (H - 1)      # row h+1 exists

    def make_slab(v32):
        # (M, C) f32 -> (M, 3C) bf16 im2col over the ky (row) axis:
        # lanes = [x[h-1, w], x[h, w], x[h+1, w]] * C, zero outside the image.
        # Row shifts are whole-image-row sublane rolls (XLU), no misaligned
        # slices / copies.
        up = jnp.where(h_gt0, pltpu.roll(v32, W, axis=0), 0.0)
        dn = jnp.where(h_ltH, pltpu.roll(v32, M - W, axis=0), 0.0)
        return jnp.concatenate([up, v32, dn], axis=-1).astype(cdt)

    def conv3x3(slab, w_ref, b_ref):
        # 3 MXU matmuls with K = 3C (f32 accumulation); the dx = -1 / +1
        # column offsets are applied to the f32 outputs via +-1 sublane rolls
        # with column-boundary masks.
        p0 = jnp.dot(slab, w_ref[0], preferred_element_type=f32)   # kx = 0
        p1 = jnp.dot(slab, w_ref[1], preferred_element_type=f32)   # kx = 1
        p2 = jnp.dot(slab, w_ref[2], preferred_element_type=f32)   # kx = 2
        acc = p1 + b_ref[...]
        acc = acc + jnp.where(w_gt0, pltpu.roll(p0, 1, axis=0), 0.0)
        acc = acc + jnp.where(w_ltW, pltpu.roll(p2, M - 1, axis=0), 0.0)
        return acc

    # conv1 -> folded-BN bias -> ReLU  (BN scale pre-folded into w1)
    y1 = jnp.maximum(conv3x3(make_slab(x_ref[...].astype(f32)),
                             w1_ref, b1_ref), 0.0)
    # conv2 -> folded-BN bias -> ReLU  (inter-conv activation stored bf16 in
    # the slab, matching the reference)
    y2 = jnp.maximum(conv3x3(make_slab(y1), w2_ref, b2_ref), 0.0)

    # Residual add (se_type=None -> no SE block; DropPath(p=0) == identity).
    # x is re-read from the resident VMEM block so it is not held live across
    # both convs.
    o_ref[...] = (x_ref[...].astype(f32) + y2).astype(o_ref.dtype)


def _vmem_capacity_bytes():
    try:
        return int(pltpu.get_tpu_info().vmem_capacity_bytes)
    except Exception:
        return 64 * 1024 * 1024   # conservative fallback (v7x per-core VMEM)


def _estimate_step_vmem(rows, C, out_bytes):
    in_blk = rows * C * 2 * 2                       # bf16 input, double-buffered
    out_blk = rows * C * out_bytes * 2              # output block, double-buffered
    weights = 2 * (3 * 3 * C * C * 2) * 2 + 2 * C * 4 * 2
    # compiler-managed temporaries: ~2 bf16 (M,3C) slabs + ~6 f32 (M,C) values
    temps = rows * C * (12 + 24)
    return in_blk + out_blk + weights + temps


def _choose_batch_tile(N, H, W, C, out_bytes, budget):
    rows_per_image = H * W
    best = 1
    for b in range(1, N + 1):
        if N % b:
            continue
        if N >= 2 and N // b < 2:
            continue   # keep >= 2 grid steps (DMA pipelining / 2-TC sharding)
        if _estimate_step_vmem(b * rows_per_image, C, out_bytes) <= budget:
            best = b
    return best


def classical_residual_block(x_nhwc, w1_k, b1, w2_k, b2, *,
                             batch_tile=None, out_dtype=jnp.float32):
    """x_nhwc: (N,H,W,C); w*_k: (3, 3C, C) bf16 (BN scale folded, kx-major,
    (ky,cin) along K); b*: (1,C) f32 folded BN bias.  Returns (N,H,W,C)."""
    N, H, W, C = x_nhwc.shape
    # TODO(synk): non power-of-two H/W would need integer div/rem for the
    # boundary masks; chess boards are 8x8 so bit ops are used.
    assert H & (H - 1) == 0 and W & (W - 1) == 0, "H and W must be powers of 2"
    if x_nhwc.dtype != jnp.bfloat16:
        x_nhwc = x_nhwc.astype(jnp.bfloat16)   # enforce bf16 MXU operands

    out_bytes = jnp.dtype(out_dtype).itemsize
    cap = _vmem_capacity_bytes()
    budget = min(int(cap * 0.70), 96 * 1024 * 1024)
    vmem_limit = min(int(cap * 0.85), 112 * 1024 * 1024)

    if batch_tile is None:
        batch_tile = _choose_batch_tile(N, H, W, C, out_bytes, budget)
    B = min(batch_tile, N)
    assert N % B == 0, "batch must be divisible by batch_tile"

    rows_total = N * H * W
    rows = B * H * W
    x2 = x_nhwc.reshape(rows_total, C)

    flops = 4 * 9 * rows_total * C * C             # 2 convs, 2 flops/MAC, 9C MACs/elt
    bytes_accessed = (rows_total * C * (2 + out_bytes)
                      + 2 * (3 * 3 * C * C * 2) + 2 * C * 4)

    # TODO(synk): single-buffer the constant-index weight/bias inputs via
    # pipeline_mode=pl.Buffered(1) once verified on the target jax build
    # (their DMA is already elided after the first step since the block index
    # never changes).
    kernel = pl.pallas_call(
        functools.partial(_residual_block_kernel, H=H, W=W),
        out_shape=jax.ShapeDtypeStruct((rows_total, C), out_dtype),
        grid_spec=pltpu.PrefetchScalarGridSpec(
            num_scalar_prefetch=0,
            grid=(N // B,),
            in_specs=[
                pl.BlockSpec((rows, C), lambda n: (n, 0)),
                pl.BlockSpec((3, 3 * C, C), lambda n: (0, 0, 0)),
                pl.BlockSpec((1, C), lambda n: (0, 0)),
                pl.BlockSpec((3, 3 * C, C), lambda n: (0, 0, 0)),
                pl.BlockSpec((1, C), lambda n: (0, 0)),
            ],
            out_specs=pl.BlockSpec((rows, C), lambda n: (n, 0)),
        ),
        compiler_params=pltpu.CompilerParams(
            dimension_semantics=("parallel",),
            vmem_limit_bytes=vmem_limit),
        cost_estimate=pl.CostEstimate(flops=flops, transcendentals=0,
                                      bytes_accessed=bytes_accessed),
    )
    out2 = kernel(x2, w1_k, b1, w2_k, b2)
    return out2.reshape(N, H, W, C)


def _fold_bn(gamma, beta, running_mean, running_var, eps=1e-5):
    scale = gamma / jnp.sqrt(running_var + eps)
    bias = beta - running_mean * scale
    return scale, bias


def prepare_params(w1_pt, g1, be1, rm1, rv1, w2_pt, g2, be2, rm2, rv2,
                   eps=1e-5):
    """PyTorch (Cout, Cin, 3, 3) weights + eval-mode BN params -> kernel args.
    BN scale is folded into the weights (f32) before the bf16 cast; weights
    are laid out (kx, ky*C + cin, cout) to match the ky lane-concat slab."""
    C = w1_pt.shape[0]

    def prep_w(w_pt, s):
        w_hwio = jnp.transpose(w_pt, (2, 3, 1, 0))           # (ky,kx,ci,co)
        w_hwio = w_hwio * s.reshape(1, 1, 1, -1)              # fold BN scale
        w_kx = jnp.transpose(w_hwio, (1, 0, 2, 3))            # (kx,ky,ci,co)
        return w_kx.reshape(3, 3 * C, C).astype(jnp.bfloat16)

    s1, b1 = _fold_bn(g1, be1, rm1, rv1, eps)
    s2, b2 = _fold_bn(g2, be2, rm2, rv2, eps)
    return (prep_w(w1_pt, s1), b1.reshape(1, -1).astype(jnp.float32),
            prep_w(w2_pt, s2), b2.reshape(1, -1).astype(jnp.float32))


def _reference(x_bf16, w1_k, b1, w2_k, b2):
    """Plain-JAX reference on the same bf16-rounded operands, f32 math."""
    N, H, W, C = x_bf16.shape
    x = x_bf16.astype(jnp.float32)
    dn = ('NHWC', 'HWIO', 'NHWC')

    def to_hwio(wk):
        return jnp.transpose(wk.astype(jnp.float32).reshape(3, 3, C, C),
                             (1, 0, 2, 3))

    y = lax.conv_general_dilated(x, to_hwio(w1_k), (1, 1), 'SAME',
                                 dimension_numbers=dn,
                                 precision=lax.Precision.HIGHEST)
    y = jnp.maximum(y + b1.reshape(1, 1, 1, -1), 0.0)
    y = y.astype(jnp.bfloat16).astype(jnp.float32)   # inter-conv bf16 round
    y = lax.conv_general_dilated(y, to_hwio(w2_k), (1, 1), 'SAME',
                                 dimension_numbers=dn,
                                 precision=lax.Precision.HIGHEST)
    y = jnp.maximum(y + b2.reshape(1, 1, 1, -1), 0.0)
    return x + y


if __name__ == "__main__":
    # Chess-board shapes: 8x8 spatial, 32 channels, batch 8.
    N, C, H, W = 8, 32, 8, 8
    key = jax.random.PRNGKey(0)
    ks = jax.random.split(key, 11)

    # PyTorch-convention input (NCHW) and conv weights (Cout, Cin, 3, 3)
    x_nchw = jax.random.normal(ks[0], (N, C, H, W), jnp.float32)
    w1_pt = 0.1 * jax.random.normal(ks[1], (C, C, 3, 3), jnp.float32)
    w2_pt = 0.1 * jax.random.normal(ks[2], (C, C, 3, 3), jnp.float32)

    # BatchNorm parameters / running stats (eval mode)
    g1 = 1.0 + 0.1 * jax.random.normal(ks[3], (C,), jnp.float32)
    be1 = 0.1 * jax.random.normal(ks[4], (C,), jnp.float32)
    rm1 = 0.1 * jax.random.normal(ks[5], (C,), jnp.float32)
    rv1 = jnp.abs(jax.random.normal(ks[6], (C,), jnp.float32)) + 0.5
    g2 = 1.0 + 0.1 * jax.random.normal(ks[7], (C,), jnp.float32)
    be2 = 0.1 * jax.random.normal(ks[8], (C,), jnp.float32)
    rm2 = 0.1 * jax.random.normal(ks[9], (C,), jnp.float32)
    rv2 = jnp.abs(jax.random.normal(ks[10], (C,), jnp.float32)) + 0.5

    w1_k, b1, w2_k, b2 = prepare_params(w1_pt, g1, be1, rm1, rv1,
                                        w2_pt, g2, be2, rm2, rv2)

    # Layout conversion (NCHW -> NHWC) + bf16 MXU inputs.
    x_nhwc = jnp.transpose(x_nchw, (0, 2, 3, 1)).astype(jnp.bfloat16)

    # f32 output (module-default semantics) with auto-chosen batch tile.
    out_f32 = classical_residual_block(x_nhwc, w1_k, b1, w2_k, b2)
    out_f32 = jax.block_until_ready(out_f32)

    ref = _reference(x_nhwc, w1_k, b1, w2_k, b2)
    np.testing.assert_allclose(np.asarray(out_f32), np.asarray(ref),
                               rtol=1e-2, atol=1e-2)

    # Optional bf16 output (halves HBM writeback when chained into the next
    # bf16-consuming residual block).
    out_bf16 = classical_residual_block(x_nhwc, w1_k, b1, w2_k, b2,
                                        out_dtype=jnp.bfloat16)
    out_bf16 = jax.block_until_ready(out_bf16)
    np.testing.assert_allclose(np.asarray(out_bf16).astype(np.float32),
                               np.asarray(ref), rtol=3e-2, atol=6e-2)

    # Result in PyTorch layout if needed downstream:
    _ = jnp.transpose(out_f32, (0, 3, 1, 2))

    # TODO(synk): se_type ('ca_se'/'eca_se'), training-mode BatchNorm (batch
    # statistics) and nonzero path_dropout are not implemented; this covers
    # the default se_type=None, eval-mode configuration.  For small C (< 128)
    # the output stays lane-sparse; production DeepCrazyhouse uses C=256.
    print("KERNEL_OK")
</pallas_src>

<mosaic_0001>
module attributes {stable_mosaic.version = 11 : i64} {
  func.func @_residual_block_kernel(%arg0: i32, %arg1: memref<256x32xbf16, #tpu.memory_space<vmem>>, %arg2: memref<3x96x32xbf16, #tpu.memory_space<vmem>>, %arg3: memref<1x32xf32, #tpu.memory_space<vmem>>, %arg4: memref<3x96x32xbf16, #tpu.memory_space<vmem>>, %arg5: memref<1x32xf32, #tpu.memory_space<vmem>>, %arg6: memref<256x32xf32, #tpu.memory_space<vmem>>) attributes {dimension_semantics = [#tpu.dimension_semantics<parallel>], iteration_bounds = array<i64: 2>, scalar_prefetch = 0 : i64, scratch_operands = 0 : i64, tpu.core_type = #tpu.core_type<tc>, window_params = [{transform_indices = @transform_0, window_bounds = array<i64: 256, 32>}, {pipeline_mode = #tpu.pipeline_mode<synchronous>, transform_indices = @transform_1, window_bounds = array<i64: 3, 96, 32>}, {pipeline_mode = #tpu.pipeline_mode<synchronous>, transform_indices = @transform_2, window_bounds = array<i64: 1, 32>}, {pipeline_mode = #tpu.pipeline_mode<synchronous>, transform_indices = @transform_3, window_bounds = array<i64: 3, 96, 32>}, {pipeline_mode = #tpu.pipeline_mode<synchronous>, transform_indices = @transform_4, window_bounds = array<i64: 1, 32>}, {transform_indices = @transform_5, window_bounds = array<i64: 256, 32>}]} {
    %0 = tpu.iota {dimensions = array<i32: 0>} : vector<256x1xi32>
    %c7_i32 = arith.constant 7 : i32
    %1 = vector.broadcast %c7_i32 : i32 to vector<256x1xi32>
    %2 = arith.andi %0, %1 : vector<256x1xi32>
    %c3_i32 = arith.constant 3 : i32
    %3 = vector.broadcast %c3_i32 : i32 to vector<256x1xi32>
    %4 = arith.shrsi %0, %3 : vector<256x1xi32>
    %c7_i32_0 = arith.constant 7 : i32
    %5 = vector.broadcast %c7_i32_0 : i32 to vector<256x1xi32>
    %6 = arith.andi %4, %5 : vector<256x1xi32>
    %c0_i32 = arith.constant 0 : i32
    %7 = vector.broadcast %c0_i32 : i32 to vector<256x1xi32>
    %8 = arith.cmpi ne, %2, %7 : vector<256x1xi32>
    %c7_i32_1 = arith.constant 7 : i32
    %9 = vector.broadcast %c7_i32_1 : i32 to vector<256x1xi32>
    %10 = arith.cmpi ne, %2, %9 : vector<256x1xi32>
    %c0_i32_2 = arith.constant 0 : i32
    %11 = vector.broadcast %c0_i32_2 : i32 to vector<256x1xi32>
    %12 = arith.cmpi ne, %6, %11 : vector<256x1xi32>
    %c7_i32_3 = arith.constant 7 : i32
    %13 = vector.broadcast %c7_i32_3 : i32 to vector<256x1xi32>
    %14 = arith.cmpi ne, %6, %13 : vector<256x1xi32>
    %c0 = arith.constant 0 : index
    %c0_4 = arith.constant 0 : index
    %15 = vector.load %arg1[%c0, %c0_4] : memref<256x32xbf16, #tpu.memory_space<vmem>>, vector<256x32xbf16>
    %16 = arith.extf %15 : vector<256x32xbf16> to vector<256x32xf32>
    %c8_i32 = arith.constant 8 : i32
    %17 = tpu.dynamic_rotate %16 by %c8_i32 dim 0 : vector<256x32xf32>, i32 -> vector<256x32xf32>
    %cst = arith.constant 0.000000e+00 : f32
    %18 = vector.shape_cast %12 : vector<256x1xi1> to vector<256x1xi1>
    %19 = vector.broadcast %18 : vector<256x1xi1> to vector<256x32xi1>
    %20 = vector.broadcast %cst : f32 to vector<256x32xf32>
    %21 = arith.select %19, %17, %20 : vector<256x32xi1>, vector<256x32xf32>
    %c248_i32 = arith.constant 248 : i32
    %22 = tpu.dynamic_rotate %16 by %c248_i32 dim 0 : vector<256x32xf32>, i32 -> vector<256x32xf32>
    %cst_5 = arith.constant 0.000000e+00 : f32
    %23 = vector.shape_cast %14 : vector<256x1xi1> to vector<256x1xi1>
    %24 = vector.broadcast %23 : vector<256x1xi1> to vector<256x32xi1>
    %25 = vector.broadcast %cst_5 : f32 to vector<256x32xf32>
    %26 = arith.select %24, %22, %25 : vector<256x32xi1>, vector<256x32xf32>
    %27 = tpu.concatenate %21, %16, %26 in 1 : vector<256x32xf32>, vector<256x32xf32>, vector<256x32xf32> -> vector<256x96xf32>
    %28 = arith.truncf %27 : vector<256x96xf32> to vector<256x96xbf16>
    %c0_6 = arith.constant 0 : index
    %c0_7 = arith.constant 0 : index
    %c0_8 = arith.constant 0 : index
    %29 = vector.load %arg2[%c0_6, %c0_7, %c0_8] : memref<3x96x32xbf16, #tpu.memory_space<vmem>>, vector<1x96x32xbf16>
    %30 = vector.shape_cast %29 : vector<1x96x32xbf16> to vector<96x32xbf16>
    %cst_9 = arith.constant dense<0.000000e+00> : vector<256x32xf32>
    %31 = tpu.matmul %28, %30, %cst_9 {dimension_numbers = #tpu.dot_dimension_numbers<[1], [0], [0], [1], [0, 0, 1, 1], [], []>} : vector<256x96xbf16>, vector<96x32xbf16>, vector<256x32xf32> -> vector<256x32xf32>
    %c1 = arith.constant 1 : index
    %c0_10 = arith.constant 0 : index
    %c0_11 = arith.constant 0 : index
    %32 = vector.load %arg2[%c1, %c0_10, %c0_11] : memref<3x96x32xbf16, #tpu.memory_space<vmem>>, vector<1x96x32xbf16>
    %33 = vector.shape_cast %32 : vector<1x96x32xbf16> to vector<96x32xbf16>
    %cst_12 = arith.constant dense<0.000000e+00> : vector<256x32xf32>
    %34 = tpu.matmul %28, %33, %cst_12 {dimension_numbers = #tpu.dot_dimension_numbers<[1], [0], [0], [1], [0, 0, 1, 1], [], []>} : vector<256x96xbf16>, vector<96x32xbf16>, vector<256x32xf32> -> vector<256x32xf32>
    %c2 = arith.constant 2 : index
    %c0_13 = arith.constant 0 : index
    %c0_14 = arith.constant 0 : index
    %35 = vector.load %arg2[%c2, %c0_13, %c0_14] : memref<3x96x32xbf16, #tpu.memory_space<vmem>>, vector<1x96x32xbf16>
    %36 = vector.shape_cast %35 : vector<1x96x32xbf16> to vector<96x32xbf16>
    %cst_15 = arith.constant dense<0.000000e+00> : vector<256x32xf32>
    %37 = tpu.matmul %28, %36, %cst_15 {dimension_numbers = #tpu.dot_dimension_numbers<[1], [0], [0], [1], [0, 0, 1, 1], [], []>} : vector<256x96xbf16>, vector<96x32xbf16>, vector<256x32xf32> -> vector<256x32xf32>
    %c0_16 = arith.constant 0 : index
    %c0_17 = arith.constant 0 : index
    %38 = vector.load %arg3[%c0_16, %c0_17] : memref<1x32xf32, #tpu.memory_space<vmem>>, vector<1x32xf32>
    %39 = vector.broadcast %38 : vector<1x32xf32> to vector<256x32xf32>
    %40 = arith.addf %34, %39 : vector<256x32xf32>
    %c1_i32 = arith.constant 1 : i32
    %41 = tpu.dynamic_rotate %31 by %c1_i32 dim 0 : vector<256x32xf32>, i32 -> vector<256x32xf32>
    %cst_18 = arith.constant 0.000000e+00 : f32
    %42 = vector.shape_cast %8 : vector<256x1xi1> to vector<256x1xi1>
    %43 = vector.broadcast %42 : vector<256x1xi1> to vector<256x32xi1>
    %44 = vector.broadcast %cst_18 : f32 to vector<256x32xf32>
    %45 = arith.select %43, %41, %44 : vector<256x32xi1>, vector<256x32xf32>
    %46 = arith.addf %40, %45 : vector<256x32xf32>
    %c255_i32 = arith.constant 255 : i32
    %47 = tpu.dynamic_rotate %37 by %c255_i32 dim 0 : vector<256x32xf32>, i32 -> vector<256x32xf32>
    %cst_19 = arith.constant 0.000000e+00 : f32
    %48 = vector.shape_cast %10 : vector<256x1xi1> to vector<256x1xi1>
    %49 = vector.broadcast %48 : vector<256x1xi1> to vector<256x32xi1>
    %50 = vector.broadcast %cst_19 : f32 to vector<256x32xf32>
    %51 = arith.select %49, %47, %50 : vector<256x32xi1>, vector<256x32xf32>
    %52 = arith.addf %46, %51 : vector<256x32xf32>
    %cst_20 = arith.constant 0.000000e+00 : f32
    %53 = vector.broadcast %cst_20 : f32 to vector<256x32xf32>
    %54 = arith.maximumf %52, %53 : vector<256x32xf32>
    %c8_i32_21 = arith.constant 8 : i32
    %55 = tpu.dynamic_rotate %54 by %c8_i32_21 dim 0 : vector<256x32xf32>, i32 -> vector<256x32xf32>
    %cst_22 = arith.constant 0.000000e+00 : f32
    %56 = vector.shape_cast %12 : vector<256x1xi1> to vector<256x1xi1>
    %57 = vector.broadcast %56 : vector<256x1xi1> to vector<256x32xi1>
    %58 = vector.broadcast %cst_22 : f32 to vector<256x32xf32>
    %59 = arith.select %57, %55, %58 : vector<256x32xi1>, vector<256x32xf32>
    %c248_i32_23 = arith.constant 248 : i32
    %60 = tpu.dynamic_rotate %54 by %c248_i32_23 dim 0 : vector<256x32xf32>, i32 -> vector<256x32xf32>
    %cst_24 = arith.constant 0.000000e+00 : f32
    %61 = vector.shape_cast %14 : vector<256x1xi1> to vector<256x1xi1>
    %62 = vector.broadcast %61 : vector<256x1xi1> to vector<256x32xi1>
    %63 = vector.broadcast %cst_24 : f32 to vector<256x32xf32>
    %64 = arith.select %62, %60, %63 : vector<256x32xi1>, vector<256x32xf32>
    %65 = tpu.concatenate %59, %54, %64 in 1 : vector<256x32xf32>, vector<256x32xf32>, vector<256x32xf32> -> vector<256x96xf32>
    %66 = arith.truncf %65 : vector<256x96xf32> to vector<256x96xbf16>
    %c0_25 = arith.constant 0 : index
    %c0_26 = arith.constant 0 : index
    %c0_27 = arith.constant 0 : index
    %67 = vector.load %arg4[%c0_25, %c0_26, %c0_27] : memref<3x96x32xbf16, #tpu.memory_space<vmem>>, vector<1x96x32xbf16>
    %68 = vector.shape_cast %67 : vector<1x96x32xbf16> to vector<96x32xbf16>
    %cst_28 = arith.constant dense<0.000000e+00> : vector<256x32xf32>
    %69 = tpu.matmul %66, %68, %cst_28 {dimension_numbers = #tpu.dot_dimension_numbers<[1], [0], [0], [1], [0, 0, 1, 1], [], []>} : vector<256x96xbf16>, vector<96x32xbf16>, vector<256x32xf32> -> vector<256x32xf32>
    %c1_29 = arith.constant 1 : index
    %c0_30 = arith.constant 0 : index
    %c0_31 = arith.constant 0 : index
    %70 = vector.load %arg4[%c1_29, %c0_30, %c0_31] : memref<3x96x32xbf16, #tpu.memory_space<vmem>>, vector<1x96x32xbf16>
    %71 = vector.shape_cast %70 : vector<1x96x32xbf16> to vector<96x32xbf16>
    %cst_32 = arith.constant dense<0.000000e+00> : vector<256x32xf32>
    %72 = tpu.matmul %66, %71, %cst_32 {dimension_numbers = #tpu.dot_dimension_numbers<[1], [0], [0], [1], [0, 0, 1, 1], [], []>} : vector<256x96xbf16>, vector<96x32xbf16>, vector<256x32xf32> -> vector<256x32xf32>
    %c2_33 = arith.constant 2 : index
    %c0_34 = arith.constant 0 : index
    %c0_35 = arith.constant 0 : index
    %73 = vector.load %arg4[%c2_33, %c0_34, %c0_35] : memref<3x96x32xbf16, #tpu.memory_space<vmem>>, vector<1x96x32xbf16>
    %74 = vector.shape_cast %73 : vector<1x96x32xbf16> to vector<96x32xbf16>
    %cst_36 = arith.constant dense<0.000000e+00> : vector<256x32xf32>
    %75 = tpu.matmul %66, %74, %cst_36 {dimension_numbers = #tpu.dot_dimension_numbers<[1], [0], [0], [1], [0, 0, 1, 1], [], []>} : vector<256x96xbf16>, vector<96x32xbf16>, vector<256x32xf32> -> vector<256x32xf32>
    %c0_37 = arith.constant 0 : index
    %c0_38 = arith.constant 0 : index
    %76 = vector.load %arg5[%c0_37, %c0_38] : memref<1x32xf32, #tpu.memory_space<vmem>>, vector<1x32xf32>
    %77 = vector.broadcast %76 : vector<1x32xf32> to vector<256x32xf32>
    %78 = arith.addf %72, %77 : vector<256x32xf32>
    %c1_i32_39 = arith.constant 1 : i32
    %79 = tpu.dynamic_rotate %69 by %c1_i32_39 dim 0 : vector<256x32xf32>, i32 -> vector<256x32xf32>
    %cst_40 = arith.constant 0.000000e+00 : f32
    %80 = vector.shape_cast %8 : vector<256x1xi1> to vector<256x1xi1>
    %81 = vector.broadcast %80 : vector<256x1xi1> to vector<256x32xi1>
    %82 = vector.broadcast %cst_40 : f32 to vector<256x32xf32>
    %83 = arith.select %81, %79, %82 : vector<256x32xi1>, vector<256x32xf32>
    %84 = arith.addf %78, %83 : vector<256x32xf32>
    %c255_i32_41 = arith.constant 255 : i32
    %85 = tpu.dynamic_rotate %75 by %c255_i32_41 dim 0 : vector<256x32xf32>, i32 -> vector<256x32xf32>
    %cst_42 = arith.constant 0.000000e+00 : f32
    %86 = vector.shape_cast %10 : vector<256x1xi1> to vector<256x1xi1>
    %87 = vector.broadcast %86 : vector<256x1xi1> to vector<256x32xi1>
    %88 = vector.broadcast %cst_42 : f32 to vector<256x32xf32>
    %89 = arith.select %87, %85, %88 : vector<256x32xi1>, vector<256x32xf32>
    %90 = arith.addf %84, %89 : vector<256x32xf32>
    %cst_43 = arith.constant 0.000000e+00 : f32
    %91 = vector.broadcast %cst_43 : f32 to vector<256x32xf32>
    %92 = arith.maximumf %90, %91 : vector<256x32xf32>
    %c0_44 = arith.constant 0 : index
    %c0_45 = arith.constant 0 : index
    %93 = vector.load %arg1[%c0_44, %c0_45] : memref<256x32xbf16, #tpu.memory_space<vmem>>, vector<256x32xbf16>
    %94 = arith.extf %93 : vector<256x32xbf16> to vector<256x32xf32>
    %95 = arith.addf %94, %92 : vector<256x32xf32>
    %c0_46 = arith.constant 0 : index
    %c0_47 = arith.constant 0 : index
    %96 = vector.load %arg6[%c0_46, %c0_47] : memref<256x32xf32, #tpu.memory_space<vmem>>, vector<256x32xf32>
    tpu.vector_store %arg6[%c0_46, %c0_47], %95 {strides = array<i32>} : memref<256x32xf32, #tpu.memory_space<vmem>>, vector<256x32xf32>,
    return
  }
  func.func @transform_0(%arg0: i32) -> (i32, i32) {
    %c0_i32 = arith.constant 0 : i32
    %c0_i32_0 = arith.constant 0 : i32
    return %arg0, %c0_i32 : i32, i32
  }
  func.func @transform_1(%arg0: i32) -> (i32, i32, i32) {
    %c0_i32 = arith.constant 0 : i32
    %c0_i32_0 = arith.constant 0 : i32
    %c0_i32_1 = arith.constant 0 : i32
    %c0_i32_2 = arith.constant 0 : i32
    return %c0_i32, %c0_i32_0, %c0_i32_1 : i32, i32, i32
  }
  func.func @transform_2(%arg0: i32) -> (i32, i32) {
    %c0_i32 = arith.constant 0 : i32
    %c0_i32_0 = arith.constant 0 : i32
    %c0_i32_1 = arith.constant 0 : i32
    return %c0_i32, %c0_i32_0 : i32, i32
  }
  func.func @transform_3(%arg0: i32) -> (i32, i32, i32) {
    %c0_i32 = arith.constant 0 : i32
    %c0_i32_0 = arith.constant 0 : i32
    %c0_i32_1 = arith.constant 0 : i32
    %c0_i32_2 = arith.constant 0 : i32
    return %c0_i32, %c0_i32_0, %c0_i32_1 : i32, i32, i32
  }
  func.func @transform_4(%arg0: i32) -> (i32, i32) {
    %c0_i32 = arith.constant 0 : i32
    %c0_i32_0 = arith.constant 0 : i32
    %c0_i32_1 = arith.constant 0 : i32
    return %c0_i32, %c0_i32_0 : i32, i32
  }
  func.func @transform_5(%arg0: i32) -> (i32, i32) {
    %c0_i32 = arith.constant 0 : i32
    %c0_i32_0 = arith.constant 0 : i32
    return %arg0, %c0_i32 : i32, i32
  }
}

</mosaic_0001>

<bundles_post_ra>
// kernel: tpu_custom_call.1
= control target key start
LH: loop header
LB: loop body
LE: loop exit
PB: predicated region body
PF: predicated region fallthrough
CT: control target
= control target key end

     0   :  { %s4036_s18 = smov 0   ;;  %s6643_s0 = inlined_call_operand.vmem [shape: bf16[512,32], index: 0, kind: input, shape index: {}]   ;;  %s6644_s1 = inlined_call_operand.vmem [shape: bf16[3,96,32], index: 1, kind: input, shape index: {}]   ;;  %s6645_s2 = inlined_call_operand.vmem [shape: f32[1,32], index: 2, kind: input, shape index: {}]   ;;  %s6646_s3 = inlined_call_operand.vmem [shape: bf16[3,96,32], index: 3, kind: input, shape index: {}]   ;;  %s6647_s4 = inlined_call_operand.vmem [shape: f32[1,32], index: 4, kind: input, shape index: {}]   ;;  %s6648_s5 = inlined_call_operand.vmem [shape: f32[512,32], index: 5, kind: output, shape index: {}]  }
   0x1 LB: > { %s3237_s19 = sadd.s32 4294967295, %s4002_s18   ;;  %p3241_p0 = scmp.ge.s32.totalorder %s4002_s18, 1  ;;  %s4002_s18 = sphi %s4036_s18, %s15_s18  }
   0x2   : > { %p188_p1 = scmp.lt.s32.totalorder %s4002_s18, 3 }
   0x4   : > { %p189_p2 = pnand %p3241_p0, %p188_p1 }
   0x6   : > { %192 = sbr.rel (%p189_p2) target bundleno = 1066 (0x42a), region = 40 }
   0xb   : > { %s3242_s20 = sshll.u32 %s3237_s19, 5  ;;  %v229_v0 = vlaneseq  ;;  %s4004_s25 = smov 32  }
   0xc   : > { %p217_p3 = scmp.lt.s32.totalorder %s3242_s20, 63  ;;  %s4005_s26 = smov 64  }
   0xd   : > { %v4044_v1 = vshrl.u32 %v229_v0, 7 }
   0xe   : > { %s7725_s20 = smov (!%p217_p3, %s3242_s20), 63 }
   0xf   : > { %v4049_v2 = vadd.s32 144, %v4044_v1  ;;  %v4052_v3 = vadd.s32 152, %v4044_v1  ;;  %v4055_v4 = vadd.s32 128, %v4044_v1  ;;  %v4058_v5 = vadd.s32 136, %v4044_v1  ;;  %s3243_s21 = sshll.u32 %s7725_s20, 2  ;;  %s3245_s15 = sshll.u32 %s7725_s20, 3 }
  0x10   : > { %v4062_v6 = vadd.s32 176, %v4044_v1  ;;  %v4065_v7 = vadd.s32 184, %v4044_v1  ;;  %s4070_s24 = scalar_lea.vmem %s6643_s0, %s3243_s21  ;;  %v4138_v42 = vadd.s32 192, %v4044_v1  ;;  %v4142_v43 = vadd.s32 224, %v4044_v1  ;;  %s6223_s19 = scalar_lea.vmem %s6648_s5, %s3245_s15 }
  0x11   : > { %6952 = vst [vmem:[#allocation2_spill] sm:$0xff] %v4049_v2  ;;  %v312_v8 = vshra.s32 %v4049_v2, 3  ;;  %v313_v9 = vshra.s32 %v4052_v3, 3  ;;  %v310_v10 = vshra.s32 %v4055_v4, 3  ;;  %v311_v11 = vshra.s32 %v4058_v5, 3  ;;  %v3644_v12 = vld [vmem:[%s4070_s24 + $0x48] sm:$0xff]  }
  0x12   : > { %6953 = vst [vmem:[#allocation3_spill] sm:$0xff] %v4052_v3  ;;  %v3643_v13 = vld [vmem:[%s4070_s24 + $0x40] sm:$0xff]   ;;  %v3645_v14 = vld [vmem:[%s4070_s24 + $0x50] sm:$0xff]   ;;  %v316_v15 = vshra.s32 %v4062_v6, 3  ;;  %v4080_v16 = vunpack.c.l.bf16 %v3644_v12  ;;  %v4082_v17 = vunpack.c.h.bf16 %v3644_v12  ;;  %v317_v27 = vshra.s32 %v4065_v7, 3  ;;  %v3646_v34 = vld [vmem:[%s4070_s24 + $0x58] sm:$0xff]  }
  0x13   : > { %6954 = vst [vmem:[#allocation4_spill] sm:$0xff] %v4055_v4  ;;  %v4084_v18 = vunpack.c.l.bf16 %v3643_v13  ;;  %v4086_v19 = vunpack.c.h.bf16 %v3643_v13  ;;  %v4088_v20 = vand.u32 7, %v312_v8  ;;  %v4090_v21 = vand.u32 7, %v313_v9  ;;  %v3647_v35 = vld [vmem:[%s4070_s24 + $0x60] sm:$0xff]   ;;  %v3648_v59 = vld [vmem:[%s4070_s24 + $0x68] sm:$0xff]   ;;  %v3649_v12 = vld [vmem:[%s4070_s24 + $0x70] sm:$0xff]  }
  0x14   : > { %6955 = vst [vmem:[#allocation5_spill] sm:$0xff] %v4058_v5  ;;  %v4092_v22 = vunpack.c.l.bf16 %v3645_v14  ;;  %v4094_v23 = vand.u32 7, %v310_v10  ;;  %v3683_v24 = vpack.i.bf16 %v4082_v17, %v4080_v16  ;;  %v4100_v26 = vand.u32 7, %v311_v11  ;;  %v3638_v3 = vld [vmem:[%s4070_s24 + $0x18] sm:$0xff]  }
  0x15   : > { %6956 = vst [vmem:[#allocation6_spill] sm:$0xff] %v4062_v6  ;;  %v3673_v25 = vpack.i.bf16 %v4086_v19, %v4084_v18  ;;  %vm6707_vm0 = vcmp.ne.s32.totalorder %v4088_v20, 7  ;;  %vm6706_vm1 = vcmp.ne.s32.totalorder %v4090_v21, 7  ;;  %v4121_v32 = vand.u32 7, %v316_v15  ;;  %v3551_v6 = vld [vmem:[%s6644_s1 + $0x78] sm:$0xff] }
  0x16   : > { %6957 = vst [vmem:[#allocation7_spill] sm:$0xff] %v4065_v7  ;;  %vm6710_vm2 = vcmp.ne.s32.totalorder %v4094_v23, 7  ;;  %3684 = vrot.lane.b32.xlu1 %v3683_v24, %s4004_s25  ;;  %vm6709_vm3 = vcmp.ne.s32.totalorder %v4100_v26, 7  ;;  %v728_v28 = vsel %vm6707_vm0, %v4082_v17, 0.0  ;;  %v729_v29 = vsel %vm6706_vm1, %v4092_v22, 0.0 }
  0x17   : > { %6958 = vst [vmem:[#allocation8_spill] sm:$0xff] %v4080_v16  ;;  %3674 = vrot.lane.b32.xlu0 %v3673_v25, %s4004_s25  ;;  %v726_v30 = vsel %vm6710_vm2, %v4086_v19, 0.0  ;;  %v727_v31 = vsel %vm6709_vm3, %v4080_v16, 0.0  ;;  %v4123_v33 = vand.u32 7, %v317_v27  ;;  %v4127_v36 = vunpack.c.h.bf16 %v3645_v14 }
  0x18   : > { %6959 = vst [vmem:[#allocation9_spill] sm:$0xff] %v4082_v17  ;;  %v3688_v37 = vpack.i.bf16 %v729_v29, %v728_v28  ;;  %v3678_v38 = vpack.i.bf16 %v727_v31, %v726_v30  ;;  %v4129_v39 = vunpack.c.h.bf16 %v3646_v34  ;;  %v4131_v40 = vunpack.c.l.bf16 %v3647_v35  ;;  %v3650_v30 = vld [vmem:[%s4070_s24 + $0x78] sm:$0xff]  }
  0x19   : > { %6960 = vst [vmem:[#allocation10_spill] sm:$0xff] %v4084_v18  ;;  %v3693_v41 = vpack.i.bf16 %v4127_v36, %v4092_v22  ;;  %vm6683_vm4 = vcmp.ne.s32.totalorder %v4121_v32, 7  ;;  %vm6682_vm5 = vcmp.ne.s32.totalorder %v4123_v33, 7  ;;  %v4145_v44 = vadd.s32 200, %v4044_v1 }
  0x1a   : > { %6961 = vst [vmem:[#allocation11_spill] sm:$0xff] %v4086_v19  ;;  %v4148_v45 = vadd.s32 160, %v4044_v1  ;;  %v4152_v46 = vunpack.c.l.bf16 %v3646_v34  ;;  %v4155_v47 = vadd.s32 232, %v4044_v1  ;;  %v318_v48 = vshra.s32 %v4138_v42, 3 }
  0x1b   : > { %6962 = vst [vmem:[#allocation12_spill] sm:$0xff] %v4088_v20  ;;  %3694 = vrot.lane.b32.xlu2 %v3693_v41, %s4004_s25  ;;  %v4159_v49 = vadd.s32 168, %v4044_v1  ;;  %v732_v50 = vsel %vm6683_vm4, %v4129_v39, 0.0  ;;  %v733_v51 = vsel %vm6682_vm5, %v4131_v40, 0.0  ;;  %v319_v52 = vshra.s32 %v4145_v44, 3 }
  0x1c   : > { %6963 = vst [vmem:[#allocation13_spill] sm:$0xff] %v4090_v21  ;;  %v314_v53 = vshra.s32 %v4148_v45, 3  ;;  %v4169_v54 = vand.u32 7, %v318_v48  ;;  %v3708_v58 = vpack.i.bf16 %v733_v51, %v732_v50  ;;  %v3703_v60 = vpack.i.bf16 %v4129_v39, %v4152_v46 }
  0x1d   : > { %6964 = vst [vmem:[#allocation14_spill] sm:$0xff] %v4092_v22  ;;  %v315_v55 = vshra.s32 %v4159_v49, 3  ;;  %v4172_v56 = vand.u32 7, %v319_v52  ;;  %v322_v62 = vshra.s32 %v4142_v43, 3  ;;  %v323_v63 = vshra.s32 %v4155_v47, 3 }
  0x1e   : > { %6965 = vst [vmem:[#allocation15_spill] sm:$0xff] %v4094_v23  ;;  %3689 = vrot.lane.b32.xlu1 %v3688_v37, %s4005_s26  ;;  %v4174_v57 = vand.u32 7, %v314_v53  ;;  %v4183_v0 = vunpack.c.h.bf16 %v3647_v35  ;;  %vm6681_vm7 = vcmp.ne.s32.totalorder %v4169_v54, 7  ;;  %v4192_v9 = vunpack.c.l.bf16 %v3648_v59 }
  0x1f   : > { %6966 = vst [vmem:[#allocation16_spill] sm:$0xff] %v4100_v26  ;;  %3679 = vrot.lane.b32.xlu0 %v3678_v38, %s4005_s26  ;;  %v4179_v61 = vand.u32 7, %v315_v55  ;;  %vm6680_vm8 = vcmp.ne.s32.totalorder %v4172_v56, 7  ;;  %v4198_v11 = vunpack.c.h.bf16 %v3648_v59  ;;  %v4203_v14 = vadd.s32 208, %v4044_v1 }
  0x20   : > { %6967 = vst [vmem:[#allocation17_spill] sm:$0xff] %v4127_v36  ;;  %vm6691_vm6 = vcmp.ne.s32.totalorder %v4174_v57, 7  ;;  %v4206_v15 = vadd.s32 216, %v4044_v1  ;;  %v4208_v24 = vand.u32 7, %v322_v62  ;;  %v734_v25 = vsel %vm6681_vm7, %v4183_v0, 0.0 }
  0x21   : > { %6968 = vst [vmem:[#allocation18_spill] sm:$0xff] %v4129_v39  ;;  %vm6690_vm9 = vcmp.ne.s32.totalorder %v4179_v61, 7  ;;  %v730_v8 = vsel %vm6691_vm6, %v4127_v36, 0.0  ;;  %v735_v27 = vsel %vm6680_vm8, %v4192_v9, 0.0  ;;  %v4217_v28 = vadd.s32 240, %v4044_v1 }
  0x22   : > { %6969 = vst [vmem:[#allocation19_spill] sm:$0xff] %v4131_v40  ;;  %v731_v10 = vsel %vm6690_vm9, %v4152_v46, 0.0  ;;  %v4219_v29 = vand.u32 7, %v323_v63  ;;  %v4224_v31 = vadd.s32 248, %v4044_v1  ;;  %v320_v34 = vshra.s32 %v4203_v14, 3 }
  0x23   : > { %6970 = vst [vmem:[#allocation20_spill] sm:$0xff] %v4138_v42  ;;  %v3698_v13 = vpack.i.bf16 %v731_v10, %v730_v8  ;;  %v321_v35 = vshra.s32 %v4206_v15, 3  ;;  %v4228_v37 = vunpack.c.h.bf16 %v3649_v12  ;;  %v3723_v38 = vpack.i.bf16 %v4198_v11, %v4192_v9 }
  0x24   : > { %6971 = vst [vmem:[#allocation21_spill] sm:$0xff] %v4142_v43  ;;  %v3718_v41 = vpack.i.bf16 %v735_v27, %v734_v25  ;;  %v4232_v48 = vand.u32 7, %v320_v34  ;;  %vm6661_vm10 = vcmp.ne.s32.totalorder %v4208_v24, 7  ;;  %v4237_v51 = vunpack.c.l.bf16 %v3650_v30 }
  0x25   : > { %6972 = vst [vmem:[#allocation22_spill] sm:$0xff] %v4145_v44  ;;  %3699 = vrot.lane.b32.xlu2 %v3698_v13, %s4005_s26  ;;  %v4234_v50 = vand.u32 7, %v321_v35  ;;  %v324_v52 = vshra.s32 %v4217_v28, 3  ;;  %vm6660_vm11 = vcmp.ne.s32.totalorder %v4219_v29, 7  ;;  %v3713_v53 = vpack.i.bf16 %v4183_v0, %v4131_v40  ;;  %v3573_v35 = vld [vmem:[%s4070_s24] sm:$0xff]  }
  0x26   : > { %6973 = vst [vmem:[#allocation23_spill] sm:$0xff] %v4148_v45  ;;  %3709 = vrot.lane.b32.xlu1 %v3708_v58, %s4005_s26  ;;  %v325_v55 = vshra.s32 %v4224_v31, 3  ;;  %v738_v58 = vsel %vm6661_vm10, %v4228_v37, 0.0  ;;  %v4249_v59 = vunpack.c.l.bf16 %v3649_v12  ;;  %vm6672_vm12 = vcmp.ne.s32.totalorder %v4232_v48, 7 }
  0x27   : > { %6974 = vst [vmem:[#allocation24_spill] sm:$0xff] %v4152_v46  ;;  %3704 = vrot.lane.b32.xlu0 %v3703_v60, %s4004_s25  ;;  %vm6671_vm13 = vcmp.ne.s32.totalorder %v4234_v50, 7  ;;  %v739_v60 = vsel %vm6660_vm11, %v4237_v51, 0.0  ;;  %v4256_v62 = vand.u32 7, %v324_v52  ;;  %v4259_v63 = vadd.s32 16, %v4044_v1 }
  0x28   : > { %6975 = vst [vmem:[#allocation25_spill] sm:$0xff] %v4155_v47  ;;  %v4262_v8 = vadd.s32 24, %v4044_v1  ;;  %v4265_v10 = vand.u32 7, %v325_v55  ;;  %v4268_v12 = vadd.s32 8, %v4044_v1  ;;  %v736_v13 = vsel %vm6672_vm12, %v4198_v11, 0.0  ;;  %v3637_v47 = vld [vmem:[%s4070_s24 + $0x10] sm:$0xff]  }
  0x29   : > { %6976 = vst [vmem:[#allocation26_spill] sm:$0xff] %v4159_v49  ;;  %v737_v25 = vsel %vm6671_vm13, %v4249_v59, 0.0  ;;  %v3738_v27 = vpack.i.bf16 %v739_v60, %v738_v58  ;;  %v3733_v34 = vpack.i.bf16 %v4228_v37, %v4249_v59  ;;  %vm6657_vm14 = vcmp.ne.s32.totalorder %v4256_v62, 7 }
  0x2a   : > { %6977 = vst [vmem:[#allocation27_spill] sm:$0xff] %v4169_v54  ;;  %v297_v52 = vshra.s32 %v4262_v8, 3  ;;  %vm6658_vm15 = vcmp.ne.s32.totalorder %v4265_v10, 7  ;;  %v294_v55 = vshra.s32 %v4044_v1, 3  ;;  %v295_v58 = vshra.s32 %v4268_v12, 3 }
  0x2b   : > { %6978 = vst [vmem:[#allocation28_spill] sm:$0xff] %v4172_v56  ;;  %v4287_v60 = vunpack.c.l.bf16 %v3573_v35  ;;  %v4320_v44 = vadd.s32 40, %v4044_v1  ;;  %v4336_v7 = vunpack.c.l.bf16 %v3637_v47  ;;  %v4371_v2 = vadd.s32 64, %v4044_v1 }
  0x2c   : > { %6979 = vst [vmem:[#allocation29_spill] sm:$0xff] %v4174_v57  ;;  %v4312_v43 = vand.u32 7, %v294_v55  ;;  %v4374_v5 = vadd.s32 72, %v4044_v1  ;;  %vm6737_vm1 = vcmp.ne.s32.totalorder %v4094_v23, 0  ;;  %vm6733_vm0 = vcmp.ne.s32.totalorder %v4100_v26, 0 }
  0x2d   : > { %6980 = vst [vmem:[#allocation30_spill] sm:$0xff] %v4179_v61  ;;  %3714 = vrot.lane.b32.xlu2 %v3713_v53, %s4004_s25  ;;  %v3728_v53 = vpack.i.bf16 %v737_v25, %v736_v13  ;;  %v3553_v13 = vld [vmem:[%s6644_s1 + $0x88] sm:$0xff]  ;;  %vm6819_vm2 = vcmask 261120  }
  0x2e   : > { %6981 = vst [vmem:[#allocation31_spill] sm:$0xff] %v4183_v0  ;;  %3724 = vrot.lane.b32.xlu1 %v3723_v38, %s4004_s25  ;;  %v4280_v38 = vunpack.c.h.bf16 %v3650_v30  ;;  %v4291_v30 = vunpack.c.h.bf16 %v3573_v35  ;;  %v4308_v35 = vand.u32 7, %v297_v52  ;;  %3657 = vmatpush.bf16.msra.mxu3 %v3553_v13  ;;  %v3552_v52 = vld [vmem:[%s6644_s1 + $0x80] sm:$0xff]  ;;  %vm454_vm11 = vcmp.ne.s32.totalorder %v4312_v43, 7 }
  0x2f   : > { %6982 = vst [vmem:[#allocation32_spill] sm:$0xff] %v4192_v9  ;;  %3719 = vrot.lane.b32.xlu0 %v3718_v41, %s4005_s26  ;;  %v296_v41 = vshra.s32 %v4259_v63, 3  ;;  %1330 = vmatpush.bf16.msra.mxu1 %v3553_v13  ;;  %v3539_v13 = vld [vmem:[%s6644_s1 + $0x18] sm:$0xff] }
  0x30   : > { %6983 = vst [vmem:[#allocation33_spill] sm:$0xff] %v4198_v11  ;;  %v740_v25 = vsel %vm6657_vm14, %v4280_v38, 0.0  ;;  %v3743_v42 = vpack.i.bf16 %v4280_v38, %v4237_v51 }
  0x31   : > { %6984 = vst [vmem:[#allocation34_spill] sm:$0xff] %v4203_v14  ;;  %v4317_v14 = vadd.s32 32, %v4044_v1 }
  0x32   : > { %6985 = vst [vmem:[#allocation35_spill] sm:$0xff] %v4206_v15  ;;  %v4314_v15 = vand.u32 7, %v295_v58  ;;  %3658 = vmatpush.bf16.msra.mxu3 %v3552_v52 }
  0x33   : > { %6986 = vst [vmem:[#allocation36_spill] sm:$0xff] %v4208_v24  ;;  %1331 = vmatpush.bf16.msra.mxu1 %v3552_v52 }
  0x34   : > { %6987 = vst [vmem:[#allocation37_spill] sm:$0xff] %v4217_v28  ;;  %v3636_v28 = vld [vmem:[%s4070_s24 + $0x8] sm:$0xff]   ;;  %vm455_vm10 = vcmp.ne.s32.totalorder %v4314_v15, 7 }
  0x35   : > { %6988 = vst [vmem:[#allocation38_spill] sm:$0xff] %v4219_v29  ;;  %3729 = vrot.lane.b32.xlu2 %v3728_v53, %s4005_s26  ;;  %v3753_v53 = vpack.i.bf16 %v4291_v30, %v4287_v60  ;;  %v4330_v58 = vunpack.c.h.bf16 %v3636_v28 }
  0x36   : > { %6989 = vst [vmem:[#allocation39_spill] sm:$0xff] %v4224_v31  ;;  %3739 = vrot.lane.b32.xlu1 %v3738_v27, %s4005_s26  ;;  %v3541_v31 = vld [vmem:[%s6644_s1 + $0x28] sm:$0xff]  ;;  %v741_v27 = vsel %vm6658_vm15, %v4287_v60, 0.0  ;;  %vm457_vm15 = vcmp.ne.s32.totalorder %v4308_v35, 7  ;;  %3659 = vmatpush.bf16.msra.mxu3 %v3551_v6 }
  0x37   : > { %6990 = vst [vmem:[#allocation40_spill] sm:$0xff] %v4228_v37  ;;  %3734 = vrot.lane.b32.xlu0 %v3733_v34, %s4004_s25  ;;  %v4306_v34 = vand.u32 7, %v296_v41  ;;  %3651 = vmatpush.bf16.msra.mxu2 %v3541_v31  ;;  %v3540_v41 = vld [vmem:[%s6644_s1 + $0x20] sm:$0xff]  ;;  %v3748_v55 = vpack.i.bf16 %v741_v27, %v740_v25  ;;  %v299_v25 = vshra.s32 %v4320_v44, 3  ;;  %v4345_v27 = vunpack.c.l.bf16 %v3636_v28 }
  0x38   : > { %6991 = vst [vmem:[#allocation41_spill] sm:$0xff] %v4232_v48  ;;  %1179 = vmatpush.bf16.msra.mxu0 %v3541_v31  ;;  %v298_v31 = vshra.s32 %v4317_v14, 3  ;;  %v713_v45 = vsel %vm457_vm15, %v4336_v7, 0.0  ;;  %v710_v28 = vsel %vm454_vm11, %v4291_v30, 0.0  ;;  %1332 = vmatpush.bf16.msra.mxu1 %v3551_v6 }
  0x39   : > { %6992 = vst [vmem:[#allocation42_spill] sm:$0xff] %v4234_v50  ;;  %vm456_vm14 = vcmp.ne.s32.totalorder %v4306_v34, 7  ;;  %v3763_v4 = vpack.i.bf16 %v4330_v58, %v4345_v27 }
  0x3a   : > { %6993 = vst [vmem:[#allocation43_spill] sm:$0xff] %v4237_v51  ;;  %v712_v49 = vsel %vm456_vm14, %v4330_v58, 0.0 }
  0x3b   : > { %6994 = vst [vmem:[#allocation44_spill] sm:$0xff] %v4249_v59  ;;  %3652 = vmatpush.bf16.msra.mxu2 %v3540_v41  ;;  %v3768_v52 = vpack.i.bf16 %v713_v45, %v712_v49  ;;  %v302_v45 = vshra.s32 %v4371_v2, 3  ;;  %v303_v49 = vshra.s32 %v4374_v5, 3 }
  0x3c   : > { %6995 = vst [vmem:[#allocation45_spill] sm:$0xff] %v4256_v62  ;;  %1180 = vmatpush.bf16.msra.mxu0 %v3540_v41  ;;  %v711_v41 = vsel %vm455_vm10, %v4345_v27, 0.0 }
  0x3d   : > { %6996 = vst [vmem:[#allocation46_spill] sm:$0xff] %v4259_v63  ;;  %3744 = vrot.lane.b32.xlu2 %v3743_v42, %s4004_s25  ;;  %v4379_v42 = vadd.s32 48, %v4044_v1 }
  0x3e   : > { %6997 = vst [vmem:[#allocation47_spill] sm:$0xff] %v4262_v8  ;;  %3754 = vrot.lane.b32.xlu1 %v3753_v53, %s4004_s25  ;;  %v4365_v53 = vand.u32 7, %v298_v31  ;;  %v4382_v31 = vadd.s32 56, %v4044_v1 }
  0x3f   : > { %6998 = vst [vmem:[#allocation48_spill] sm:$0xff] %v4265_v10  ;;  %3749 = vrot.lane.b32.xlu0 %v3748_v55, %s4005_s26  ;;  %v4367_v55 = vand.u32 7, %v299_v25  ;;  %3653 = vmatpush.bf16.msra.mxu2 %v3539_v13  ;;  %v3758_v25 = vpack.i.bf16 %v711_v41, %v710_v28 }
  0x40   : > { %6999 = vst [vmem:[#allocation49_spill] sm:$0xff] %v4268_v12  ;;  %1181 = vmatpush.bf16.msra.mxu0 %v3539_v13  ;;  %vm6836_vm13 = vcmp.ne.s32.totalorder %v4365_v53, 7  ;;  %v4394_v13 = vunpack.c.h.bf16 %v3638_v3  ;;  %v301_v28 = vshra.s32 %v4382_v31, 3 }
  0x41   : > { %7000 = vst [vmem:[#allocation50_spill] sm:$0xff] %v4280_v38  ;;  %vm6830_vm12 = vcmp.ne.s32.totalorder %v4367_v55, 7 }
  0x42   : > { %7001 = vst [vmem:[#allocation51_spill] sm:$0xff] %v4287_v60  ;;  %v4415_v8 = vand.u32 7, %v301_v28 }
  0x43   : > { %7002 = vst [vmem:[#allocation52_spill] sm:$0xff] %v4291_v30 }
  0x44   : > { %7003 = vst [vmem:[#allocation53_spill] sm:$0xff] %v4312_v43  ;;  %vm6827_vm4 = vcmp.ne.s32.totalorder %v4415_v8, 7 }
  0x45   : > { %7004 = vst [vmem:[#allocation54_spill] sm:$0xff] %v4314_v15  ;;  %3759 = vrot.lane.b32.xlu2 %v3758_v25, %s4005_s26 }
  0x46   : > { %7005 = vst [vmem:[#allocation55_spill] sm:$0xff] %v4317_v14  ;;  %v4386_v14 = vunpack.c.l.bf16 %v3638_v3  ;;  %3769 = vrot.lane.b32.xlu1 %v3768_v52, %s4005_s26  ;;  %v4408_v52 = vand.u32 7, %v303_v49  ;;  %v3640_v3 = vld [vmem:[%s4070_s24 + $0x28] sm:$0xff]  }
  0x47   : > { %7006 = vst [vmem:[#allocation56_spill] sm:$0xff] %v4320_v44  ;;  %v4384_v44 = vunpack.c.h.bf16 %v3637_v47  ;;  %3764 = vrot.lane.b32.xlu0 %v3763_v4, %s4004_s25  ;;  %v300_v47 = vshra.s32 %v4379_v42, 3  ;;  %v4406_v4 = vand.u32 7, %v302_v45  ;;  %v4419_v12 = vunpack.c.l.bf16 %v3640_v3 }
  0x48   : > { %7007 = vst [vmem:[#allocation57_spill] sm:$0xff] %v4330_v58  ;;  %v715_v41 = vsel %vm6830_vm12, %v4386_v14, 0.0  ;;  %vm6740_vm7 = vcmp.ne.s32.totalorder %v4408_v52, 7 }
  0x49   : > { %7008 = vst [vmem:[#allocation58_spill] sm:$0xff] %v4336_v7  ;;  %v714_v6 = vsel %vm6836_vm13, %v4384_v44, 0.0  ;;  %v3773_v25 = vpack.i.bf16 %v4384_v44, %v4336_v7  ;;  %vm6826_vm8 = vcmp.ne.s32.totalorder %v4406_v4, 7 }
  0x4a   : > { %7009 = vst [vmem:[#allocation59_spill] sm:$0xff] %v4345_v27 }
  0x4b   : > { %7010 = vst [vmem:[#allocation60_spill] sm:$0xff] %v4371_v2  ;;  %v3778_v2 = vpack.i.bf16 %v715_v41, %v714_v6  ;;  %v4450_v41 = vadd.s32 80, %v4044_v1 }
  0x4c   : > { %7011 = vst [vmem:[#allocation61_spill] sm:$0xff] %v4374_v5  ;;  %v3639_v5 = vld [vmem:[%s4070_s24 + $0x20] sm:$0xff]  }
  0x4d   : > { %7012 = vst [vmem:[#allocation62_spill] sm:$0xff] %v4379_v42  ;;  %v4413_v42 = vand.u32 7, %v300_v47  ;;  %v4417_v63 = vunpack.c.h.bf16 %v3639_v5  ;;  %v4427_v45 = vunpack.c.l.bf16 %v3639_v5  ;;  %v719_v47 = vsel %vm6740_vm7, %v4419_v12, 0.0  ;;  %3774 = vrot.lane.b32.xlu2 %v3773_v25, %s4004_s25 }
  0x4e   : > { %7013 = vst [vmem:[#allocation63_spill] sm:$0xff] %v4382_v31  ;;  %v3783_v31 = vpack.i.bf16 %v4394_v13, %v4386_v14  ;;  %v4453_v25 = vadd.s32 88, %v4044_v1 }
  0x4f   : > { %7014 = vst [vmem:[#allocation64_spill] sm:$0xff] %v4384_v44  ;;  %3779 = vrot.lane.b32.xlu0 %v3778_v2, %s4005_s26  ;;  %vm6828_vm5 = vcmp.ne.s32.totalorder %v4413_v42, 7  ;;  %v718_v49 = vsel %vm6826_vm8, %v4417_v63, 0.0  ;;  %v717_v5 = vsel %vm6827_vm4, %v4427_v45, 0.0 }
  0x50   : > { %7015 = vst [vmem:[#allocation65_spill] sm:$0xff] %v4386_v14  ;;  %3784 = vrot.lane.b32.xlu1 %v3783_v31, %s4004_s25  ;;  %v716_v2 = vsel %vm6828_vm5, %v4394_v13, 0.0  ;;  %v3793_v31 = vpack.i.bf16 %v4417_v63, %v4427_v45  ;;  %v3798_v28 = vpack.i.bf16 %v719_v47, %v718_v49  ;;  %v305_v59 = vshra.s32 %v4453_v25, 3  ;;  %v3538_v49 = vld [vmem:[%s6644_s1 + $0x10] sm:$0xff] }
  0x51   : > { %7016 = vst [vmem:[#allocation66_spill] sm:$0xff] %v4394_v13  ;;  %v3788_v6 = vpack.i.bf16 %v717_v5, %v716_v2  ;;  %v304_v13 = vshra.s32 %v4450_v41, 3  ;;  %v3550_v47 = vld [vmem:[%s6644_s1 + $0x70] sm:$0xff]  ;;  %3654 = vmatpush.bf16.msra.mxu2 %v3538_v49  ;;  %1182 = vmatpush.bf16.msra.mxu0 %v3538_v49  ;;  %v3548_v49 = vld [vmem:[%s6644_s1 + $0x60] sm:$0xff]  ;;  %v4554_v14 = vadd.s32 96, %v4044_v1 }
  0x52   : > { %7017 = vst [vmem:[#allocation67_spill] sm:$0xff] %v4406_v4  ;;  %v4465_v5 = vand.u32 7, %v305_v59  ;;  %3660 = vmatpush.bf16.msra.mxu3 %v3550_v47  ;;  %1333 = vmatpush.bf16.msra.mxu1 %v3550_v47  ;;  %v3547_v47 = vld [vmem:[%s6644_s1 + $0x58] sm:$0xff] }
  0x53   : > { %7018 = vst [vmem:[#allocation68_spill] sm:$0xff] %v4408_v52  ;;  %v4463_v2 = vand.u32 7, %v304_v13 }
  0x54   : > { %7019 = vst [vmem:[#allocation69_spill] sm:$0xff] %v4417_v63  ;;  %vm6714_vm6 = vcmp.ne.s32.totalorder %v4465_v5, 7 }
  0x55   : > { %7020 = vst [vmem:[#allocation70_spill] sm:$0xff] %v4419_v12  ;;  %3789 = vrot.lane.b32.xlu2 %v3788_v6, %s4005_s26  ;;  %v3549_v6 = vld [vmem:[%s6644_s1 + $0x68] sm:$0xff]  ;;  %vm6717_vm9 = vcmp.ne.s32.totalorder %v4463_v2, 7 }
  0x56   : > { %7021 = vst [vmem:[#allocation71_spill] sm:$0xff] %v4427_v45  ;;  %3661 = vmatpush.bf16.msra.mxu3 %v3549_v6  ;;  %1334 = vmatpush.bf16.msra.mxu1 %v3549_v6 }
  0x57   : > { %3794 = vrot.lane.b32.xlu0 %v3793_v31, %s4004_s25  ;;  %7022 = vst [vmem:[#allocation72_spill] sm:$0xff] %v4450_v41  ;;  %v3641_v31 = vld [vmem:[%s4070_s24 + $0x30] sm:$0xff]  }
  0x58   : > { %3799 = vrot.lane.b32.xlu1 %v3798_v28, %s4005_s26  ;;  %7023 = vst [vmem:[#allocation73_spill] sm:$0xff] %v4453_v25  ;;  %v3537_v28 = vld [vmem:[%s6644_s1 + $0x8] sm:$0xff]  ;;  %v4474_v25 = vunpack.c.h.bf16 %v3640_v3  ;;  %v4476_v41 = vunpack.c.l.bf16 %v3641_v31  ;;  %v3536_v3 = vld [vmem:[%s6644_s1] sm:$0xff] }
  0x59   : > { %7024 = vst [vmem:[#allocation74_spill] sm:$0xff] %v4463_v2  ;;  %3655 = vmatpush.bf16.msra.mxu2 %v3537_v28  ;;  %1183 = vmatpush.bf16.msra.mxu0 %v3537_v28 }
  0x5a   : > { %7025 = vst [vmem:[#allocation75_spill] sm:$0xff] %v4465_v5  ;;  %v720_v59 = vsel %vm6717_vm9, %v4474_v25, 0.0  ;;  %v721_v13 = vsel %vm6714_vm6, %v4476_v41, 0.0  ;;  %3662 = vmatpush.bf16.msra.mxu3 %v3548_v49  ;;  %1335 = vmatpush.bf16.msra.mxu1 %v3548_v49  ;;  %v3803_v6 = vpack.i.bf16 %v4474_v25, %v4419_v12  ;;  %v4511_v49 = vadd.s32 120, %v4044_v1  ;;  %v3642_v5 = vld [vmem:[%s4070_s24 + $0x38] sm:$0xff]  }
  0x5b   : > { %7026 = vst [vmem:[#allocation76_spill] sm:$0xff] %v4474_v25  ;;  %v3808_v63 = vpack.i.bf16 %v721_v13, %v720_v59  ;;  %v4522_v12 = vunpack.c.l.bf16 %v3642_v5  ;;  %v4526_v45 = vunpack.c.h.bf16 %v3642_v5  ;;  %vm6817_vm9 = vcmask 523264  }
  0x5c   : > { %7027 = vst [vmem:[#allocation77_spill] sm:$0xff] %v4476_v41  ;;  %v309_v25 = vshra.s32 %v4511_v49, 3 }
  0x5d   : > { %3656 = vmatpush.bf16.msra.mxu2 %v3536_v3  ;;  %1184 = vmatpush.bf16.msra.mxu0 %v3536_v3  ;;  %v4508_v3 = vadd.s32 112, %v4044_v1  ;;  %7030 = vst [vmem:[#allocation80_spill] sm:$0xff] %v4511_v49  ;;  %v630_v5 = vsel %vm6737_vm1, %v4526_v45, 0.0  ;;  %vm6751_vm1 = vcmp.ne.s32.totalorder %v4088_v20, 0 }
  0x5e   : > { %3804 = vrot.lane.b32.xlu2 %v3803_v6, %s4004_s25  ;;  %7031 = vst [vmem:[#allocation81_spill] sm:$0xff] %v4522_v12  ;;  %v3823_v6 = vpack.i.bf16 %v4526_v45, %v4522_v12 }
  0x5f   : > { %3809 = vrot.lane.b32.xlu0 %v3808_v63, %s4005_s26  ;;  %v4496_v63 = vunpack.c.h.bf16 %v3641_v31  ;;  %7029 = vst [vmem:[#allocation79_spill] sm:$0xff] %v4508_v3  ;;  %v308_v31 = vshra.s32 %v4508_v3, 3  ;;  %v4532_v3 = vand.u32 7, %v309_v25 }
  0x60   : > { %7033 = vst [vmem:[#allocation83_spill] sm:$0xff] %v4526_v45 }
  0x61   : > { %1459 = vmatpush.bf16.msrb.mxu2 %v3547_v47  ;;  %7028 = vst [vmem:[#allocation78_spill] sm:$0xff] %v4496_v63  ;;  %v3813_v59 = vpack.i.bf16 %v4496_v63, %v4476_v41  ;;  %v4524_v2 = vand.u32 7, %v308_v31  ;;  %v631_v31 = vsel %vm6733_vm0, %v4084_v18, 0.0  ;;  %vm6738_vm6 = vcmp.ne.s32.totalorder %v4532_v3, 7 }
  0x62   : > { %v725_v23 = vsel %vm6738_vm6, %v4084_v18, 0.0  ;;  %7034 = vst [vmem:[#allocation84_spill] sm:$0xff] %v4554_v14  ;;  %vm6838_vm0 = vcmask 785408   ;;  %v4562_v18 = vadd.s32 104, %v4044_v1  ;;  %vm6750_vm6 = vcmp.ne.s32.totalorder %v4090_v21, 0 }
  0x63   : > { %3814 = vrot.lane.b32.xlu1 %v3813_v59, %s4004_s25  ;;  %v3546_v59 = vld [vmem:[%s6644_s1 + $0x50] sm:$0xff]  ;;  %7032 = vst [vmem:[#allocation82_spill] sm:$0xff] %v4524_v2  ;;  %vm6739_vm3 = vcmp.ne.s32.totalorder %v4524_v2, 7 }
  0x64   : > { %v724_v25 = vsel %vm6739_vm3, %v4526_v45, 0.0  ;;  %7036 = vst [vmem:[#allocation86_spill] sm:$0xff] %v4562_v18 }
  0x65   : > { %1460 = vmatpush.bf16.msrb.mxu2 %v3546_v59 }
  0x67   : > { %3824 = vrot.lane.b32.xlu0 %v3823_v6, %s4004_s25  ;;  %v3828_v6 = vpack.i.bf16 %v725_v23, %v724_v25  ;;  %v307_v23 = vshra.s32 %v4562_v18, 3  ;;  %v3545_v25 = vld [vmem:[%s6644_s1 + $0x48] sm:$0xff] }
  0x69   : > { %1461 = vmatpush.bf16.msrb.mxu2 %v3545_v25 }
  0x6b   : > { %3829 = vrot.lane.b32.xlu1 %v3828_v6, %s4005_s26 }
  0x75   : > { %v4498_v28 = vpop.permute.xlu2 %3694 }
  0x7f   : > { %v4505_v13 = vpop.permute.xlu2 %3699 }
  0x80   : > { %v3701_v25 = vunpack.i.l.bf16 %v4505_v13 }
  0x87   : > { %v4541_v59 = vpop.permute.xlu2 %3714 }
  0x88   : > { %v4515_v47 = vpop.permute.xlu1 %3684 }
  0x89   : > { %v3675_v41 = vpop.permute.xlu0 %3674 }
  0x8a   : > { %v3677_v49 = vunpack.i.h.bf16 %v3675_v41  ;;  %v3676_v11 = vunpack.i.l.bf16 %v3675_v41 }
  0x8c   : > { %v1015_v29 = vsel %vm6819_vm2, %v630_v5, %v3676_v11  ;;  %v1016_v24 = vsel %vm6819_vm2, %v631_v31, %v3677_v49  ;;  %v306_v11 = vshra.s32 %v4554_v14, 3  ;;  %v4582_v49 = vand.u32 7, %v307_v23 }
  0x8d   : > { %v632_v5 = vsel %vm6751_vm1, %v4086_v19, 0.0  ;;  %v633_v31 = vsel %vm6750_vm6, %v4080_v16, 0.0  ;;  %vm6765_vm6 = vcmp.ne.s32.totalorder %v4174_v57, 0  ;;  %vm6764_vm1 = vcmp.ne.s32.totalorder %v4179_v61, 0 }
  0x8e   : > { %vm6752_vm7 = vcmp.ne.s32.totalorder %v4582_v49, 7 }
  0x90   : > { %v3690_v52 = vpop.permute.xlu1 %3689 }
  0x91   : > { %v3680_v41 = vpop.permute.xlu0 %3679  ;;  %v3691_v6 = vunpack.i.l.bf16 %v3690_v52 }
  0x92   : > { %v3682_v4 = vunpack.i.h.bf16 %v3680_v41  ;;  %v3681_v26 = vunpack.i.l.bf16 %v3680_v41  ;;  %v3692_v41 = vunpack.i.h.bf16 %v3690_v52 }
  0x94   : > { %v1048_v2 = vsel %vm6817_vm9, %v1015_v29, %v3681_v26  ;;  %v1049_v45 = vsel %vm6817_vm9, %v1016_v24, %v3682_v4  ;;  %v4570_v26 = vand.u32 7, %v306_v11  ;;  %v4578_v4 = vpop.permute.xlu2 %3729  ;;  %v723_v11 = vsel %vm6752_vm7, %v4522_v12, 0.0 }
  0x95   : > { %v4558_v44 = vpack.c.bf16 %v1049_v45, %v1048_v2  ;;  %v3687_v45 = vunpack.i.h.bf16 %v4515_v47  ;;  %v3686_v2 = vunpack.i.l.bf16 %v4515_v47  ;;  %vm6766_vm7 = vcmp.ne.s32.totalorder %v4312_v43, 0 }
  0x96   : > { %vm6753_vm3 = vcmp.ne.s32.totalorder %v4570_v26, 7 }
  0x97   : > { %7035 = vst [vmem:[#allocation85_spill] sm:$0xff] %v4558_v44  ;;  %3278 = vmatmul.msk.bf16.vlgmr.msra.gmra.mxu2 %vm6838_vm0, %v4558_v44  ;;  %3342 = vmatmul.msk.bf16.vlgmr.msra.gmra.mxu3 %vm6838_vm0, %v4558_v44  ;;  %v722_v47 = vsel %vm6753_vm3, %v4496_v63, 0.0  ;;  %v1017_v23 = vsel %vm6819_vm2, %v632_v5, %v3686_v2  ;;  %v1018_v16 = vsel %vm6819_vm2, %v633_v31, %v3687_v45  ;;  %v3696_v2 = vunpack.i.l.bf16 %v4498_v28 }
  0x98   : > { %v4574_v24 = vpop.permute.xlu1 %3709  ;;  %v3818_v19 = vpack.i.bf16 %v723_v11, %v722_v47  ;;  %v1050_v18 = vsel %vm6817_vm9, %v1017_v23, %v3691_v6  ;;  %v1051_v52 = vsel %vm6817_vm9, %v1018_v16, %v3692_v41  ;;  %v3697_v16 = vunpack.i.h.bf16 %v4498_v28 }
  0x99   : > { %v4576_v29 = vpop.permute.xlu0 %3704  ;;  %v4612_v44 = vpack.c.bf16 %v1051_v52, %v1050_v18  ;;  %v634_v18 = vsel %vm6765_vm6, %v4082_v17, 0.0  ;;  %v635_v5 = vsel %vm6764_vm1, %v4092_v22, 0.0  ;;  %v3702_v31 = vunpack.i.h.bf16 %v4505_v13 }
  0x9a   : > { %3819 = vrot.lane.b32.xlu2 %v3818_v19, %s4005_s26  ;;  %vm6767_vm3 = vcmp.ne.s32.totalorder %v4314_v15, 0  ;;  %v1019_v41 = vsel %vm6819_vm2, %v634_v18, %v3696_v2  ;;  %v1020_v28 = vsel %vm6819_vm2, %v635_v5, %v3697_v16  ;;  %v614_v6 = vsel %vm6766_vm7, %v4280_v38, 0.0 }
  0x9b   : > { %v615_v23 = vsel %vm6767_vm3, %v4287_v60, 0.0  ;;  %v1052_v57 = vsel %vm6817_vm9, %v1019_v41, %v3701_v25  ;;  %v1053_v2 = vsel %vm6817_vm9, %v1020_v28, %v3702_v31  ;;  %vm6772_vm1 = vcmp.ne.s32.totalorder %v4121_v32, 0 }
  0x9c   : > { %v4610_v14 = vpop.permute.xlu2 %3744  ;;  %v4650_v5 = vpack.c.bf16 %v1053_v2, %v1052_v57  ;;  %vm6771_vm6 = vcmp.ne.s32.totalorder %v4123_v33, 0  ;;  %vm6774_vm7 = vcmp.ne.s32.totalorder %v4306_v34, 0  ;;  %vm6773_vm3 = vcmp.ne.s32.totalorder %v4308_v35, 0 }
  0x9d   : > { %v3707_v57 = vunpack.i.h.bf16 %v4576_v29  ;;  %v637_v31 = vsel %vm6771_vm6, %v4152_v46, 0.0  ;;  %v616_v28 = vsel %vm6774_vm7, %v4291_v30, 0.0  ;;  %vm6776_vm6 = vcmp.ne.s32.totalorder %v4169_v54, 0 }
  0x9e   : > { %vm6777_vm7 = vcmp.ne.s32.totalorder %v4367_v55, 0  ;;  %v7059_v30 = vld [vmem:[#allocation85_spill] sm:$0xff] }
  0xa0   : > { %v4603_v21 = vpop.permute.xlu1 %3724 }
  0xa1   : > { %v4605_v20 = vpop.permute.xlu0 %3719 }
  0xa4   : > { %v3760_v47 = vpop.permute.xlu2 %3759 }
  0xa5   : > { %v3762_v52 = vunpack.i.h.bf16 %v3760_v47  ;;  %v3761_v13 = vunpack.i.l.bf16 %v3760_v47 }
  0xa7   : > { %3279 = vmatmul.msk.bf16.gmra.mxu2 %vm6838_vm0, %v4612_v44  ;;  %3343 = vmatmul.msk.bf16.gmra.mxu3 %vm6838_vm0, %v4612_v44 }
  0xa8   : > { %v4620_v45 = vpop.permute.xlu1 %3739 }
  0xa9   : > { %v4622_v19 = vpop.permute.xlu0 %3734 }
  0xb0   : > { %v3755_v11 = vpop.permute.xlu1 %3754 }
  0xb1   : > { %v4644_v22 = vpop.permute.xlu0 %3749  ;;  %v3757_v17 = vunpack.i.h.bf16 %v3755_v11  ;;  %v3756_v61 = vunpack.i.l.bf16 %v3755_v11  ;;  %v3711_v11 = vunpack.i.l.bf16 %v4574_v24 }
  0xb3   : > { %v999_v16 = vsel %vm6819_vm2, %v614_v6, %v3756_v61  ;;  %v1000_v18 = vsel %vm6819_vm2, %v615_v23, %v3757_v17  ;;  %v3544_v17 = vld [vmem:[%s6644_s1 + $0x40] sm:$0xff]  ;;  %v3706_v61 = vunpack.i.l.bf16 %v4576_v29  ;;  %v617_v29 = vsel %vm6773_vm3, %v4345_v27, 0.0 }
  0xb4   : > { %v1032_v38 = vsel %vm6817_vm9, %v999_v16, %v3761_v13  ;;  %v1033_v60 = vsel %vm6817_vm9, %v1000_v18, %v3762_v52  ;;  %1462 = vmatpush.bf16.msrb.mxu2 %v3544_v17  ;;  %v3712_v6 = vunpack.i.h.bf16 %v4574_v24  ;;  %v1022_v23 = vsel %vm6819_vm2, %v637_v31, %v3707_v57  ;;  %v3775_v57 = vpop.permute.xlu2 %3774 }
  0xb5   : > { %v4654_v15 = vpack.c.bf16 %v1033_v60, %v1032_v38  ;;  %v636_v60 = vsel %vm6772_vm1, %v4127_v36, 0.0  ;;  %vm6775_vm1 = vcmp.ne.s32.totalorder %v4172_v56, 0  ;;  %vm6780_vm3 = vcmp.ne.s32.totalorder %v4365_v53, 0 }
  0xb6   : > { %v1021_v52 = vsel %vm6819_vm2, %v636_v60, %v3706_v61  ;;  %v3716_v61 = vunpack.i.l.bf16 %v4541_v59  ;;  %v638_v60 = vsel %vm6776_vm6, %v4129_v39, 0.0  ;;  %v639_v31 = vsel %vm6775_vm1, %v4131_v40, 0.0 }
  0xb7   : > { %3280 = vmatmul.msk.bf16.gmra.mxu2 %vm6838_vm0, %v4650_v5  ;;  %3344 = vmatmul.msk.bf16.gmra.mxu3 %vm6838_vm0, %v4650_v5  ;;  %v1054_v17 = vsel %vm6817_vm9, %v1021_v52, %v3711_v11  ;;  %vm6778_vm1 = vcmp.ne.s32.totalorder %v4256_v62, 0  ;;  %vm6779_vm6 = vcmp.ne.s32.totalorder %v4265_v10, 0  ;;  %v262_v62 = vand.u32 7, %v4044_v1 }
  0xb8   : > { %3270 = vmatmul.msk.bf16.vlgmr.msra.gmra.mxu0 %vm6838_vm0, %v4654_v15  ;;  %3334 = vmatmul.msk.bf16.vlgmr.msra.gmra.mxu1 %vm6838_vm0, %v4654_v15  ;;  %v3770_v41 = vpop.permute.xlu1 %3769 }
  0xb9   : > { %v3765_v38 = vpop.permute.xlu0 %3764  ;;  %v3772_v13 = vunpack.i.h.bf16 %v3770_v41  ;;  %v3771_v2 = vunpack.i.l.bf16 %v3770_v41 }
  0xba   : > { %v3767_v25 = vunpack.i.h.bf16 %v3765_v38  ;;  %v3766_v47 = vunpack.i.l.bf16 %v3765_v38  ;;  %v1055_v38 = vsel %vm6817_vm9, %v1022_v23, %v3712_v6  ;;  %v3721_v6 = vunpack.i.l.bf16 %v4605_v20 }
  0xbb   : > { %v4695_v27 = vpack.c.bf16 %v1055_v38, %v1054_v17  ;;  %v1023_v23 = vsel %vm6819_vm2, %v638_v60, %v3716_v61  ;;  %v3746_v38 = vunpack.i.l.bf16 %v4610_v14  ;;  %v645_v61 = vsel %vm6779_vm6, %v4237_v51, 0.0 }
  0xbc   : > { %v1002_v16 = vsel %vm6819_vm2, %v617_v29, %v3767_v25  ;;  %v1001_v18 = vsel %vm6819_vm2, %v616_v28, %v3766_v47  ;;  %v3777_v25 = vunpack.i.h.bf16 %v3775_v57  ;;  %v3776_v47 = vunpack.i.l.bf16 %v3775_v57 }
  0xbd   : > { %v1034_v46 = vsel %vm6817_vm9, %v1001_v18, %v3771_v2  ;;  %v1035_v36 = vsel %vm6817_vm9, %v1002_v16, %v3772_v13  ;;  %v618_v28 = vsel %vm6780_vm3, %v4330_v58, 0.0  ;;  %v3722_v29 = vunpack.i.h.bf16 %v4605_v20 }
  0xbe   : > { %v4697_v24 = vpack.c.bf16 %v1035_v36, %v1034_v46  ;;  %v3543_v36 = vld [vmem:[%s6644_s1 + $0x38] sm:$0xff]  ;;  %v3717_v46 = vunpack.i.h.bf16 %v4541_v59  ;;  %v619_v59 = vsel %vm6777_vm7, %v4336_v7, 0.0  ;;  %v1003_v16 = vsel %vm6819_vm2, %v618_v28, %v3776_v47 }
  0xbf   : > { %1463 = vmatpush.bf16.msrb.mxu2 %v3543_v36  ;;  %v1004_v2 = vsel %vm6819_vm2, %v619_v59, %v3777_v25  ;;  %v1056_v18 = vsel %vm6817_vm9, %v1023_v23, %v3721_v6  ;;  %v3747_v20 = vunpack.i.h.bf16 %v4610_v14  ;;  %v3751_v25 = vunpack.i.l.bf16 %v4644_v22 }
  0xc0   : > { %v1024_v11 = vsel %vm6819_vm2, %v639_v31, %v3717_v46  ;;  %v644_v46 = vsel %vm6778_vm1, %v4228_v37, 0.0  ;;  %v3752_v31 = vunpack.i.h.bf16 %v4644_v22  ;;  %vm6783_vm7 = vcmp.ne.s32.totalorder %v4232_v48, 0  ;;  %v3542_v22 = vld [vmem:[%s6644_s1 + $0x30] sm:$0xff] }
  0xc1   : > { %v3780_v41 = vpop.permute.xlu0 %3779  ;;  %v1057_v17 = vsel %vm6817_vm9, %v1024_v11, %v3722_v29  ;;  %v1030_v14 = vsel %vm6819_vm2, %v645_v61, %v3747_v20  ;;  %vm6782_vm1 = vcmp.ne.s32.totalorder %v4234_v50, 0  ;;  %vm6785_vm6 = vcmp.ne.s32.totalorder %v4413_v42, 0 }
  0xc2   : > { %v3782_v52 = vunpack.i.h.bf16 %v3780_v41  ;;  %v3781_v13 = vunpack.i.l.bf16 %v3780_v41  ;;  %v4748_v60 = vpack.c.bf16 %v1057_v17, %v1056_v18  ;;  %v1029_v41 = vsel %vm6819_vm2, %v644_v46, %v3746_v38  ;;  %v3785_v28 = vpop.permute.xlu1 %3784  ;;  %v3790_v18 = vpop.permute.xlu2 %3789  ;;  %v7037_v17 = vld [vmem:[#allocation64_spill] sm:$0xff]  ;;  %v7038_v38 = vld [vmem:[#allocation65_spill] sm:$0xff] }
  0xc3   : > { %vm6784_vm3 = vcmp.ne.s32.totalorder %v4415_v8, 0  ;;  %v1062_v59 = vsel %vm6817_vm9, %v1029_v41, %v3751_v25  ;;  %v1063_v29 = vsel %vm6817_vm9, %v1030_v14, %v3752_v31  ;;  %v3727_v6 = vunpack.i.h.bf16 %v4603_v21  ;;  %1464 = vmatpush.bf16.msrb.mxu2 %v3542_v22 }
  0xc4   : > { %v1036_v57 = vsel %vm6817_vm9, %v1003_v16, %v3781_v13  ;;  %v1037_v36 = vsel %vm6817_vm9, %v1004_v2, %v3782_v52  ;;  %v3726_v11 = vunpack.i.l.bf16 %v4603_v21  ;;  %v4775_v23 = vpack.c.bf16 %v1063_v29, %v1062_v59 }
  0xc5   : > { %v4752_v47 = vpack.c.bf16 %v1037_v36, %v1036_v57  ;;  %v640_v52 = vsel %vm6783_vm7, %v4183_v0, 0.0  ;;  %v641_v13 = vsel %vm6782_vm1, %v4192_v9, 0.0  ;;  %v3787_v2 = vunpack.i.h.bf16 %v3785_v28 }
  0xc6   : > { %v3786_v16 = vunpack.i.l.bf16 %v3785_v28  ;;  %v620_v20 = vsel %vm6785_vm6, %v7037_v17, 0.0  ;;  %v621_v21 = vsel %vm6784_vm3, %v7038_v38, 0.0  ;;  %v3732_v57 = vunpack.i.h.bf16 %v4578_v4 }
  0xc7   : > { %3281 = vmatmul.msk.bf16.gmra.mxu2 %vm6838_vm0, %v4695_v27  ;;  %3345 = vmatmul.msk.bf16.gmra.mxu3 %vm6838_vm0, %v4695_v27  ;;  %v3731_v36 = vunpack.i.l.bf16 %v4578_v4  ;;  %v1026_v46 = vsel %vm6819_vm2, %v641_v13, %v3727_v6  ;;  %v1025_v61 = vsel %vm6819_vm2, %v640_v52, %v3726_v11  ;;  %v3792_v31 = vunpack.i.h.bf16 %v3790_v18  ;;  %v7039_v6 = vld [vmem:[#allocation36_spill] sm:$0xff]  ;;  %v7040_v11 = vld [vmem:[#allocation38_spill] sm:$0xff]  ;;  %v7041_v13 = vld [vmem:[#allocation67_spill] sm:$0xff] }
  0xc8   : > { %3271 = vmatmul.msk.bf16.gmra.mxu0 %vm6838_vm0, %v4697_v24  ;;  %3335 = vmatmul.msk.bf16.gmra.mxu1 %vm6838_vm0, %v4697_v24  ;;  %v3791_v25 = vunpack.i.l.bf16 %v3790_v18  ;;  %v1006_v14 = vsel %vm6819_vm2, %v621_v21, %v3787_v2  ;;  %v1005_v41 = vsel %vm6819_vm2, %v620_v20, %v3786_v16  ;;  %v1059_v22 = vsel %vm6817_vm9, %v1026_v46, %v3732_v57  ;;  %v7042_v2 = vld [vmem:[#allocation68_spill] sm:$0xff]  ;;  %v7043_v20 = vld [vmem:[#allocation33_spill] sm:$0xff] }
  0xc9   : > { %v1058_v28 = vsel %vm6817_vm9, %v1025_v61, %v3731_v36  ;;  %v1039_v29 = vsel %vm6817_vm9, %v1006_v14, %v3792_v31  ;;  %vm6792_vm1 = vcmp.ne.s32.totalorder %v7039_v6, 0  ;;  %vm6791_vm7 = vcmp.ne.s32.totalorder %v7040_v11, 0  ;;  %v3795_v52 = vpop.permute.xlu0 %3794  ;;  %v7044_v57 = vld [vmem:[#allocation44_spill] sm:$0xff] }
  0xca   : > { %v1038_v59 = vsel %vm6817_vm9, %v1005_v41, %v3791_v25  ;;  %v4799_v51 = vpack.c.bf16 %v1059_v22, %v1058_v28  ;;  %vm6816_vm3 = vcmp.ne.s32.totalorder %v7041_v13, 0  ;;  %vm6797_vm6 = vcmp.ne.s32.totalorder %v7042_v2, 0  ;;  %v3800_v31 = vpop.permute.xlu1 %3799  ;;  %v7045_v25 = vld [vmem:[#allocation66_spill] sm:$0xff]  ;;  %v7046_v41 = vld [vmem:[#allocation71_spill] sm:$0xff] }
  0xcb   : > { %v4801_v4 = vpack.c.bf16 %v1039_v29, %v1038_v59  ;;  %v3737_v16 = vunpack.i.h.bf16 %v4622_v19  ;;  %v3736_v18 = vunpack.i.l.bf16 %v4622_v19  ;;  %v642_v21 = vsel %vm6792_vm1, %v7043_v20, 0.0 }
  0xcc   : > { %v643_v36 = vsel %vm6791_vm7, %v7044_v57, 0.0  ;;  %v3797_v46 = vunpack.i.h.bf16 %v3795_v52  ;;  %v3796_v61 = vunpack.i.l.bf16 %v3795_v52  ;;  %v622_v14 = vsel %vm6816_vm3, %v7045_v25, 0.0 }
  0xcd   : > { %v623_v28 = vsel %vm6797_vm6, %v7046_v41, 0.0  ;;  %v3742_v19 = vunpack.i.h.bf16 %v4620_v45  ;;  %v3741_v22 = vunpack.i.l.bf16 %v4620_v45  ;;  %v1028_v59 = vsel %vm6819_vm2, %v643_v36, %v3737_v16  ;;  %v3805_v16 = vpop.permute.xlu2 %3804 }
  0xce   : > { %v1027_v29 = vsel %vm6819_vm2, %v642_v21, %v3736_v18  ;;  %v3802_v37 = vunpack.i.h.bf16 %v3800_v31  ;;  %v3801_v57 = vunpack.i.l.bf16 %v3800_v31  ;;  %v1008_v52 = vsel %vm6819_vm2, %v623_v28, %v3797_v46  ;;  %v7047_v18 = vld [vmem:[#allocation74_spill] sm:$0xff] }
  0xcf   : > { %v1007_v20 = vsel %vm6819_vm2, %v622_v14, %v3796_v61  ;;  %v1060_v9 = vsel %vm6817_vm9, %v1027_v29, %v3741_v22  ;;  %v1061_v0 = vsel %vm6817_vm9, %v1028_v59, %v3742_v19  ;;  %vm6794_vm7 = vcmp.ne.s32.totalorder %v7047_v18, 0  ;;  %v7050_v21 = vld [vmem:[#allocation70_spill] sm:$0xff] }
  0xd0   : > { %v1040_v40 = vsel %vm6817_vm9, %v1007_v20, %v3801_v57  ;;  %v1041_v39 = vsel %vm6817_vm9, %v1008_v52, %v3802_v37  ;;  %v4839_v41 = vpack.c.bf16 %v1061_v0, %v1060_v9  ;;  %v7048_v37 = vld [vmem:[#allocation75_spill] sm:$0xff]  ;;  %v3807_v0 = vunpack.i.h.bf16 %v3805_v16  ;;  %v7049_v9 = vld [vmem:[#allocation69_spill] sm:$0xff] }
  0xd1   : > { %v4841_v45 = vpack.c.bf16 %v1041_v39, %v1040_v40  ;;  %vm6793_vm1 = vcmp.ne.s32.totalorder %v7048_v37, 0  ;;  %v3806_v39 = vunpack.i.l.bf16 %v3805_v16  ;;  %v3810_v40 = vpop.permute.xlu0 %3809  ;;  %v624_v20 = vsel %vm6794_vm7, %v7049_v9, 0.0  ;;  %v7051_v16 = vld [vmem:[#allocation76_spill] sm:$0xff] }
  0xd2   : > { %v625_v57 = vsel %vm6793_vm1, %v7050_v21, 0.0  ;;  %v3812_v36 = vunpack.i.h.bf16 %v3810_v40  ;;  %v3811_v46 = vunpack.i.l.bf16 %v3810_v40  ;;  %vm6796_vm1 = vcmp.ne.s32.totalorder %v4570_v26, 0 }
  0xd3   : > { %v1010_v61 = vsel %vm6819_vm2, %v625_v57, %v3807_v0  ;;  %v1009_v31 = vsel %vm6819_vm2, %v624_v20, %v3806_v39  ;;  %vm6795_vm7 = vcmp.ne.s32.totalorder %v4582_v49, 0  ;;  %v626_v0 = vsel %vm6796_vm1, %v7051_v16, 0.0  ;;  %v7052_v39 = vld [vmem:[#allocation77_spill] sm:$0xff] }
  0xd4   : > { %v1042_v14 = vsel %vm6817_vm9, %v1009_v31, %v3811_v46  ;;  %v1043_v28 = vsel %vm6817_vm9, %v1010_v61, %v3812_v36  ;;  %v627_v40 = vsel %vm6795_vm7, %v7052_v39, 0.0  ;;  %vm6810_vm1 = vcmp.ne.s32.totalorder %v4532_v3, 0 }
  0xd5   : > { %v4863_v19 = vpack.c.bf16 %v1043_v28, %v1042_v14  ;;  %v3815_v22 = vpop.permute.xlu1 %3814  ;;  %vm6874_vm6 = vcmp.lt.s32.totalorder %v4044_v1, 1  ;;  %vm5022_vm3 = vcmp.ne.s32.totalorder %v262_v62, 7 }
  0xd6   : > { %v3817_v59 = vunpack.i.h.bf16 %v3815_v22  ;;  %v3816_v29 = vunpack.i.l.bf16 %v3815_v22  ;;  %v7053_v22 = vld [vmem:[#allocation82_spill] sm:$0xff] }
  0xd7   : > { %3282 = vmatmul.msk.bf16.gmra.mxu2 %vm6838_vm0, %v4748_v60  ;;  %3346 = vmatmul.msk.bf16.gmra.mxu3 %vm6838_vm0, %v4748_v60  ;;  %vm6815_vm7 = vcmp.ne.s32.totalorder %v7053_v22, 0 }
  0xd8   : > { %3272 = vmatmul.msk.bf16.gmra.mxu0 %vm6838_vm0, %v4752_v47  ;;  %3336 = vmatmul.msk.bf16.gmra.mxu1 %vm6838_vm0, %v4752_v47  ;;  %v1012_v36 = vsel %vm6819_vm2, %v627_v40, %v3817_v59  ;;  %v1011_v46 = vsel %vm6819_vm2, %v626_v0, %v3816_v29  ;;  %v629_v40 = vsel %vm6810_vm1, %v4522_v12, 0.0  ;;  %vm5005_vm1 = vcmp.ne.s32.totalorder %v262_v62, 0 }
  0xd9   : > { %v3825_v28 = vpop.permute.xlu0 %3824 }
  0xda   : > { %v3827_v29 = vunpack.i.h.bf16 %v3825_v28 }
  0xdd   : > { %v3830_v0 = vpop.permute.xlu1 %3829 }
  0xe7   : > { %3283 = vmatmul.msk.bf16.gmra.mxu2 %vm6838_vm0, %v4799_v51  ;;  %3347 = vmatmul.msk.bf16.gmra.mxu3 %vm6838_vm0, %v4799_v51 }
  0xe8   : > { %3273 = vmatmul.msk.bf16.gmra.mxu0 %vm6838_vm0, %v4801_v4  ;;  %3337 = vmatmul.msk.bf16.gmra.mxu1 %vm6838_vm0, %v4801_v4 }
  0xf4   : > { %v3820_v52 = vpop.permute.xlu2 %3819 }
  0xf5   : > { %v3822_v20 = vunpack.i.h.bf16 %v3820_v52  ;;  %v3821_v57 = vunpack.i.l.bf16 %v3820_v52  ;;  %v3826_v52 = vunpack.i.l.bf16 %v3825_v28 }
  0xf7   : > { %3284 = vmatmul.msk.bf16.gmra.mxu2 %vm6838_vm0, %v4839_v41  ;;  %3348 = vmatmul.msk.bf16.gmra.mxu3 %vm6838_vm0, %v4839_v41  ;;  %v1044_v61 = vsel %vm6817_vm9, %v1011_v46, %v3821_v57  ;;  %v1045_v31 = vsel %vm6817_vm9, %v1012_v36, %v3822_v20  ;;  %v3832_v20 = vunpack.i.h.bf16 %v3830_v0  ;;  %v3831_v57 = vunpack.i.l.bf16 %v3830_v0 }
  0xf8   : > { %3274 = vmatmul.msk.bf16.gmra.mxu0 %vm6838_vm0, %v4841_v45  ;;  %3338 = vmatmul.msk.bf16.gmra.mxu1 %vm6838_vm0, %v4841_v45  ;;  %v4885_v14 = vpack.c.bf16 %v1045_v31, %v1044_v61  ;;  %v1014_v36 = vsel %vm6819_vm2, %v629_v40, %v3827_v29 }
  0xf9   : > { %v1047_v31 = vsel %vm6817_vm9, %v1014_v36, %v3832_v20 }
 0x107   : > { %3285 = vmatmul.msk.bf16.gmra.mxu2 %vm6838_vm0, %v4775_v23  ;;  %3349 = vmatmul.msk.bf16.gmra.mxu3 %vm6838_vm0, %v4775_v23 }
 0x108   : > { %3275 = vmatmul.msk.bf16.gmra.mxu0 %vm6838_vm0, %v4863_v19  ;;  %3339 = vmatmul.msk.bf16.gmra.mxu1 %vm6838_vm0, %v4863_v19 }
 0x117   : > { %3374 = vmatmul.msk.bf16.vlgmr.msrb.gmra.mxu2 %vm6838_vm0, %v4654_v15  ;;  %v628_v15 = vsel %vm6815_vm7, %v4496_v63, 0.0  ;;  %vm6844_vm7 = vcmp.lt.s32.totalorder %v4044_v1, 7 }
 0x118   : > { %3276 = vmatmul.msk.bf16.gmra.mxu0 %vm6838_vm0, %v4885_v14  ;;  %3340 = vmatmul.msk.bf16.gmra.mxu1 %vm6838_vm0, %v4885_v14  ;;  %v1013_v46 = vsel %vm6819_vm2, %v628_v15, %v3826_v52 }
 0x119   : > { %v1046_v61 = vsel %vm6817_vm9, %v1013_v46, %v3831_v57 }
 0x11a   : > { %v4895_v59 = vpop.f32.mrf.mxu2  ;;  %v1071_v16 = vpack.c.bf16 %v1047_v31, %v1046_v61 }
 0x11b   : > { %v6799_v39 = vrot.slane %v4895_v59, 7 }
 0x122   : > { %v1228_v28 = vpop.f32.mrf.mxu2 }
 0x123   : > { %v1563_v63 = vrot.slane %v1228_v28, 7 }
 0x125   : > { %v4913_v0 = vsel %vm6874_vm6, %v6799_v39, %v1563_v63 }
 0x127   : > { %3375 = vmatmul.msk.bf16.gmra.mxu2 %vm6838_vm0, %v4697_v24 }
 0x128   : > { %3277 = vmatmul.msk.bf16.gmra.mxu0 %vm6838_vm0, %v1071_v16  ;;  %3341 = vmatmul.msk.bf16.gmra.mxu1 %vm6838_vm0, %v1071_v16 }
 0x12a   : > { %v1231_v29 = vpop.f32.mrf.mxu2 }
 0x12b   : > { %v1564_v52 = vrot.slane %v1231_v29, 7 }
 0x12d   : > { %v4921_v15 = vsel %vm6874_vm6, %v1563_v63, %v1564_v52 }
 0x132   : > { %v1233_v40 = vpop.f32.mrf.mxu2 }
 0x133   : > { %v1565_v20 = vrot.slane %v1233_v40, 7 }
 0x135   : > { %v4925_v57 = vsel %vm6874_vm6, %v1564_v52, %v1565_v20  ;;  %v1186_v12 = vpop.f32.mrf.mxu0 }
 0x137   : > { %3376 = vmatmul.msk.bf16.gmra.mxu2 %vm6838_vm0, %v4752_v47 }
 0x13a   : > { %v1236_v24 = vpop.f32.mrf.mxu2 }
 0x13b   : > { %v1566_v36 = vrot.slane %v1236_v24, 7 }
 0x13d   : > { %v4931_v46 = vsel %vm6874_vm6, %v1565_v20, %v1566_v36 }
 0x142   : > { %v1238_v61 = vpop.f32.mrf.mxu2 }
 0x143   : > { %v1567_v31 = vrot.slane %v1238_v61, 7 }
 0x145   : > { %v4935_v63 = vsel %vm6874_vm6, %v1566_v36, %v1567_v31 }
 0x147   : > { %3377 = vmatmul.msk.bf16.gmra.mxu2 %vm6838_vm0, %v4801_v4 }
 0x14a   : > { %v1241_v28 = vpop.f32.mrf.mxu2 }
 0x14b   : > { %v1568_v29 = vrot.slane %v1241_v28, 7 }
 0x14d   : > { %v4941_v47 = vsel %vm6874_vm6, %v1567_v31, %v1568_v29 }
 0x152   : > { %v1243_v52 = vpop.f32.mrf.mxu2 }
 0x153   : > { %v1569_v40 = vrot.slane %v1243_v52, 7 }
 0x155   : > { %v4945_v20 = vsel %vm6874_vm6, %v1568_v29, %v1569_v40 }
 0x157   : > { %3378 = vmatmul.msk.bf16.gmra.mxu2 %vm6838_vm0, %v4841_v45 }
 0x15a   : > { %v1246_v24 = vpop.f32.mrf.mxu2 }
 0x15b   : > { %v1570_v36 = vrot.slane %v1246_v24, 7  ;;  %v4963_v24 = vpop.f32.mrf.mxu1 }
 0x15c   : > { %7054 = vst [vmem:[#allocation67_spill] sm:$0xff] %v4963_v24  ;;  %v6820_v50 = vrot.slane %v4963_v24, 1 }
 0x15d   : > { %v4951_v4 = vsel %vm6874_vm6, %v1569_v40, %v1570_v36 }
 0x162   : > { %v1248_v61 = vpop.f32.mrf.mxu2 }
 0x163   : > { %v1571_v28 = vrot.slane %v1248_v61, 7 }
 0x165   : > { %v4955_v31 = vsel %vm6874_vm6, %v1570_v36, %v1571_v28  ;;  %v1339_v36 = vpop.f32.mrf.mxu1 }
 0x166   : > { %v1740_v11 = vrot.slane %v1339_v36, 1 }
 0x167   : > { %3379 = vmatmul.msk.bf16.gmra.mxu2 %vm6838_vm0, %v4863_v19 }
 0x168   : > { %v1802_v36 = vsel %vm6844_vm7, %v6820_v50, %v1740_v11  ;;  %v7071_v50 = vmov 0 }
 0x16a   : > { %v1251_v29 = vpop.f32.mrf.mxu2 }
 0x16b   : > { %v1572_v52 = vrot.slane %v1251_v29, 7 }
 0x16d   : > { %v4961_v45 = vsel %vm6874_vm6, %v1571_v28, %v1572_v52  ;;  %v1188_v28 = vpop.f32.mrf.mxu0  ;;  %v1342_v38 = vpop.f32.mrf.mxu1 }
 0x172   : > { %v1253_v39 = vpop.f32.mrf.mxu2 }
 0x173   : > { %v1573_v40 = vrot.slane %v1253_v39, 7 }
 0x175   : > { %v4967_v61 = vsel %vm6874_vm6, %v1572_v52, %v1573_v40  ;;  %v4980_v52 = vpop.f32.mrf.mxu0 }
 0x176   : > { %7055 = vst [vmem:[#allocation68_spill] sm:$0xff] %v4967_v61  ;;  %v7074_v61 = vld [vmem:[#allocation46_spill] sm:$0xff] }
 0x177   : > { %3380 = vmatmul.msk.bf16.gmra.mxu2 %vm6838_vm0, %v4885_v14 }
 0x17a   : > { %v1256_v19 = vpop.f32.mrf.mxu2 }
 0x17b   : > { %v1574_v21 = vrot.slane %v1256_v19, 7 }
 0x17d   : > { %v4973_v29 = vsel %vm6874_vm6, %v1573_v40, %v1574_v21  ;;  %v4986_v40 = vpop.f32.mrf.mxu1  ;;  %v4988_v58 = vpop.f32.mrf.mxu0 }
 0x17e   : > { %7056 = vst [vmem:[#allocation74_spill] sm:$0xff] %v4973_v29  ;;  %v1742_v54 = vrot.slane %v4986_v40, 1 }
 0x182   : > { %v1258_v9 = vpop.f32.mrf.mxu2 }
 0x183   : > { %v1575_v25 = vrot.slane %v1258_v9, 7 }
 0x185   : > { %v4977_v39 = vsel %vm6874_vm6, %v1574_v21, %v1575_v25  ;;  %v4992_v21 = vpop.f32.mrf.mxu1  ;;  %v5013_v48 = vpop.f32.mrf.mxu0 }
 0x186   : > { %7057 = vst [vmem:[#allocation82_spill] sm:$0xff] %v4977_v39 }
 0x187   : > { %3381 = vmatmul.msk.bf16.gmra.mxu2 %vm6838_vm0, %v1071_v16  ;;  %v1546_v16 = vrot.slane %v1186_v12, 7 }
 0x18a   : > { %v1261_v14 = vpop.f32.mrf.mxu2 }
 0x18b   : > { %v1576_v17 = vrot.slane %v1261_v14, 7  ;;  %v4998_v14 = vld [vmem:[%s6645_s2] ss:$0 sm:$0xff] }
 0x18d   : > { %v4984_v19 = vsel %vm6874_vm6, %v1575_v25, %v1576_v17 }
 0x18e   : > { %7058 = vst [vmem:[#allocation87_spill] sm:$0xff] %v4984_v19  ;;  %v1547_v19 = vrot.slane %v1188_v28, 7 }
 0x192   : > { %v1263_v7 = vpop.f32.mrf.mxu2 }
 0x193   : > { %v1577_v9 = vrot.slane %v1263_v7, 7  ;;  %v7061_v7 = vld [vmem:[#allocation49_spill] sm:$0xff] }
 0x194   : > { %v263_v6 = vand.u32 7, %v7061_v7  ;;  %v7068_v7 = vmov 0 }
 0x195   : > { %v5002_v25 = vsel %vm6874_vm6, %v1576_v17, %v1577_v9  ;;  %v1610_v39 = vsel %vm6874_vm6, %v1577_v9, %v1546_v16  ;;  %v1741_v17 = vrot.slane %v1342_v38, 1  ;;  %v1609_v38 = vsel %vm6874_vm6, %v1546_v16, %v1547_v19 }
 0x196   : > { %7060 = vst [vmem:[#allocation85_spill] sm:$0xff] %v5002_v25  ;;  %v1675_v28 = vsel %vm5005_vm1, %v1610_v39, 0.0  ;;  %vm5026_vm9 = vcmp.ne.s32.totalorder %v263_v6, 0  ;;  %v5032_v25 = vpop.f32.mrf.mxu1  ;;  %vm5034_vm2 = vcmp.ne.s32.totalorder %v263_v6, 7  ;;  %v1548_v16 = vrot.slane %v4980_v52, 7 }
 0x197   : > { %3382 = vmatmul.msk.bf16.gmra.mxu2 %vm6838_vm0, %v7059_v30  ;;  %v7062_v30 = vmov 0  ;;  %v7069_v7 = vsel %vm5026_vm9, 4294967295, %v7068_v7  ;;  %v7072_v50 = vsel %vm5034_vm2, 4294967295, %v7071_v50  ;;  %v1801_v62 = vsel %vm6844_vm7, %v1740_v11, %v1741_v17 }
 0x198   : > { %v7063_v30 = vsel %vm5005_vm1, 4294967295, %v7062_v30  ;;  %7070 = vst [vmem:[#allocation89_spill] sm:$0xff] %v7069_v7  ;;  %v264_v6 = vand.u32 7, %v7074_v61  ;;  %v1869_v56 = vsel %vm5034_vm2, %v1801_v62, 0.0  ;;  %v7076_v52 = vmov 0 }
 0x199   : > { %7064 = vst [vmem:[#allocation49_spill] sm:$0xff] %v7063_v30  ;;  %v1608_v61 = vsel %vm6874_vm6, %v1547_v19, %v1548_v16  ;;  %v1549_v19 = vrot.slane %v4988_v58, 7  ;;  %vm7119_vm1 = vcmp.lt.s32.totalorder %v4044_v1, 7 }
 0x19a   : > { %v1466_v10 = vpop.f32.mrf.mxu2  ;;  %7073 = vst [vmem:[#allocation90_spill] sm:$0xff] %v7072_v50  ;;  %vm5058_vm8 = vcmp.ne.s32.totalorder %v264_v6, 0  ;;  %vm5066_vm4 = vcmp.ne.s32.totalorder %v264_v6, 7  ;;  %v1743_v6 = vrot.slane %v4992_v21, 1  ;;  %v1744_v50 = vrot.slane %v5032_v25, 1 }
 0x19b   : > { %v1467_v12 = vadd.f32 %v4998_v14, %v1466_v10  ;;  %v7065_v10 = vmov 0  ;;  %v7077_v52 = vsel %vm5058_vm8, 4294967295, %v7076_v52  ;;  %v1677_v62 = vsel %vm5058_vm8, %v1608_v61, 0.0 }
 0x19c   : > { %v7066_v10 = vsel %vm5022_vm3, 4294967295, %v7065_v10  ;;  %7078 = vst [vmem:[#allocation91_spill] sm:$0xff] %v7077_v52  ;;  %v1607_v58 = vsel %vm6874_vm6, %v1548_v16, %v1549_v19  ;;  %v7086_v61 = vmov 0  ;;  %v1799_v21 = vsel %vm6844_vm7, %v1742_v54, %v1743_v6 }
 0x19d   : > { %7067 = vst [vmem:[#allocation88_spill] sm:$0xff] %v7066_v10  ;;  %v1707_v9 = vadd.f32 %v1675_v28, %v1467_v12  ;;  %v1868_v12 = vsel %vm5022_vm3, %v1802_v36, 0.0  ;;  %v1676_v28 = vsel %vm5026_vm9, %v1609_v38, 0.0  ;;  %v7083_v10 = vmov 0 }
 0x19f   : > { %v1900_v30 = vadd.f32 %v1868_v12, %v1707_v9 }
 0x1a1   : > { %v5054_v36 = vmax.f32 %v1900_v30, 0.0  ;;  %v5073_v30 = vpop.f32.mrf.mxu1 }
 0x1a2   : > { %v1468_v24 = vpop.f32.mrf.mxu2 }
 0x1a3   : > { %v1469_v39 = vadd.f32 %v4998_v14, %v1468_v24  ;;  %v5052_v24 = vpop.f32.mrf.mxu0  ;;  %7075 = vst [vmem:[#allocation46_spill] sm:$0xff] %v5054_v36 }
 0x1a5   : > { %v1708_v29 = vadd.f32 %v1676_v28, %v1469_v39  ;;  %v7082_v39 = vld [vmem:[#allocation47_spill] sm:$0xff] }
 0x1a6   : > { %v265_v12 = vand.u32 7, %v7082_v39 }
 0x1a7   : > { %v1901_v11 = vadd.f32 %v1869_v56, %v1708_v29  ;;  %3383 = vmatmul.msk.bf16.gmra.mxu2 %vm6838_vm0, %v4612_v44  ;;  %v1800_v56 = vsel %vm6844_vm7, %v1741_v17, %v1742_v54  ;;  %v7079_v29 = vmov 0 }
 0x1a8   : > { %v7080_v29 = vsel %vm5066_vm4, 4294967295, %v7079_v29  ;;  %v1870_v17 = vsel %vm5066_vm4, %v1800_v56, 0.0  ;;  %vm5085_vm5 = vcmp.ne.s32.totalorder %v265_v12, 0  ;;  %vm5091_vm12 = vcmp.ne.s32.totalorder %v265_v12, 7 }
 0x1a9   : > { %v5056_v38 = vmax.f32 %v1901_v11, 0.0  ;;  %7081 = vst [vmem:[#allocation92_spill] sm:$0xff] %v7080_v29  ;;  %v7084_v10 = vsel %vm5085_vm5, 4294967295, %v7083_v10  ;;  %v7087_v61 = vsel %vm5091_vm12, 4294967295, %v7086_v61  ;;  %v1678_v12 = vsel %vm5085_vm5, %v1607_v58, 0.0  ;;  %v7090_v29 = vld [vmem:[#allocation55_spill] sm:$0xff] }
 0x1aa   : > { %v1471_v9 = vpop.f32.mrf.mxu2  ;;  %7085 = vst [vmem:[#allocation47_spill] sm:$0xff] %v7084_v10  ;;  %v266_v52 = vand.u32 7, %v7090_v29  ;;  %v1871_v54 = vsel %vm5091_vm12, %v1799_v21, 0.0 }
 0x1ab   : > { %v1472_v44 = vadd.f32 %v4998_v14, %v1471_v9  ;;  %v3833_v40 = vpack.i.bf16 %v5056_v38, %v5054_v36  ;;  %7088 = vst [vmem:[#allocation93_spill] sm:$0xff] %v7087_v61 }
 0x1ad   : > { %v1709_v28 = vadd.f32 %v1677_v62, %v1472_v44  ;;  %3834 = vrot.lane.b32.xlu2 %v3833_v40, %s4004_s25  ;;  %v5095_v44 = vpop.f32.mrf.mxu0  ;;  %v1996_v62 = vsel %vm454_vm11, %v5056_v38, 0.0  ;;  %vm5128_vm11 = vcmp.ne.s32.totalorder %v266_v52, 7 }
 0x1af   : > { %v1902_v11 = vadd.f32 %v1870_v17, %v1709_v28  ;;  %v1550_v17 = vrot.slane %v5013_v48, 7  ;;  %v7091_v48 = vmov 0 }
 0x1b1   : > { %v5083_v9 = vmax.f32 %v1902_v11, 0.0  ;;  %v1606_v29 = vsel %vm6874_vm6, %v1549_v19, %v1550_v17  ;;  %v1551_v19 = vrot.slane %v5052_v24, 7 }
 0x1b2   : > { %v1473_v40 = vpop.f32.mrf.mxu2 }
 0x1b3   : > { %v1474_v56 = vadd.f32 %v4998_v14, %v1473_v40  ;;  %v1997_v16 = vsel %vm455_vm10, %v5083_v9, 0.0  ;;  %v5112_v40 = vpop.f32.mrf.mxu1  ;;  %vm5120_vm10 = vcmp.ne.s32.totalorder %v266_v52, 0  ;;  %v1605_v24 = vsel %vm6874_vm6, %v1550_v17, %v1551_v19 }
 0x1b4   : > { %v3838_v28 = vpack.i.bf16 %v1997_v16, %v1996_v62  ;;  %v7092_v48 = vsel %vm5120_vm10, 4294967295, %v7091_v48  ;;  %v7094_v62 = vmov 0  ;;  %v1679_v16 = vsel %vm5120_vm10, %v1606_v29, 0.0 }
 0x1b5   : > { %v1710_v11 = vadd.f32 %v1678_v12, %v1474_v56  ;;  %7093 = vst [vmem:[#allocation55_spill] sm:$0xff] %v7092_v48  ;;  %v1798_v56 = vsel %vm6844_vm7, %v1743_v6, %v1744_v50  ;;  %v7095_v62 = vsel %vm5128_vm11, 4294967295, %v7094_v62  ;;  %v7097_v12 = vld [vmem:[#allocation56_spill] sm:$0xff]  ;;  %v1745_v6 = vrot.slane %v5073_v30, 1 }
 0x1b6   : > { %3839 = vrot.lane.b32.xlu0 %v3838_v28, %s4005_s26  ;;  %7096 = vst [vmem:[#allocation94_spill] sm:$0xff] %v7095_v62  ;;  %v267_v28 = vand.u32 7, %v7097_v12  ;;  %v1872_v52 = vsel %vm5128_vm11, %v1798_v56, 0.0  ;;  %v7098_v48 = vmov 0  ;;  %v7101_v29 = vmov 0 }
 0x1b7   : > { %v1903_v7 = vadd.f32 %v1871_v54, %v1710_v11  ;;  %3384 = vmatmul.msk.bf16.gmra.mxu2 %vm6838_vm0, %v4650_v5  ;;  %v1797_v30 = vsel %vm6844_vm7, %v1744_v50, %v1745_v6  ;;  %v1746_v62 = vrot.slane %v5112_v40, 1  ;;  %v7109_v40 = vmov 0 }
 0x1b8   : > { %vm5149_vm13 = vcmp.ne.s32.totalorder %v267_v28, 0  ;;  %vm5155_vm0 = vcmp.ne.s32.totalorder %v267_v28, 7  ;;  %v1552_v28 = vrot.slane %v5095_v44, 7  ;;  %v7106_v44 = vmov 0 }
 0x1b9   : > { %v5118_v58 = vmax.f32 %v1903_v7, 0.0  ;;  %v5135_v7 = vpop.f32.mrf.mxu0  ;;  %v7099_v48 = vsel %vm5149_vm13, 4294967295, %v7098_v48  ;;  %v7102_v29 = vsel %vm5155_vm0, 4294967295, %v7101_v29  ;;  %v1680_v17 = vsel %vm5149_vm13, %v1605_v24, 0.0 }
 0x1ba   : > { %v1476_v21 = vpop.f32.mrf.mxu2  ;;  %7100 = vst [vmem:[#allocation56_spill] sm:$0xff] %v7099_v48  ;;  %v1873_v50 = vsel %vm5155_vm0, %v1797_v30, 0.0 }
 0x1bb   : > { %v1477_v25 = vadd.f32 %v4998_v14, %v1476_v21  ;;  %v3843_v5 = vpack.i.bf16 %v5118_v58, %v5083_v9  ;;  %v5145_v21 = vpop.f32.mrf.mxu1  ;;  %7103 = vst [vmem:[#allocation95_spill] sm:$0xff] %v7102_v29 }
 0x1bd   : > { %v1711_v11 = vadd.f32 %v1679_v16, %v1477_v25  ;;  %3844 = vrot.lane.b32.xlu1 %v3843_v5, %s4004_s25  ;;  %v1998_v5 = vsel %vm456_vm14, %v5118_v58, 0.0  ;;  %vm7105_vm14 = vcmask 785408  }
 0x1bf   : > { %v1904_v54 = vadd.f32 %v1872_v52, %v1711_v11  ;;  %v7104_v52 = vld [vmem:[#allocation62_spill] sm:$0xff] }
 0x1c1   : > { %v5147_v61 = vmax.f32 %v1904_v54, 0.0  ;;  %v268_v54 = vand.u32 7, %v7104_v52 }
 0x1c2   : > { %v1478_v25 = vpop.f32.mrf.mxu2 }
 0x1c3   : > { %v1479_v56 = vadd.f32 %v4998_v14, %v1478_v25  ;;  %v1999_v16 = vsel %vm457_vm15, %v5147_v61, 0.0  ;;  %v5174_v25 = vpop.f32.mrf.mxu0  ;;  %vm5182_vm15 = vcmp.ne.s32.totalorder %v268_v54, 0  ;;  %v1359_v30 = vpop.f32.mrf.mxu1  ;;  %vm5190_vm3 = vcmp.ne.s32.totalorder %v268_v54, 7 }
 0x1c4   : > { %v3848_v12 = vpack.i.bf16 %v1999_v16, %v1998_v5  ;;  %v7107_v44 = vsel %vm5182_vm15, 4294967295, %v7106_v44  ;;  %v1796_v16 = vsel %vm6844_vm7, %v1745_v6, %v1746_v62  ;;  %v7110_v40 = vsel %vm5190_vm3, 4294967295, %v7109_v40 }
 0x1c5   : > { %v1712_v11 = vadd.f32 %v1680_v17, %v1479_v56  ;;  %7108 = vst [vmem:[#allocation62_spill] sm:$0xff] %v7107_v44  ;;  %v1604_v56 = vsel %vm6874_vm6, %v1551_v19, %v1552_v28  ;;  %v7112_v19 = vld [vmem:[#allocation63_spill] sm:$0xff]  ;;  %v1874_v6 = vsel %vm5190_vm3, %v1796_v16, 0.0  ;;  %v1747_v54 = vrot.slane %v5145_v21, 1 }
 0x1c6   : > { %3849 = vrot.lane.b32.xlu2 %v3848_v12, %s4005_s26  ;;  %7111 = vst [vmem:[#allocation96_spill] sm:$0xff] %v7110_v40  ;;  %v1681_v17 = vsel %vm5182_vm15, %v1604_v56, 0.0  ;;  %v1553_v12 = vrot.slane %v5135_v7, 7  ;;  %v7113_v44 = vmov 0  ;;  %v7116_v56 = vmov 0 }
 0x1c7   : > { %v1905_v10 = vadd.f32 %v1873_v50, %v1712_v11  ;;  %3385 = vmatmul.msk.bf16.gmra.mxu2 %vm7105_vm14, %v4695_v27  ;;  %v269_v11 = vand.u32 7, %v7112_v19  ;;  %v1795_v21 = vsel %vm7119_vm1, %v1746_v62, %v1747_v54  ;;  %vm7120_vm3 = vcmp.ne.s32.totalorder %v4365_v53, 7 }
 0x1c8   : > { %v1603_v7 = vsel %vm6874_vm6, %v1552_v28, %v1553_v12  ;;  %vm7121_vm15 = vcmp.ne.s32.totalorder %v4367_v55, 7  ;;  %v1748_v40 = vrot.slane %v1359_v30, 1  ;;  %vm7123_vm1 = vcmask 785408  }
 0x1c9   : > { %v5180_v24 = vmax.f32 %v1905_v10, 0.0  ;;  %vm5209_vm14 = vcmp.ne.s32.totalorder %v269_v11, 0  ;;  %vm5215_vm7 = vcmp.ne.s32.totalorder %v269_v11, 7  ;;  %v7128_v30 = vmov 0 }
 0x1ca   : > { %v1481_v5 = vpop.f32.mrf.mxu2  ;;  %v7114_v44 = vsel %vm5209_vm14, 4294967295, %v7113_v44  ;;  %v7117_v56 = vsel %vm5215_vm7, 4294967295, %v7116_v56  ;;  %v1682_v28 = vsel %vm5209_vm14, %v1603_v7, 0.0  ;;  %v7124_v7 = vmov 0 }
 0x1cb   : > { %v1482_v27 = vadd.f32 %v4998_v14, %v1481_v5  ;;  %v3853_v10 = vpack.i.bf16 %v5180_v24, %v5147_v61  ;;  %v5205_v5 = vpop.f32.mrf.mxu0  ;;  %7115 = vst [vmem:[#allocation63_spill] sm:$0xff] %v7114_v44  ;;  %v1362_v19 = vpop.f32.mrf.mxu1  ;;  %vm7139_vm14 = vcmp.ne.s32.totalorder %v4415_v8, 7 }
 0x1cc   : > { %7118 = vst [vmem:[#allocation97_spill] sm:$0xff] %v7117_v56  ;;  %v7132_v56 = vmov 0 }
 0x1cd   : > { %v1713_v52 = vadd.f32 %v1681_v17, %v1482_v27  ;;  %3854 = vrot.lane.b32.xlu0 %v3853_v10, %s4004_s25  ;;  %v2000_v10 = vsel %vm7120_vm3, %v5180_v24, 0.0 }
 0x1cf   : > { %v1906_v50 = vadd.f32 %v1874_v6, %v1713_v52  ;;  %v1554_v52 = vrot.slane %v5174_v25, 7 }
 0x1d1   : > { %v5207_v29 = vmax.f32 %v1906_v50, 0.0  ;;  %v7122_v50 = vld [vmem:[#allocation60_spill] sm:$0xff]  ;;  %v1602_v25 = vsel %vm6874_vm6, %v1553_v12, %v1554_v52 }
 0x1d2   : > { %v1483_v27 = vpop.f32.mrf.mxu2  ;;  %v270_v62 = vand.u32 7, %v7122_v50 }
 0x1d3   : > { %v1484_v16 = vadd.f32 %v4998_v14, %v1483_v27  ;;  %v2001_v17 = vsel %vm7121_vm15, %v5207_v29, 0.0  ;;  %v1875_v27 = vsel %vm5215_vm7, %v1795_v21, 0.0  ;;  %vm7127_vm15 = vcmp.lt.s32.totalorder %v4044_v1, 7  ;;  %v1364_v50 = vpop.f32.mrf.mxu1 }
 0x1d4   : > { %v3858_v11 = vpack.i.bf16 %v2001_v17, %v2000_v10  ;;  %vm5239_vm3 = vcmp.ne.s32.totalorder %v270_v62, 0  ;;  %v1794_v21 = vsel %vm7127_vm15, %v1747_v54, %v1748_v40  ;;  %vm5247_vm7 = vcmp.ne.s32.totalorder %v270_v62, 7 }
 0x1d5   : > { %v1714_v6 = vadd.f32 %v1682_v28, %v1484_v16  ;;  %v7125_v7 = vsel %vm5239_vm3, 4294967295, %v7124_v7  ;;  %v1211_v16 = vpop.f32.mrf.mxu0  ;;  %v7129_v30 = vsel %vm5247_vm7, 4294967295, %v7128_v30  ;;  %v1683_v17 = vsel %vm5239_vm3, %v1602_v25, 0.0 }
 0x1d6   : > { %3859 = vrot.lane.b32.xlu1 %v3858_v11, %s4005_s26  ;;  %7126 = vst [vmem:[#allocation60_spill] sm:$0xff] %v7125_v7  ;;  %v1555_v28 = vrot.slane %v5205_v5, 7  ;;  %v7131_v11 = vld [vmem:[#allocation61_spill] sm:$0xff]  ;;  %v1749_v54 = vrot.slane %v1362_v19, 1  ;;  %v1876_v62 = vsel %vm5247_vm7, %v1794_v21, 0.0  ;;  %v7135_v19 = vmov 0 }
 0x1d7   : > { %v1907_v48 = vadd.f32 %v1875_v27, %v1714_v6  ;;  %3386 = vmatmul.msk.bf16.gmra.mxu2 %vm7123_vm1, %v4748_v60  ;;  %7130 = vst [vmem:[#allocation98_spill] sm:$0xff] %v7129_v30  ;;  %v271_v6 = vand.u32 7, %v7131_v11  ;;  %vm7138_vm7 = vcmp.ne.s32.totalorder %v4413_v42, 7  ;;  %v1556_v11 = vrot.slane %v1211_v16, 7 }
 0x1d8   : > { %v1601_v5 = vsel %vm6874_vm6, %v1554_v52, %v1555_v28  ;;  %v1793_v25 = vsel %vm7127_vm15, %v1748_v40, %v1749_v54  ;;  %v1750_v30 = vrot.slane %v1364_v50, 1  ;;  %v7145_v50 = vmov 0 }
 0x1d9   : > { %v5237_v43 = vmax.f32 %v1907_v48, 0.0  ;;  %vm5263_vm1 = vcmp.ne.s32.totalorder %v271_v6, 0  ;;  %vm5271_vm3 = vcmp.ne.s32.totalorder %v271_v6, 7  ;;  %v1600_v16 = vsel %vm6874_vm6, %v1555_v28, %v1556_v11 }
 0x1da   : > { %v1486_v10 = vpop.f32.mrf.mxu2  ;;  %v7133_v56 = vsel %vm5263_vm1, 4294967295, %v7132_v56  ;;  %v7136_v19 = vsel %vm5271_vm3, 4294967295, %v7135_v19  ;;  %v1684_v52 = vsel %vm5263_vm1, %v1601_v5, 0.0  ;;  %v7142_v5 = vmov 0 }
 0x1db   : > { %v1487_v60 = vadd.f32 %v4998_v14, %v1486_v10  ;;  %v3863_v48 = vpack.i.bf16 %v5237_v43, %v5207_v29  ;;  %7134 = vst [vmem:[#allocation61_spill] sm:$0xff] %v7133_v56  ;;  %v1367_v44 = vpop.f32.mrf.mxu1  ;;  %vm7156_vm1 = vcmp.ne.s32.totalorder %v7042_v2, 7 }
 0x1dc   : > { %7137 = vst [vmem:[#allocation99_spill] sm:$0xff] %v7136_v19  ;;  %v7149_v19 = vmov 0 }
 0x1dd   : > { %v1715_v12 = vadd.f32 %v1683_v17, %v1487_v60  ;;  %3864 = vrot.lane.b32.xlu2 %v3863_v48, %s4004_s25  ;;  %v2002_v48 = vsel %vm7138_vm7, %v5237_v43, 0.0  ;;  %vm7141_vm7 = vcmask 785408  }
 0x1df   : > { %v1908_v27 = vadd.f32 %v1876_v62, %v1715_v12  ;;  %v1213_v12 = vpop.f32.mrf.mxu0  ;;  %v7140_v62 = vld [vmem:[#allocation72_spill] sm:$0xff] }
 0x1e1   : > { %v5261_v10 = vmax.f32 %v1908_v27, 0.0  ;;  %v272_v27 = vand.u32 7, %v7140_v62  ;;  %v1751_v62 = vrot.slane %v1367_v44, 1  ;;  %v7152_v44 = vmov 0 }
 0x1e2   : > { %v1488_v60 = vpop.f32.mrf.mxu2 }
 0x1e3   : > { %v1489_v21 = vadd.f32 %v4998_v14, %v1488_v60  ;;  %v2003_v17 = vsel %vm7139_vm14, %v5261_v10, 0.0  ;;  %v1877_v60 = vsel %vm5271_vm3, %v1793_v25, 0.0  ;;  %vm5292_vm14 = vcmp.ne.s32.totalorder %v272_v27, 0 }
 0x1e4   : > { %v3868_v40 = vpack.i.bf16 %v2003_v17, %v2002_v48  ;;  %v7143_v5 = vsel %vm5292_vm14, 4294967295, %v7142_v5  ;;  %v1792_v25 = vsel %vm7127_vm15, %v1749_v54, %v1750_v30  ;;  %vm5300_vm3 = vcmp.ne.s32.totalorder %v272_v27, 7  ;;  %v5309_v17 = vpop.f32.mrf.mxu3 }
 0x1e5   : > { %v1716_v6 = vadd.f32 %v1684_v52, %v1489_v21  ;;  %7144 = vst [vmem:[#allocation72_spill] sm:$0xff] %v7143_v5  ;;  %v7146_v50 = vsel %vm5300_vm3, 4294967295, %v7145_v50  ;;  %v1685_v48 = vsel %vm5292_vm14, %v1600_v16, 0.0  ;;  %v1557_v52 = vrot.slane %v1213_v12, 7 }
 0x1e6   : > { %3869 = vrot.lane.b32.xlu0 %v3868_v40, %s4005_s26  ;;  %7147 = vst [vmem:[#allocation100_spill] sm:$0xff] %v7146_v50  ;;  %v7148_v40 = vld [vmem:[#allocation73_spill] sm:$0xff]  ;;  %v1878_v27 = vsel %vm5300_vm3, %v1792_v25, 0.0  ;;  %v1791_v16 = vsel %vm7127_vm15, %v1750_v30, %v1751_v62  ;;  %vm7155_vm3 = vcmp.ne.s32.totalorder %v7041_v13, 7 }
 0x1e7   : > { %v1909_v7 = vadd.f32 %v1877_v60, %v1716_v6  ;;  %3387 = vmatmul.msk.bf16.gmra.mxu2 %vm7141_vm7, %v4799_v51  ;;  %v273_v54 = vand.u32 7, %v7148_v40  ;;  %v1216_v6 = vpop.f32.mrf.mxu0  ;;  %v1599_v12 = vsel %vm6874_vm6, %v1556_v11, %v1557_v52 }
 0x1e8   : > { %v1558_v40 = vrot.slane %v1216_v6, 7  ;;  %v7160_v6 = vmov 0 }
 0x1e9   : > { %v5290_v39 = vmax.f32 %v1909_v7, 0.0  ;;  %vm5317_vm7 = vcmp.ne.s32.totalorder %v273_v54, 0  ;;  %vm5325_vm14 = vcmp.ne.s32.totalorder %v273_v54, 7  ;;  %v7157_v54 = vld [vmem:[#allocation84_spill] sm:$0xff] }
 0x1ea   : > { %v1491_v21 = vpop.f32.mrf.mxu2  ;;  %v7150_v19 = vsel %vm5317_vm7, 4294967295, %v7149_v19  ;;  %v7153_v44 = vsel %vm5325_vm14, 4294967295, %v7152_v44  ;;  %v1686_v11 = vsel %vm5317_vm7, %v1599_v12, 0.0  ;;  %v1879_v50 = vsel %vm5325_vm14, %v1791_v16, 0.0 }
 0x1eb   : > { %v1492_v51 = vadd.f32 %v4998_v14, %v1491_v21  ;;  %v3873_v7 = vpack.i.bf16 %v5290_v39, %v5261_v10  ;;  %7151 = vst [vmem:[#allocation73_spill] sm:$0xff] %v7150_v19  ;;  %v1598_v12 = vsel %vm6874_vm6, %v1557_v52, %v1558_v40  ;;  %v7166_v52 = vld [vmem:[#allocation86_spill] sm:$0xff]  ;;  %vm7195_vm7 = vcmp.ne.s32.totalorder %v4582_v49, 7 }
 0x1ec   : > { %7154 = vst [vmem:[#allocation101_spill] sm:$0xff] %v7153_v44  ;;  %v7167_v44 = vmov 0 }
 0x1ed   : > { %v1717_v28 = vadd.f32 %v1685_v48, %v1492_v51  ;;  %3874 = vrot.lane.b32.xlu1 %v3873_v7, %s4004_s25  ;;  %v1369_v51 = vpop.f32.mrf.mxu1  ;;  %v2004_v48 = vsel %vm7155_vm3, %v5290_v39, 0.0  ;;  %vm7158_vm3 = vcmask 785408  }
 0x1ee   : > { %v1752_v5 = vrot.slane %v1369_v51, 1  ;;  %v7163_v51 = vmov 0 }
 0x1ef   : > { %v1910_v60 = vadd.f32 %v1878_v27, %v1717_v28  ;;  %v1218_v36 = vpop.f32.mrf.mxu0 }
 0x1f1   : > { %v5315_v21 = vmax.f32 %v1910_v60, 0.0  ;;  %v274_v60 = vand.u32 7, %v7157_v54 }
 0x1f2   : > { %v1493_v7 = vpop.f32.mrf.mxu2 }
 0x1f3   : > { %v1494_v25 = vadd.f32 %v4998_v14, %v1493_v7  ;;  %v2005_v28 = vsel %vm7156_vm1, %v5315_v21, 0.0  ;;  %v5342_v7 = vpop.f32.mrf.mxu3  ;;  %vm5348_vm1 = vcmp.ne.s32.totalorder %v274_v60, 0  ;;  %vm5356_vm14 = vcmp.ne.s32.totalorder %v274_v60, 7 }
 0x1f4   : > { %v3878_v30 = vpack.i.bf16 %v2005_v28, %v2004_v48  ;;  %v7161_v6 = vsel %vm5348_vm1, 4294967295, %v7160_v6  ;;  %v7164_v51 = vsel %vm5356_vm14, 4294967295, %v7163_v51  ;;  %v1687_v48 = vsel %vm5348_vm1, %v1598_v12, 0.0  ;;  %v3559_v12 = vld [vmem:[%s6646_s3 + $0x28] sm:$0xff] }
 0x1f5   : > { %v1718_v27 = vadd.f32 %v1686_v11, %v1494_v25  ;;  %7162 = vst [vmem:[#allocation102_spill] sm:$0xff] %v7161_v6  ;;  %v1790_v25 = vsel %vm7127_vm15, %v1751_v62, %v1752_v5  ;;  %v1559_v28 = vrot.slane %v1218_v36, 7  ;;  %vm7173_vm1 = vcmp.ne.s32.totalorder %v7047_v18, 7  ;;  %2462 = vmatpush.bf16.msrb.mxu3 %v3559_v12 }
 0x1f6   : > { %3879 = vrot.lane.b32.xlu2 %v3878_v30, %s4005_s26  ;;  %7165 = vst [vmem:[#allocation103_spill] sm:$0xff] %v7164_v51  ;;  %v275_v30 = vand.u32 7, %v7166_v52 }
 0x1f7   : > { %v1911_v56 = vadd.f32 %v1879_v50, %v1718_v27  ;;  %3388 = vmatmul.msk.bf16.gmra.mxu2 %vm7158_vm3, %v4839_v41  ;;  %v1372_v50 = vpop.f32.mrf.mxu1  ;;  %v1880_v27 = vsel %vm5356_vm14, %v1790_v25, 0.0  ;;  %v1597_v36 = vsel %vm6874_vm6, %v1558_v40, %v1559_v28  ;;  %vm7174_vm6 = vcmp.ne.s32.totalorder %v7048_v37, 7 }
 0x1f8   : > { %v1753_v62 = vrot.slane %v1372_v50, 1  ;;  %vm5373_vm3 = vcmp.ne.s32.totalorder %v275_v30, 0  ;;  %vm5384_vm14 = vcmp.ne.s32.totalorder %v275_v30, 7  ;;  %v7170_v50 = vmov 0 }
 0x1f9   : > { %v5346_v19 = vmax.f32 %v1911_v56, 0.0  ;;  %v7168_v44 = vsel %vm5373_vm3, 4294967295, %v7167_v44  ;;  %v7171_v50 = vsel %vm5384_vm14, 4294967295, %v7170_v50  ;;  %v1688_v52 = vsel %vm5373_vm3, %v1597_v36, 0.0 }
 0x1fa   : > { %v1496_v16 = vpop.f32.mrf.mxu2  ;;  %7169 = vst [vmem:[#allocation86_spill] sm:$0xff] %v7168_v44  ;;  %v1789_v25 = vsel %vm7127_vm15, %v1752_v5, %v1753_v62  ;;  %v7177_v36 = vmov 0  ;;  %vm7180_vm15 = vcmp.lt.s32.totalorder %v4044_v1, 1  ;;  %vm7194_vm3 = vcmp.ne.s32.totalorder %v4570_v26, 7 }
 0x1fb   : > { %7159 = vst [vmem:[#allocation84_spill] sm:$0xff] %v5346_v19  ;;  %v1497_v41 = vadd.f32 %v4998_v14, %v1496_v16  ;;  %v3883_v56 = vpack.i.bf16 %v5346_v19, %v5315_v21  ;;  %v5369_v60 = vpop.f32.mrf.mxu3 }
 0x1fc   : > { %7172 = vst [vmem:[#allocation104_spill] sm:$0xff] %v7171_v50 }
 0x1fd   : > { %v1719_v11 = vadd.f32 %v1687_v48, %v1497_v41  ;;  %3884 = vrot.lane.b32.xlu0 %v3883_v56, %s4004_s25  ;;  %v1221_v41 = vpop.f32.mrf.mxu0 }
 0x1ff   : > { %v1912_v54 = vadd.f32 %v1880_v27, %v1719_v11  ;;  %v2006_v11 = vsel %vm7173_vm1, %v5346_v19, 0.0  ;;  %v1560_v27 = vrot.slane %v1221_v41, 7  ;;  %v1374_v6 = vpop.f32.mrf.mxu1  ;;  %vm7176_vm1 = vcmask 785408  }
 0x200   : > { %v1754_v37 = vrot.slane %v1374_v6, 1  ;;  %v7182_v6 = vmov 0 }
 0x201   : > { %v5371_v16 = vmax.f32 %v1912_v54, 0.0  ;;  %v7175_v54 = vld [vmem:[#allocation79_spill] sm:$0xff]  ;;  %v1596_v41 = vsel %vm7180_vm15, %v1559_v28, %v1560_v27 }
 0x202   : > { %v1498_v56 = vpop.f32.mrf.mxu2  ;;  %v276_v51 = vand.u32 7, %v7175_v54 }
 0x203   : > { %v1499_v48 = vadd.f32 %v4998_v14, %v1498_v56  ;;  %v2007_v40 = vsel %vm7174_vm6, %v5371_v16, 0.0  ;;  %v1881_v56 = vsel %vm5384_vm14, %v1789_v25, 0.0  ;;  %v3571_v25 = vld [vmem:[%s6646_s3 + $0x88] sm:$0xff] }
 0x204   : > { %v3888_v5 = vpack.i.bf16 %v2007_v40, %v2006_v11  ;;  %vm5405_vm6 = vcmp.ne.s32.totalorder %v276_v51, 0  ;;  %vm5421_vm14 = vcmp.ne.s32.totalorder %v276_v51, 7  ;;  %2613 = vmatpush.bf16.msrb.mxu0 %v3571_v25  ;;  %v7186_v25 = vmov 0 }
 0x205   : > { %v1720_v30 = vadd.f32 %v1688_v52, %v1499_v48  ;;  %v7178_v36 = vsel %vm5405_vm6, 4294967295, %v7177_v36  ;;  %v3565_v48 = vld [vmem:[%s6646_s3 + $0x58] sm:$0xff]  ;;  %v7183_v6 = vsel %vm5421_vm14, 4294967295, %v7182_v6  ;;  %v1223_v52 = vpop.f32.mrf.mxu0 }
 0x206   : > { %3889 = vrot.lane.b32.xlu1 %v3888_v5, %s4005_s26  ;;  %7179 = vst [vmem:[#allocation79_spill] sm:$0xff] %v7178_v36  ;;  %2742 = vmatpush.bf16.msrb.mxu1 %v3565_v48  ;;  %v1689_v5 = vsel %vm5405_vm6, %v1596_v41, 0.0  ;;  %v7190_v48 = vmov 0  ;;  %v7197_v36 = vmov 0 }
 0x207   : > { %v1913_v19 = vadd.f32 %v1881_v56, %v1720_v30  ;;  %3389 = vmatmul.msk.bf16.gmra.mxu2 %vm7176_vm1, %v4775_v23  ;;  %v5417_v23 = vpop.f32.mrf.mxu3  ;;  %vm7181_vm1 = vcmp.lt.s32.totalorder %v4044_v1, 7  ;;  %7184 = vst [vmem:[#allocation105_spill] sm:$0xff] %v7183_v6  ;;  %v1561_v56 = vrot.slane %v1223_v52, 7 }
 0x209   : > { %v5403_v12 = vmax.f32 %v1913_v19, 0.0  ;;  %v1788_v19 = vsel %vm7181_vm1, %v1753_v62, %v1754_v37  ;;  %v7185_v62 = vld [vmem:[#allocation80_spill] sm:$0xff]  ;;  %vm7189_vm1 = vcmp.lt.s32.totalorder %v4044_v1, 1 }
 0x20a   : > { %v1501_v11 = vpop.f32.mrf.mxu2  ;;  %v1882_v51 = vsel %vm5421_vm14, %v1788_v19, 0.0  ;;  %v277_v54 = vand.u32 7, %v7185_v62  ;;  %v1595_v41 = vsel %vm7189_vm1, %v1560_v27, %v1561_v56  ;;  %vm7193_vm14 = vcmp.lt.s32.totalorder %v4044_v1, 7 }
 0x20b   : > { %v1502_v28 = vadd.f32 %v4998_v14, %v1501_v11  ;;  %v3893_v40 = vpack.i.bf16 %v5403_v12, %v5371_v16  ;;  %v1755_v11 = vrot.slane %v5309_v17, 1  ;;  %v2008_v17 = vsel %vm7194_vm3, %v5403_v12, 0.0 }
 0x20c   : > { %vm5437_vm15 = vcmp.ne.s32.totalorder %v277_v54, 0  ;;  %vm5443_vm6 = vcmp.ne.s32.totalorder %v277_v54, 7  ;;  %v7196_v54 = vld [vmem:[#allocation4_spill] sm:$0xff]  ;;  %vm7202_vm3 = vcmp.lt.s32.totalorder %v4044_v1, 7 }
 0x20d   : > { %v1721_v30 = vadd.f32 %v1689_v5, %v1502_v28  ;;  %3894 = vrot.lane.b32.xlu2 %v3893_v40, %s4004_s25  ;;  %v7187_v25 = vsel %vm5437_vm15, 4294967295, %v7186_v25  ;;  %v7191_v48 = vsel %vm5443_vm6, 4294967295, %v7190_v48  ;;  %v1787_v28 = vsel %vm7193_vm14, %v1754_v37, %v1755_v11 }
 0x20e   : > { %7188 = vst [vmem:[#allocation80_spill] sm:$0xff] %v7187_v25  ;;  %v1690_v27 = vsel %vm5437_vm15, %v1595_v41, 0.0  ;;  %v1883_v37 = vsel %vm5443_vm6, %v1787_v28, 0.0  ;;  %v7200_v41 = vrot.slane %v4895_v59, 7  ;;  %v3558_v28 = vld [vmem:[%s6646_s3 + $0x20] sm:$0xff]  ;;  %vm7215_vm6 = vcmp.ne.s32.totalorder %v4532_v3, 7 }
 0x20f   : > { %v1914_v50 = vadd.f32 %v1882_v51, %v1721_v30  ;;  %7192 = vst [vmem:[#allocation106_spill] sm:$0xff] %v7191_v48  ;;  %v5458_v5 = vpop.f32.mrf.mxu3  ;;  %v1756_v51 = vrot.slane %v5342_v7, 1  ;;  %2463 = vmatpush.bf16.msrb.mxu3 %v3558_v28  ;;  %v7207_v28 = vmov 0  ;;  %v7226_v25 = vmov 0 }
 0x210   : > { %vm7236_vm15 = vcmask 261120  }
 0x211   : > { %v5435_v44 = vmax.f32 %v1914_v50, 0.0  ;;  %v1786_v7 = vsel %vm7202_vm3, %v1755_v11, %v1756_v51  ;;  %vm7237_vm0 = vmmov %vm7236_vm15 }
 0x212   : > { %v1503_v19 = vpop.f32.mrf.mxu2 }
 0x213   : > { %v1504_v40 = vadd.f32 %v4998_v14, %v1503_v19  ;;  %v2009_v50 = vsel %vm7195_vm7, %v5435_v44, 0.0  ;;  %v278_v19 = vand.u32 7, %v7196_v54  ;;  %vm7201_vm7 = vmmov %vm7189_vm1 }
 0x214   : > { %v3898_v52 = vpack.i.bf16 %v2009_v50, %v2008_v17  ;;  %v7203_v50 = vmov 0 }
 0x215   : > { %v1722_v30 = vadd.f32 %v1690_v27, %v1504_v40  ;;  %vm5467_vm14 = vcmp.ne.s32.totalorder %v278_v19, 0  ;;  %v1594_v40 = vsel %vm7201_vm7, %v1561_v56, %v7200_v41  ;;  %vm5480_vm1 = vcmp.ne.s32.totalorder %v278_v19, 7 }
 0x216   : > { %3899 = vrot.lane.b32.xlu0 %v3898_v52, %s4005_s26  ;;  %v7198_v36 = vsel %vm5467_vm14, 4294967295, %v7197_v36  ;;  %v7204_v50 = vsel %vm5480_vm1, 4294967295, %v7203_v50  ;;  %v1691_v56 = vsel %vm5467_vm14, %v1594_v40, 0.0  ;;  %v1884_v11 = vsel %vm5480_vm1, %v1786_v7, 0.0  ;;  %v3570_v40 = vld [vmem:[%s6646_s3 + $0x80] sm:$0xff] }
 0x217   : > { %v1915_v62 = vadd.f32 %v1883_v37, %v1722_v30  ;;  %7199 = vst [vmem:[#allocation4_spill] sm:$0xff] %v7198_v36  ;;  %v7206_v30 = vld [vmem:[#allocation5_spill] sm:$0xff]  ;;  %v5494_v54 = vpop.f32.mrf.mxu3  ;;  %v7210_v7 = vmov 0  ;;  %vm7213_vm1 = vcmp.lt.s32.totalorder %v4044_v1, 7  ;;  %vm7214_vm14 = vcmp.ne.s32.totalorder %v7053_v22, 7  ;;  %2614 = vmatpush.bf16.msrb.mxu0 %v3570_v40 }
 0x218   : > { %7205 = vst [vmem:[#allocation107_spill] sm:$0xff] %v7204_v50  ;;  %v279_v37 = vand.u32 7, %v7206_v30  ;;  %v5525_v50 = vpop.permute.xlu2 %3834  ;;  %v1758_v36 = vrot.slane %v5417_v23, 1 }
 0x219   : > { %v5465_v6 = vmax.f32 %v1915_v62, 0.0  ;;  %v1757_v62 = vrot.slane %v5369_v60, 1 }
 0x21a   : > { %v1506_v17 = vpop.f32.mrf.mxu2  ;;  %vm5498_vm7 = vcmp.ne.s32.totalorder %v279_v37, 0  ;;  %vm5508_vm3 = vcmp.ne.s32.totalorder %v279_v37, 7 }
 0x21b   : > { %v1507_v27 = vadd.f32 %v4998_v14, %v1506_v17  ;;  %v3903_v59 = vpack.i.bf16 %v5465_v6, %v5435_v44  ;;  %v7208_v28 = vsel %vm5498_vm7, 4294967295, %v7207_v28  ;;  %v3564_v17 = vld [vmem:[%s6646_s3 + $0x50] sm:$0xff]  ;;  %v7211_v7 = vsel %vm5508_vm3, 4294967295, %v7210_v7 }
 0x21c   : > { %7209 = vst [vmem:[#allocation5_spill] sm:$0xff] %v7208_v28  ;;  %2743 = vmatpush.bf16.msrb.mxu1 %v3564_v17  ;;  %v1692_v30 = vsel %vm5498_vm7, %v4913_v0, 0.0  ;;  %v7218_v0 = vmov 0  ;;  %vm7235_vm7 = vcmp.lt.s32.totalorder %v4044_v1, 7 }
 0x21d   : > { %v1723_v52 = vadd.f32 %v1691_v56, %v1507_v27  ;;  %3904 = vrot.lane.b32.xlu1 %v3903_v59, %s4004_s25  ;;  %7212 = vst [vmem:[#allocation108_spill] sm:$0xff] %v7211_v7  ;;  %v1785_v27 = vsel %vm7213_vm1, %v1756_v51, %v1757_v62  ;;  %v2010_v56 = vsel %vm7214_vm14, %v5465_v6, 0.0  ;;  %vm7221_vm14 = vmmov %vm7213_vm1 }
 0x21f   : > { %v1916_v19 = vadd.f32 %v1884_v11, %v1723_v52  ;;  %v5531_v40 = vpop.f32.mrf.mxu3 }
 0x221   : > { %v5496_v41 = vmax.f32 %v1916_v19, 0.0  ;;  %v7216_v19 = vld [vmem:[#allocation2_spill] sm:$0xff] }
 0x222   : > { %v1508_v60 = vpop.f32.mrf.mxu2  ;;  %v280_v51 = vand.u32 7, %v7216_v19  ;;  %v3850_v19 = vpop.permute.xlu2 %3849 }
 0x223   : > { %v1509_v59 = vadd.f32 %v4998_v14, %v1508_v60  ;;  %v2011_v52 = vsel %vm7215_vm6, %v5496_v41, 0.0  ;;  %v1885_v60 = vsel %vm5508_vm3, %v1785_v27, 0.0  ;;  %vm7233_vm3 = vcmp.ne.s32.totalorder %v4306_v34, 0 }
 0x224   : > { %v3908_v37 = vpack.i.bf16 %v2011_v52, %v2010_v56  ;;  %vm5535_vm6 = vcmp.ne.s32.totalorder %v280_v51, 0  ;;  %v1784_v56 = vsel %vm7221_vm14, %v1757_v62, %v1758_v36  ;;  %vm5541_vm1 = vcmp.ne.s32.totalorder %v280_v51, 7 }
 0x225   : > { %v1724_v11 = vadd.f32 %v1692_v30, %v1509_v59  ;;  %v7219_v0 = vsel %vm5535_vm6, 4294967295, %v7218_v0  ;;  %v7222_v52 = vmov 0  ;;  %v7225_v30 = vld [vmem:[#allocation3_spill] sm:$0xff]  ;;  %v1759_v62 = vrot.slane %v5458_v5, 1 }
 0x226   : > { %3909 = vrot.lane.b32.xlu2 %v3908_v37, %s4005_s26  ;;  %7220 = vst [vmem:[#allocation109_spill] sm:$0xff] %v7219_v0  ;;  %v7223_v52 = vsel %vm5541_vm1, 4294967295, %v7222_v52  ;;  %v281_v37 = vand.u32 7, %v7225_v30  ;;  %v1886_v51 = vsel %vm5541_vm1, %v1784_v56, 0.0  ;;  %v1966_v5 = vsel %vm7233_vm3, %v5056_v38, 0.0 }
 0x227   : > { %v1917_v48 = vadd.f32 %v1885_v60, %v1724_v11  ;;  %7224 = vst [vmem:[#allocation110_spill] sm:$0xff] %v7223_v52  ;;  %vm7234_vm1 = vcmp.ne.s32.totalorder %v4308_v35, 0  ;;  %v1783_v30 = vsel %vm7235_vm7, %v1758_v36, %v1759_v62  ;;  %v7238_v35 = vld [vmem:[#allocation15_spill] sm:$0xff]  ;;  %vm7242_vm7 = vcmask 523264  }
 0x228   : > { %vm5556_vm14 = vcmp.ne.s32.totalorder %v281_v37, 0  ;;  %v1967_v56 = vsel %vm7234_vm1, %v5083_v9, 0.0  ;;  %vm7239_vm3 = vcmp.ne.s32.totalorder %v7238_v35, 7  ;;  %v7240_v9 = vld [vmem:[#allocation16_spill] sm:$0xff] }
 0x229   : > { %v5533_v17 = vmax.f32 %v1917_v48, 0.0  ;;  %v1693_v48 = vsel %vm5535_vm6, %v4921_v15, 0.0  ;;  %v7227_v25 = vsel %vm5556_vm14, 4294967295, %v7226_v25  ;;  %vm5560_vm6 = vcmp.ne.s32.totalorder %v281_v37, 7 }
 0x22a   : > { %v1511_v59 = vpop.f32.mrf.mxu2  ;;  %7228 = vst [vmem:[#allocation3_spill] sm:$0xff] %v7227_v25  ;;  %v7229_v15 = vmov 0  ;;  %v3852_v37 = vunpack.i.h.bf16 %v3850_v19  ;;  %vm7241_vm1 = vcmp.ne.s32.totalorder %v7240_v9, 7 }
 0x22b   : > { %7217 = vst [vmem:[#allocation2_spill] sm:$0xff] %v5533_v17  ;;  %v1512_v27 = vadd.f32 %v4998_v14, %v1511_v59  ;;  %v3913_v23 = vpack.i.bf16 %v5533_v17, %v5496_v41  ;;  %v7230_v15 = vsel %vm5560_vm6, 4294967295, %v7229_v15  ;;  %v2012_v38 = vsel %vm7239_vm3, %v5533_v17, 0.0 }
 0x22c   : > { %7231 = vst [vmem:[#allocation111_spill] sm:$0xff] %v7230_v15  ;;  %v1887_v17 = vsel %vm5560_vm6, %v1783_v30, 0.0  ;;  %vm7249_vm3 = vcmp.lt.s32.totalorder %v4044_v1, 7 }
 0x22d   : > { %v1725_v11 = vadd.f32 %v1693_v48, %v1512_v27  ;;  %3914 = vrot.lane.b32.xlu0 %v3913_v23, %s4004_s25  ;;  %v3851_v27 = vunpack.i.l.bf16 %v3850_v19  ;;  %v3557_v48 = vld [vmem:[%s6646_s3 + $0x18] sm:$0xff] }
 0x22e   : > { %2464 = vmatpush.bf16.msrb.mxu3 %v3557_v48  ;;  %v1760_v48 = vrot.slane %v5494_v54, 1  ;;  %v5614_v54 = vpop.permute.xlu0 %3839 }
 0x22f   : > { %v1918_v60 = vadd.f32 %v1886_v51, %v1725_v11  ;;  %v3845_v59 = vpop.permute.xlu1 %3844 }
 0x230   : > { %v3847_v7 = vunpack.i.h.bf16 %v3845_v59  ;;  %v3846_v28 = vunpack.i.l.bf16 %v3845_v59  ;;  %v5579_v59 = vpop.f32.mrf.mxu3 }
 0x231   : > { %v5564_v23 = vmax.f32 %v1918_v60, 0.0 }
 0x232   : > { %v2287_v11 = vsel %vm7236_vm15, %v1967_v56, %v3847_v7  ;;  %v2286_v51 = vsel %vm7237_vm0, %v1966_v5, %v3846_v28  ;;  %v1513_v60 = vpop.f32.mrf.mxu2  ;;  %v1694_v28 = vsel %vm5556_vm14, %v4925_v57, 0.0  ;;  %vm7243_vm0 = vmmov %vm7242_vm7  ;;  %v7244_v56 = vld [vmem:[#allocation23_spill] sm:$0xff]  ;;  %v7246_v57 = vmov 0 }
 0x233   : > { %7232 = vst [vmem:[#allocation112_spill] sm:$0xff] %v5564_v23  ;;  %v1514_v34 = vadd.f32 %v4998_v14, %v1513_v60  ;;  %v2013_v52 = vsel %vm7241_vm1, %v5564_v23, 0.0  ;;  %v2318_v36 = vsel %vm7242_vm7, %v2286_v51, %v3851_v27  ;;  %v2319_v19 = vsel %vm7243_vm0, %v2287_v11, %v3852_v37  ;;  %v3563_v37 = vld [vmem:[%s6646_s3 + $0x48] sm:$0xff] }
 0x234   : > { %v3918_v7 = vpack.i.bf16 %v2013_v52, %v2012_v38  ;;  %v282_v60 = vand.u32 7, %v7244_v56  ;;  %v5594_v0 = vpack.c.bf16 %v2319_v19, %v2318_v36  ;;  %v3569_v52 = vld [vmem:[%s6646_s3 + $0x78] sm:$0xff]  ;;  %v1782_v11 = vsel %vm7249_vm3, %v1759_v62, %v1760_v48  ;;  %2744 = vmatpush.bf16.msrb.mxu1 %v3563_v37 }
 0x235   : > { %v1726_v5 = vadd.f32 %v1694_v28, %v1514_v34  ;;  %2615 = vmatpush.bf16.msrb.mxu0 %v3569_v52  ;;  %v1761_v56 = vrot.slane %v5531_v40, 1  ;;  %v7254_v52 = vmov 0 }
 0x236   : > { %3919 = vrot.lane.b32.xlu1 %v3918_v7, %s4005_s26  ;;  %vm5602_vm15 = vcmp.ne.s32.totalorder %v282_v60, 0  ;;  %vm5616_vm1 = vcmp.ne.s32.totalorder %v282_v60, 7  ;;  %v7253_v7 = vld [vmem:[#allocation26_spill] sm:$0xff] }
 0x237   : > { %v1919_v27 = vadd.f32 %v1887_v17, %v1726_v5  ;;  %v7247_v57 = vsel %vm5602_vm15, 4294967295, %v7246_v57  ;;  %v7250_v17 = vmov 0  ;;  %v1695_v36 = vsel %vm5602_vm15, %v4931_v46, 0.0 }
 0x238   : > { %7248 = vst [vmem:[#allocation16_spill] sm:$0xff] %v7247_v57  ;;  %v7251_v17 = vsel %vm5616_vm1, 4294967295, %v7250_v17  ;;  %v5626_v28 = vpop.f32.mrf.mxu3  ;;  %v283_v19 = vand.u32 7, %v7253_v7  ;;  %v1888_v5 = vsel %vm5616_vm1, %v1782_v11, 0.0  ;;  %v7256_v46 = vmov 0 }
 0x239   : > { %v5600_v51 = vmax.f32 %v1919_v27, 0.0  ;;  %7252 = vst [vmem:[#allocation23_spill] sm:$0xff] %v7251_v17  ;;  %v1781_v11 = vsel %vm7249_vm3, %v1760_v48, %v1761_v56  ;;  %v1762_v57 = vrot.slane %v5579_v59, 1 }
 0x23a   : > { %v1516_v30 = vpop.f32.mrf.mxu2  ;;  %vm5635_vm7 = vcmp.ne.s32.totalorder %v283_v19, 0  ;;  %vm5639_vm0 = vcmp.ne.s32.totalorder %v283_v19, 7 }
 0x23b   : > { %7245 = vst [vmem:[#allocation15_spill] sm:$0xff] %v5600_v51  ;;  %v1517_v34 = vadd.f32 %v4998_v14, %v1516_v30  ;;  %v3923_v38 = vpack.i.bf16 %v5600_v51, %v5564_v23  ;;  %v7255_v52 = vsel %vm5635_vm7, 4294967295, %v7254_v52  ;;  %v7257_v46 = vsel %vm5639_vm0, 4294967295, %v7256_v46  ;;  %v3556_v30 = vld [vmem:[%s6646_s3 + $0x10] sm:$0xff] }
 0x23c   : > { %7258 = vst [vmem:[#allocation26_spill] sm:$0xff] %v7257_v46  ;;  %v1696_v19 = vsel %vm5635_vm7, %v4935_v63, 0.0  ;;  %2465 = vmatpush.bf16.msrb.mxu3 %v3556_v30  ;;  %v1889_v15 = vsel %vm5639_vm0, %v1781_v11, 0.0  ;;  %v7264_v63 = vmov 0  ;;  %v1780_v11 = vsel %vm7249_vm3, %v1761_v56, %v1762_v57 }
 0x23d   : > { %v1727_v62 = vadd.f32 %v1695_v36, %v1517_v34  ;;  %3924 = vrot.lane.b32.xlu2 %v3923_v38, %s4004_s25  ;;  %v7259_v38 = vld [vmem:[#allocation12_spill] sm:$0xff]  ;;  %vm7268_vm0 = vcmp.ne.s32.totalorder %v4367_v55, 0  ;;  %vm7269_vm7 = vcmask 261120  }
 0x23e   : > { %vm7260_vm1 = vcmp.ne.s32.totalorder %v7259_v38, 7 }
 0x23f   : > { %v1920_v60 = vadd.f32 %v1888_v5, %v1727_v62  ;;  %v3855_v40 = vpop.permute.xlu0 %3854  ;;  %v2014_v36 = vsel %vm7260_vm1, %v5600_v51, 0.0  ;;  %v7261_v62 = vld [vmem:[#allocation13_spill] sm:$0xff]  ;;  %vm7267_vm1 = vcmp.ne.s32.totalorder %v4365_v53, 0  ;;  %v3568_v53 = vld [vmem:[%s6646_s3 + $0x70] sm:$0xff] }
 0x240   : > { %vm7262_vm15 = vcmp.ne.s32.totalorder %v7261_v62, 7  ;;  %v5663_v25 = vpop.f32.mrf.mxu3  ;;  %v3857_v51 = vunpack.i.h.bf16 %v3855_v40  ;;  %v1968_v30 = vsel %vm7267_vm1, %v5118_v58, 0.0  ;;  %v3562_v58 = vld [vmem:[%s6646_s3 + $0x40] sm:$0xff]  ;;  %vm7273_vm1 = vmmov %vm7269_vm7  ;;  %2616 = vmatpush.bf16.msrb.mxu0 %v3568_v53 }
 0x241   : > { %v5633_v27 = vmax.f32 %v1920_v60, 0.0  ;;  %v7263_v60 = vld [vmem:[#allocation6_spill] sm:$0xff]  ;;  %2745 = vmatpush.bf16.msrb.mxu1 %v3562_v58 }
 0x242   : > { %v1518_v37 = vpop.f32.mrf.mxu2  ;;  %v284_v17 = vand.u32 7, %v7263_v60  ;;  %v7276_v60 = vld [vmem:[#allocation7_spill] sm:$0xff] }
 0x243   : > { %v1519_v34 = vadd.f32 %v4998_v14, %v1518_v37  ;;  %v2015_v7 = vsel %vm7262_vm15, %v5633_v27, 0.0  ;;  %v3856_v37 = vunpack.i.l.bf16 %v3855_v40 }
 0x244   : > { %v3928_v5 = vpack.i.bf16 %v2015_v7, %v2014_v36  ;;  %vm5665_vm15 = vcmp.ne.s32.totalorder %v284_v17, 0  ;;  %vm5680_vm6 = vcmp.ne.s32.totalorder %v284_v17, 7  ;;  %v7270_v7 = vmov 0 }
 0x245   : > { %v1728_v48 = vadd.f32 %v1696_v19, %v1519_v34  ;;  %v7265_v63 = vsel %vm5665_vm15, 4294967295, %v7264_v63  ;;  %v2288_v40 = vsel %vm7269_vm7, %v1968_v30, %v3856_v37  ;;  %v7271_v7 = vsel %vm5680_vm6, 4294967295, %v7270_v7 }
 0x246   : > { %3929 = vrot.lane.b32.xlu0 %v3928_v5, %s4005_s26  ;;  %7266 = vst [vmem:[#allocation12_spill] sm:$0xff] %v7265_v63  ;;  %vm7274_vm7 = vcmask 523264   ;;  %v1697_v56 = vsel %vm5665_vm15, %v4941_v47, 0.0  ;;  %v1890_v37 = vsel %vm5680_vm6, %v1780_v11, 0.0  ;;  %v1763_v30 = vrot.slane %v5626_v28, 1  ;;  %v7283_v28 = vld [vmem:[#allocation29_spill] sm:$0xff] }
 0x247   : > { %v1921_v62 = vadd.f32 %v1889_v15, %v1728_v48  ;;  %v1969_v15 = vsel %vm7268_vm0, %v5147_v61, 0.0  ;;  %7272 = vst [vmem:[#allocation6_spill] sm:$0xff] %v7271_v7  ;;  %vm7275_vm0 = vmmov %vm7274_vm7  ;;  %vm7295_vm15 = vcmask 261120  }
 0x248   : > { %v3860_v23 = vpop.permute.xlu1 %3859  ;;  %vm7296_vm14 = vmmov %vm7295_vm15 }
 0x249   : > { %v5672_v59 = vmax.f32 %v1921_v62, 0.0  ;;  %v3862_v34 = vunpack.i.h.bf16 %v3860_v23  ;;  %v3861_v36 = vunpack.i.l.bf16 %v3860_v23  ;;  %v2289_v23 = vsel %vm7273_vm1, %v1969_v15, %v3857_v51  ;;  %v5706_v15 = vpop.f32.mrf.mxu3 }
 0x24a   : > { %v1521_v19 = vpop.f32.mrf.mxu2  ;;  %v285_v51 = vand.u32 7, %v7276_v60 }
 0x24b   : > { %v1522_v55 = vadd.f32 %v4998_v14, %v1521_v19  ;;  %v3933_v61 = vpack.i.bf16 %v5672_v59, %v5633_v27  ;;  %v2320_v17 = vsel %vm7274_vm7, %v2288_v40, %v3861_v36  ;;  %v2321_v62 = vsel %vm7275_vm0, %v2289_v23, %v3862_v34  ;;  %v7285_v23 = vld [vmem:[#allocation30_spill] sm:$0xff] }
 0x24c   : > { %v5701_v48 = vpack.c.bf16 %v2321_v62, %v2320_v17  ;;  %vm5710_vm3 = vcmp.ne.s32.totalorder %v285_v51, 0  ;;  %v7277_v40 = vmov 0  ;;  %vm5714_vm1 = vcmp.ne.s32.totalorder %v285_v51, 7 }
 0x24d   : > { %v1729_v5 = vadd.f32 %v1697_v56, %v1522_v55  ;;  %3934 = vrot.lane.b32.xlu1 %v3933_v61, %s4004_s25  ;;  %v7278_v40 = vsel %vm5710_vm3, 4294967295, %v7277_v40  ;;  %v7280_v34 = vmov 0  ;;  %vm7282_vm7 = vcmp.lt.s32.totalorder %v4044_v1, 7  ;;  %v3865_v61 = vpop.permute.xlu2 %3864 }
 0x24e   : > { %7279 = vst [vmem:[#allocation7_spill] sm:$0xff] %v7278_v40  ;;  %v7281_v34 = vsel %vm5714_vm1, 4294967295, %v7280_v34  ;;  %v1779_v53 = vsel %vm7282_vm7, %v1762_v57, %v1763_v30  ;;  %vm7284_vm0 = vcmp.ne.s32.totalorder %v7283_v28, 7  ;;  %vm7286_vm6 = vcmp.ne.s32.totalorder %v7285_v23, 7 }
 0x24f   : > { %v1922_v36 = vadd.f32 %v1890_v37, %v1729_v5  ;;  %v2016_v58 = vsel %vm7284_vm0, %v5672_v59, 0.0  ;;  %v1698_v17 = vsel %vm5710_vm3, %v4945_v20, 0.0  ;;  %v7287_v5 = vld [vmem:[#allocation20_spill] sm:$0xff]  ;;  %v1764_v57 = vrot.slane %v5663_v25, 1  ;;  %v3555_v25 = vld [vmem:[%s6646_s3 + $0x8] sm:$0xff] }
 0x250   : > { %v286_v60 = vand.u32 7, %v7287_v5  ;;  %v1891_v51 = vsel %vm5714_vm1, %v1779_v53, 0.0  ;;  %v3867_v37 = vunpack.i.h.bf16 %v3865_v61  ;;  %v7288_v20 = vmov 0  ;;  %2466 = vmatpush.bf16.msrb.mxu3 %v3555_v25 }
 0x251   : > { %v5708_v47 = vmax.f32 %v1922_v36, 0.0  ;;  %v3866_v36 = vunpack.i.l.bf16 %v3865_v61  ;;  %v1778_v53 = vsel %vm7282_vm7, %v1763_v30, %v1764_v57  ;;  %vm7290_vm0 = vcmp.ne.s32.totalorder %v4413_v42, 0  ;;  %v5756_v61 = vpop.f32.mrf.mxu3 }
 0x252   : > { %v1523_v19 = vpop.f32.mrf.mxu2  ;;  %vm7291_vm1 = vcmp.ne.s32.totalorder %v4415_v8, 0  ;;  %vm5752_vm3 = vcmp.ne.s32.totalorder %v286_v60, 7 }
 0x253   : > { %v1524_v11 = vadd.f32 %v4998_v14, %v1523_v19  ;;  %v2017_v55 = vsel %vm7286_vm6, %v5708_v47, 0.0  ;;  %vm5737_vm6 = vcmp.ne.s32.totalorder %v286_v60, 0 }
 0x254   : > { %v3938_v56 = vpack.i.bf16 %v2017_v55, %v2016_v58  ;;  %v7289_v20 = vsel %vm5737_vm6, 4294967295, %v7288_v20  ;;  %v1971_v58 = vsel %vm7291_vm1, %v5207_v29, 0.0  ;;  %v1699_v8 = vsel %vm5737_vm6, %v4951_v4, 0.0  ;;  %v7297_v29 = vld [vmem:[#allocation22_spill] sm:$0xff] }
 0x255   : > { %v1730_v62 = vadd.f32 %v1698_v17, %v1524_v11  ;;  %v1970_v11 = vsel %vm7290_vm0, %v5180_v24, 0.0  ;;  %v2291_v17 = vsel %vm7295_vm15, %v1971_v58, %v3867_v37  ;;  %v287_v24 = vand.u32 7, %v7297_v29  ;;  %v3880_v37 = vpop.permute.xlu2 %3879 }
 0x256   : > { %3939 = vrot.lane.b32.xlu2 %v3938_v56, %s4005_s26  ;;  %v2290_v56 = vsel %vm7296_vm14, %v1970_v11, %v3866_v36  ;;  %vm7298_vm1 = vcmask 523264   ;;  %v1892_v36 = vsel %vm5752_vm3, %v1778_v53, 0.0  ;;  %v7300_v58 = vmov 0 }
 0x257   : > { %v1923_v19 = vadd.f32 %v1891_v51, %v1730_v62  ;;  %vm7299_vm7 = vmmov %vm7298_vm1  ;;  %vm5775_vm14 = vcmp.ne.s32.totalorder %v287_v24, 0  ;;  %vm5779_vm15 = vcmp.ne.s32.totalorder %v287_v24, 7  ;;  %vm7306_vm0 = vcmp.ne.s32.totalorder %v7041_v13, 0 }
 0x258   : > { %v3870_v7 = vpop.permute.xlu0 %3869  ;;  %v7301_v58 = vsel %vm5775_vm14, 4294967295, %v7300_v58 }
 0x259   : > { %v5735_v63 = vmax.f32 %v1923_v19, 0.0  ;;  %v3872_v46 = vunpack.i.h.bf16 %v3870_v7  ;;  %v3871_v40 = vunpack.i.l.bf16 %v3870_v7  ;;  %v7292_v7 = vmov 0  ;;  %7302 = vst [vmem:[#allocation30_spill] sm:$0xff] %v7301_v58 }
 0x25a   : > { %v7293_v7 = vsel %vm5752_vm3, 4294967295, %v7292_v7  ;;  %v1526_v55 = vpop.f32.mrf.mxu2  ;;  %vm7309_vm3 = vcmask 261120  }
 0x25b   : > { %7294 = vst [vmem:[#allocation29_spill] sm:$0xff] %v7293_v7  ;;  %v1527_v30 = vadd.f32 %v4998_v14, %v1526_v55  ;;  %v3943_v42 = vpack.i.bf16 %v5735_v63, %v5708_v47  ;;  %v2322_v62 = vsel %vm7298_vm1, %v2290_v56, %v3871_v40  ;;  %v2323_v5 = vsel %vm7299_vm7, %v2291_v17, %v3872_v46  ;;  %v3567_v17 = vld [vmem:[%s6646_s3 + $0x68] sm:$0xff]  ;;  %v3561_v56 = vld [vmem:[%s6646_s3 + $0x38] sm:$0xff]  ;;  %vm7310_vm6 = vmmov %vm7309_vm3 }
 0x25c   : > { %v5770_v51 = vpack.c.bf16 %v2323_v5, %v2322_v62  ;;  %v1765_v14 = vrot.slane %v5706_v15, 1  ;;  %v7303_v46 = vmov 0  ;;  %v3881_v40 = vunpack.i.l.bf16 %v3880_v37  ;;  %2617 = vmatpush.bf16.msrb.mxu0 %v3567_v17  ;;  %2746 = vmatpush.bf16.msrb.mxu1 %v3561_v56 }
 0x25d   : > { %v1731_v60 = vadd.f32 %v1699_v8, %v1527_v30  ;;  %3944 = vrot.lane.b32.xlu0 %v3943_v42, %s4004_s25  ;;  %v7304_v46 = vsel %vm5779_vm15, 4294967295, %v7303_v46  ;;  %v1972_v15 = vsel %vm7306_vm0, %v5237_v43, 0.0  ;;  %vm7307_vm1 = vcmp.ne.s32.totalorder %v7042_v2, 0  ;;  %v5804_v2 = vld [vmem:[%s6645_s2] ss:$0 sm:$0xff] }
 0x25e   : > { %7305 = vst [vmem:[#allocation20_spill] sm:$0xff] %v7304_v46  ;;  %v1973_v53 = vsel %vm7307_vm1, %v5261_v10, 0.0  ;;  %vm7308_vm7 = vcmp.lt.s32.totalorder %v4044_v1, 7  ;;  %v3882_v42 = vunpack.i.h.bf16 %v3880_v37  ;;  %vm7311_vm0 = vcmp.ne.s32.totalorder %v4121_v32, 7  ;;  %v1407_v37 = vpop.f32.mrf.mxu3  ;;  %v7363_v46 = vld [vmem:[#allocation84_spill] sm:$0xff] }
 0x25f   : > { %v1924_v19 = vadd.f32 %v1892_v36, %v1731_v60  ;;  %v3875_v25 = vpop.permute.xlu1 %3874  ;;  %v1777_v30 = vsel %vm7308_vm7, %v1764_v57, %v1765_v14  ;;  %v2018_v29 = vsel %vm7311_vm0, %v5735_v63, 0.0  ;;  %vm7312_vm1 = vcmp.ne.s32.totalorder %v4123_v33, 7 }
 0x260   : > { %v3877_v4 = vunpack.i.h.bf16 %v3875_v25  ;;  %v3876_v11 = vunpack.i.l.bf16 %v3875_v25  ;;  %v1700_v62 = vsel %vm5775_vm14, %v4955_v31, 0.0  ;;  %v7316_v31 = vmov 0 }
 0x261   : > { %v5783_v55 = vmax.f32 %v1924_v19, 0.0  ;;  %v7315_v19 = vld [vmem:[#allocation34_spill] sm:$0xff]  ;;  %vm7319_vm0 = vcmp.lt.s32.totalorder %v4044_v1, 7  ;;  %vm7348_vm14 = vcmask 523264  }
 0x262   : > { %v2293_v8 = vsel %vm7309_vm3, %v1973_v53, %v3877_v4  ;;  %v2292_v43 = vsel %vm7310_vm6, %v1972_v15, %v3876_v11  ;;  %v1528_v13 = vpop.f32.mrf.mxu2  ;;  %vm7313_vm3 = vcmask 523264   ;;  %v288_v25 = vand.u32 7, %v7315_v19  ;;  %vm7349_vm13 = vmmov %vm7348_vm14 }
 0x263   : > { %v1529_v10 = vadd.f32 %v5804_v2, %v1528_v13  ;;  %v2019_v57 = vsel %vm7312_vm1, %v5783_v55, 0.0  ;;  %v2324_v24 = vsel %vm7313_vm3, %v2292_v43, %v3881_v40  ;;  %vm7314_vm6 = vmmov %vm7313_vm3  ;;  %v1893_v11 = vsel %vm5779_vm15, %v1777_v30, 0.0  ;;  %v7323_v13 = vld [vmem:[#allocation35_spill] sm:$0xff] }
 0x264   : > { %v3948_v5 = vpack.i.bf16 %v2019_v57, %v2018_v29  ;;  %v2325_v60 = vsel %vm7314_vm6, %v2293_v8, %v3882_v42  ;;  %v1766_v40 = vrot.slane %v5756_v61, 1  ;;  %vm5827_vm7 = vcmp.ne.s32.totalorder %v288_v25, 0 }
 0x265   : > { %v1732_v36 = vadd.f32 %v1700_v62, %v1529_v10  ;;  %v5819_v4 = vpack.c.bf16 %v2325_v60, %v2324_v24  ;;  %v7317_v31 = vsel %vm5827_vm7, 4294967295, %v7316_v31  ;;  %vm5833_vm1 = vcmp.ne.s32.totalorder %v288_v25, 7 }
 0x266   : > { %3949 = vrot.lane.b32.xlu1 %v3948_v5, %s4005_s26  ;;  %7318 = vst [vmem:[#allocation22_spill] sm:$0xff] %v7317_v31  ;;  %v1776_v56 = vsel %vm7319_vm0, %v1765_v14, %v1766_v40  ;;  %v7320_v42 = vmov 0  ;;  %v1701_v8 = vsel %vm5827_vm7, %v4961_v45, 0.0  ;;  %v289_v10 = vand.u32 7, %v7323_v13  ;;  %v1409_v57 = vpop.f32.mrf.mxu3  ;;  %v3554_v45 = vld [vmem:[%s6646_s3] sm:$0xff] }
 0x267   : > { %v1925_v15 = vadd.f32 %v1893_v11, %v1732_v36  ;;  %v7321_v42 = vsel %vm5833_vm1, 4294967295, %v7320_v42  ;;  %v1894_v14 = vsel %vm5833_vm1, %v1776_v56, 0.0  ;;  %v1767_v29 = vrot.slane %v1407_v37, 1  ;;  %v7330_v11 = vld [vmem:[#allocation27_spill] sm:$0xff]  ;;  %2467 = vmatpush.bf16.msrb.mxu3 %v3554_v45 }
 0x268   : > { %7322 = vst [vmem:[#allocation34_spill] sm:$0xff] %v7321_v42  ;;  %vm5849_vm3 = vcmp.ne.s32.totalorder %v289_v10, 0  ;;  %v7324_v5 = vmov 0  ;;  %vm5856_vm6 = vcmp.ne.s32.totalorder %v289_v10, 7  ;;  %v7327_v60 = vmov 0 }
 0x269   : > { %v5825_v53 = vmax.f32 %v1925_v15, 0.0  ;;  %v7325_v5 = vsel %vm5849_vm3, 4294967295, %v7324_v5  ;;  %v7328_v60 = vsel %vm5856_vm6, 4294967295, %v7327_v60  ;;  %v1775_v37 = vsel %vm7319_vm0, %v1766_v40, %v1767_v29 }
 0x26a   : > { %v1531_v17 = vpop.f32.mrf.mxu2  ;;  %7326 = vst [vmem:[#allocation35_spill] sm:$0xff] %v7325_v5  ;;  %vm7331_vm1 = vcmp.ne.s32.totalorder %v7330_v11, 7  ;;  %v1768_v10 = vrot.slane %v1409_v57, 1  ;;  %v7340_v57 = vld [vmem:[#allocation75_spill] sm:$0xff] }
 0x26b   : > { %v1532_v30 = vadd.f32 %v5804_v2, %v1531_v17  ;;  %v3953_v61 = vpack.i.bf16 %v5825_v53, %v5783_v55  ;;  %7329 = vst [vmem:[#allocation113_spill] sm:$0xff] %v7328_v60  ;;  %v2020_v15 = vsel %vm7331_vm1, %v5825_v53, 0.0  ;;  %v7332_v17 = vld [vmem:[#allocation28_spill] sm:$0xff]  ;;  %vm7341_vm0 = vcmp.ne.s32.totalorder %v7340_v57, 0  ;;  %v7351_v57 = vld [vmem:[#allocation25_spill] sm:$0xff] }
 0x26c   : > { %vm7333_vm7 = vcmp.ne.s32.totalorder %v7332_v17, 7 }
 0x26d   : > { %v1733_v43 = vadd.f32 %v1701_v8, %v1532_v30  ;;  %3954 = vrot.lane.b32.xlu2 %v3953_v61, %s4004_s25  ;;  %v7334_v30 = vld [vmem:[#allocation68_spill] sm:$0xff] }
 0x26e   : > { %v1702_v61 = vsel %vm5849_vm3, %v7334_v30, 0.0  ;;  %v7337_v30 = vmov 0  ;;  %vm7343_vm3 = vcmask 261120  }
 0x26f   : > { %v1926_v24 = vadd.f32 %v1894_v14, %v1733_v43  ;;  %v3885_v19 = vpop.permute.xlu0 %3884  ;;  %v7335_v43 = vld [vmem:[#allocation21_spill] sm:$0xff] }
 0x270   : > { %v290_v13 = vand.u32 7, %v7335_v43  ;;  %v3887_v14 = vunpack.i.h.bf16 %v3885_v19 }
 0x271   : > { %v5847_v62 = vmax.f32 %v1926_v24, 0.0  ;;  %v3886_v24 = vunpack.i.l.bf16 %v3885_v19  ;;  %v1975_v19 = vsel %vm7341_vm0, %v5315_v21, 0.0 }
 0x272   : > { %v1533_v36 = vpop.f32.mrf.mxu2  ;;  %vm5879_vm1 = vcmp.ne.s32.totalorder %v290_v13, 0  ;;  %vm5892_vm15 = vcmp.ne.s32.totalorder %v290_v13, 7  ;;  %v3560_v13 = vld [vmem:[%s6646_s3 + $0x30] sm:$0xff] }
 0x273   : > { %v1534_v25 = vadd.f32 %v5804_v2, %v1533_v36  ;;  %v2021_v56 = vsel %vm7333_vm7, %v5847_v62, 0.0  ;;  %v1895_v36 = vsel %vm5856_vm6, %v1775_v37, 0.0  ;;  %vm7336_vm7 = vcmp.ne.s32.totalorder %v7047_v18, 0  ;;  %2747 = vmatpush.bf16.msrb.mxu1 %v3560_v13 }
 0x274   : > { %v3958_v8 = vpack.i.bf16 %v2021_v56, %v2020_v15  ;;  %v1974_v45 = vsel %vm7336_vm7, %v5290_v39, 0.0  ;;  %v7338_v30 = vsel %vm5879_vm1, 4294967295, %v7337_v30  ;;  %v1412_v15 = vpop.f32.mrf.mxu3  ;;  %vm7342_vm6 = vcmp.lt.s32.totalorder %v4044_v1, 7  ;;  %vm7344_vm7 = vmmov %vm7343_vm3 }
 0x275   : > { %v1734_v40 = vadd.f32 %v1702_v61, %v1534_v25  ;;  %7339 = vst [vmem:[#allocation27_spill] sm:$0xff] %v7338_v30  ;;  %v1774_v61 = vsel %vm7342_vm6, %v1767_v29, %v1768_v10  ;;  %v2295_v18 = vsel %vm7343_vm3, %v1975_v19, %v3887_v14  ;;  %v2294_v39 = vsel %vm7344_vm7, %v1974_v45, %v3886_v24  ;;  %v3566_v29 = vld [vmem:[%s6646_s3 + $0x60] sm:$0xff]  ;;  %vm7356_vm3 = vmmov %vm7342_vm6 }
 0x276   : > { %3959 = vrot.lane.b32.xlu0 %v3958_v8, %s4005_s26  ;;  %v7345_v8 = vmov 0  ;;  %v7350_v24 = vld [vmem:[#allocation74_spill] sm:$0xff]  ;;  %v291_v19 = vand.u32 7, %v7351_v57  ;;  %2618 = vmatpush.bf16.msrb.mxu0 %v3566_v29  ;;  %v3895_v29 = vpop.permute.xlu2 %3894  ;;  %vm7364_vm7 = vcmp.ne.s32.totalorder %v4570_v26, 0 }
 0x277   : > { %v1927_v42 = vadd.f32 %v1895_v36, %v1734_v40  ;;  %v7346_v8 = vsel %vm5892_vm15, 4294967295, %v7345_v8  ;;  %v1703_v36 = vsel %vm5879_vm1, %v7350_v24, 0.0  ;;  %v7359_v24 = vld [vmem:[#allocation42_spill] sm:$0xff]  ;;  %v3897_v30 = vunpack.i.h.bf16 %v3895_v29 }
 0x278   : > { %v3890_v31 = vpop.permute.xlu1 %3889  ;;  %7347 = vst [vmem:[#allocation28_spill] sm:$0xff] %v7346_v8  ;;  %vm7360_vm0 = vcmp.ne.s32.totalorder %v7359_v24, 7  ;;  %v3896_v60 = vunpack.i.l.bf16 %v3895_v29  ;;  %v1976_v58 = vsel %vm7364_vm7, %v7363_v46, 0.0  ;;  %v7371_v46 = vmov 0 }
 0x279   : > { %v5886_v25 = vmax.f32 %v1927_v42, 0.0  ;;  %v3892_v37 = vunpack.i.h.bf16 %v3890_v31  ;;  %v3891_v56 = vunpack.i.l.bf16 %v3890_v31 }
 0x27a   : > { %v1536_v43 = vpop.f32.mrf.mxu2 }
 0x27b   : > { %v2327_v40 = vsel %vm7348_vm14, %v2295_v18, %v3892_v37  ;;  %v2326_v21 = vsel %vm7349_vm13, %v2294_v39, %v3891_v56  ;;  %v1537_v42 = vadd.f32 %v5804_v2, %v1536_v43  ;;  %v3963_v31 = vpack.i.bf16 %v5886_v25, %v5847_v62 }
 0x27c   : > { %v5907_v14 = vpack.c.bf16 %v2327_v40, %v2326_v21  ;;  %v1896_v37 = vsel %vm5892_vm15, %v1774_v61, 0.0  ;;  %v1769_v56 = vrot.slane %v1412_v15, 1  ;;  %vm5918_vm13 = vcmp.ne.s32.totalorder %v291_v19, 0  ;;  %v7357_v15 = vld [vmem:[#allocation41_spill] sm:$0xff] }
 0x27d   : > { %v1735_v45 = vadd.f32 %v1703_v36, %v1537_v42  ;;  %3964 = vrot.lane.b32.xlu1 %v3963_v31, %s4004_s25  ;;  %v7352_v43 = vmov 0  ;;  %vm5922_vm14 = vcmp.ne.s32.totalorder %v291_v19, 7  ;;  %v7354_v40 = vmov 0  ;;  %v1414_v31 = vpop.f32.mrf.mxu3 }
 0x27e   : > { %v7353_v43 = vsel %vm5918_vm13, 4294967295, %v7352_v43  ;;  %v7355_v40 = vsel %vm5922_vm14, 4294967295, %v7354_v40  ;;  %v1773_v42 = vsel %vm7356_vm3, %v1768_v10, %v1769_v56  ;;  %vm7358_vm6 = vcmp.ne.s32.totalorder %v7357_v15, 7 }
 0x27f   : > { %v1928_v18 = vadd.f32 %v1896_v37, %v1735_v45  ;;  %v2022_v13 = vsel %vm7358_vm6, %v5886_v25, 0.0  ;;  %v7361_v45 = vld [vmem:[#allocation82_spill] sm:$0xff]  ;;  %v7362_v37 = vld [vmem:[#allocation37_spill] sm:$0xff]  ;;  %v1770_v8 = vrot.slane %v1414_v31, 1  ;;  %vm7367_vm6 = vcmp.ne.s32.totalorder %v4582_v49, 0 }
 0x280   : > { %v1704_v57 = vsel %vm5918_vm13, %v7361_v45, 0.0  ;;  %v7365_v45 = vmov 0  ;;  %v1977_v31 = vsel %vm7367_vm6, %v5371_v16, 0.0  ;;  %vm7373_vm15 = vcmask 523264  }
 0x281   : > { %v5916_v39 = vmax.f32 %v1928_v18, 0.0  ;;  %v292_v18 = vand.u32 7, %v7362_v37  ;;  %vm7374_vm1 = vmmov %vm7373_vm15 }
 0x282   : > { %v1538_v21 = vpop.f32.mrf.mxu2 }
 0x283   : > { %v1539_v61 = vadd.f32 %v5804_v2, %v1538_v21  ;;  %v2023_v36 = vsel %vm7360_vm0, %v5916_v39, 0.0  ;;  %v1897_v21 = vsel %vm5922_vm14, %v1773_v42, 0.0  ;;  %vm5945_vm3 = vcmp.ne.s32.totalorder %v292_v18, 0 }
 0x284   : > { %v3968_v19 = vpack.i.bf16 %v2023_v36, %v2022_v13  ;;  %v7366_v45 = vsel %vm5945_vm3, 4294967295, %v7365_v45  ;;  %vm7368_vm0 = vcmp.lt.s32.totalorder %v4044_v1, 7  ;;  %vm7369_vm14 = vcmask 261120  }
 0x285   : > { %v1736_v10 = vadd.f32 %v1704_v57, %v1539_v61  ;;  %v1772_v13 = vsel %vm7368_vm0, %v1769_v56, %v1770_v8  ;;  %v2297_v36 = vsel %vm7369_vm14, %v1977_v31, %v3897_v30  ;;  %vm7370_vm13 = vmmov %vm7369_vm14  ;;  %vm5958_vm7 = vcmp.ne.s32.totalorder %v292_v18, 7  ;;  %v7375_v56 = vld [vmem:[#allocation87_spill] sm:$0xff]  ;;  %v3910_v18 = vpop.permute.xlu2 %3909 }
 0x286   : > { %3969 = vrot.lane.b32.xlu2 %v3968_v19, %s4005_s26  ;;  %v2296_v26 = vsel %vm7370_vm13, %v1976_v58, %v3896_v60  ;;  %v7372_v46 = vsel %vm5958_vm7, 4294967295, %v7371_v46  ;;  %v1705_v58 = vsel %vm5945_vm3, %v7375_v56, 0.0  ;;  %v7376_v60 = vld [vmem:[#allocation39_spill] sm:$0xff]  ;;  %vm7381_vm13 = vcmp.ne.s32.totalorder %v7053_v22, 0  ;;  %vm7385_vm6 = vmmov %vm7368_vm0  ;;  %v7388_v22 = vld [vmem:[#allocation36_spill] sm:$0xff] }
 0x287   : > { %v1929_v5 = vadd.f32 %v1897_v21, %v1736_v10  ;;  %v293_v30 = vand.u32 7, %v7376_v60  ;;  %v1898_v10 = vsel %vm5958_vm7, %v1772_v13, 0.0  ;;  %vm7382_vm14 = vcmp.ne.s32.totalorder %v4532_v3, 0  ;;  %v7390_v3 = vld [vmem:[#allocation38_spill] sm:$0xff] }
 0x288   : > { %v3900_v7 = vpop.permute.xlu0 %3899  ;;  %v1979_v13 = vsel %vm7382_vm14, %v5435_v44, 0.0  ;;  %vm7386_vm0 = vcmask 261120   ;;  %vm7391_vm14 = vcmp.ne.s32.totalorder %v7390_v3, 7  ;;  %vm7392_vm3 = vcmask 523264  }
 0x289   : > { %v5952_v29 = vmax.f32 %v1929_v5, 0.0  ;;  %v3902_v61 = vunpack.i.h.bf16 %v3900_v7  ;;  %v3901_v42 = vunpack.i.l.bf16 %v3900_v7  ;;  %vm7387_vm7 = vmmov %vm7386_vm0 }
 0x28a   : > { %v1541_v57 = vpop.f32.mrf.mxu2 }
 0x28b   : > { %v2329_v19 = vsel %vm7373_vm15, %v2297_v36, %v3902_v61  ;;  %v2328_v49 = vsel %vm7374_vm1, %v2296_v26, %v3901_v42  ;;  %v1542_v16 = vadd.f32 %v5804_v2, %v1541_v57  ;;  %v3973_v7 = vpack.i.bf16 %v5952_v29, %v5916_v39 }
 0x28c   : > { %v5967_v5 = vpack.c.bf16 %v2329_v19, %v2328_v49  ;;  %vm5976_vm15 = vcmp.ne.s32.totalorder %v293_v30, 0  ;;  %v7377_v36 = vmov 0  ;;  %vm5980_vm1 = vcmp.ne.s32.totalorder %v293_v30, 7 }
 0x28d   : > { %v1737_v37 = vadd.f32 %v1705_v58, %v1542_v16  ;;  %3974 = vrot.lane.b32.xlu0 %v3973_v7, %s4004_s25  ;;  %v7378_v36 = vsel %vm5976_vm15, 4294967295, %v7377_v36  ;;  %v7379_v26 = vmov 0  ;;  %v3911_v57 = vunpack.i.l.bf16 %v3910_v18  ;;  %v7383_v16 = vld [vmem:[#allocation67_spill] sm:$0xff] }
 0x28e   : > { %v7380_v26 = vsel %vm5980_vm1, 4294967295, %v7379_v26  ;;  %v1978_v49 = vsel %vm7381_vm13, %v5403_v12, 0.0  ;;  %v7384_v7 = vrot.slane %v7383_v16, 1  ;;  %v3912_v58 = vunpack.i.h.bf16 %v3910_v18 }
 0x28f   : > { %v1930_v21 = vadd.f32 %v1898_v10, %v1737_v37  ;;  %v3905_v31 = vpop.permute.xlu1 %3904  ;;  %vm7389_vm13 = vcmp.ne.s32.totalorder %v7388_v22, 7  ;;  %v3837_v16 = vunpack.i.h.bf16 %v5525_v50 }
 0x290   : > { %v3907_v61 = vunpack.i.h.bf16 %v3905_v31  ;;  %v3906_v42 = vunpack.i.l.bf16 %v3905_v31  ;;  %v1803_v56 = vsel %vm7385_vm6, %v1770_v8, %v7384_v7  ;;  %v2024_v12 = vsel %vm7389_vm13, %v5952_v29, 0.0  ;;  %v7393_v31 = vld [vmem:[#allocation85_spill] sm:$0xff]  ;;  %vm7394_vm6 = vmmov %vm7392_vm3 }
 0x291   : > { %v5984_v19 = vmax.f32 %v1930_v21, 0.0  ;;  %v1706_v8 = vsel %vm5976_vm15, %v7393_v31, 0.0 }
 0x292   : > { %v2299_v60 = vsel %vm7386_vm0, %v1979_v13, %v3907_v61  ;;  %v2298_v30 = vsel %vm7387_vm7, %v1978_v49, %v3906_v42  ;;  %v1543_v37 = vpop.f32.mrf.mxu2 }
 0x293   : > { %v1544_v10 = vadd.f32 %v5804_v2, %v1543_v37  ;;  %v2025_v44 = vsel %vm7391_vm14, %v5984_v19, 0.0  ;;  %v2330_v21 = vsel %vm7392_vm3, %v2298_v30, %v3911_v57  ;;  %v2331_v61 = vsel %vm7394_vm6, %v2299_v60, %v3912_v58  ;;  %v7395_v30 = vld [vmem:[#allocation46_spill] sm:$0xff]  ;;  %v7398_v60 = vld [vmem:[#allocation48_spill] sm:$0xff] }
 0x294   : > { %v3978_v18 = vpack.i.bf16 %v2025_v44, %v2024_v12  ;;  %v6010_v49 = vpack.c.bf16 %v2331_v61, %v2330_v21  ;;  %v1899_v2 = vsel %vm5980_vm1, %v1803_v56, 0.0  ;;  %v3842_v57 = vunpack.i.h.bf16 %v5614_v54  ;;  %v7396_v37 = vld [vmem:[#allocation54_spill] sm:$0xff]  ;;  %v7400_v44 = vld [vmem:[#allocation53_spill] sm:$0xff] }
 0x295   : > { %v1738_v42 = vadd.f32 %v1706_v8, %v1544_v10  ;;  %vm7397_vm3 = vcmp.ne.s32.totalorder %v7396_v37, 0  ;;  %v3836_v58 = vunpack.i.l.bf16 %v5525_v50  ;;  %vm7399_vm7 = vcmp.ne.s32.totalorder %v7398_v60, 7  ;;  %v7402_v8 = vld [vmem:[#allocation45_spill] sm:$0xff] }
 0x296   : > { %3979 = vrot.lane.b32.xlu1 %v3978_v18, %s4005_s26  ;;  %v1965_v12 = vsel %vm7397_vm3, %v7395_v30, 0.0  ;;  %v2027_v10 = vsel %vm7399_vm7, %v7395_v30, 0.0  ;;  %v3841_v56 = vunpack.i.l.bf16 %v5614_v54  ;;  %vm7401_vm0 = vcmp.ne.s32.totalorder %v7400_v44, 0 }
 0x297   : > { %v1931_v13 = vadd.f32 %v1899_v2, %v1738_v42  ;;  %vm7403_vm13 = vcmp.ne.s32.totalorder %v7402_v8, 7  ;;  %vm7404_vm14 = vcmask 261120   ;;  %vm7406_vm3 = vcmask 523264  }
 0x298   : > { %v2285_v61 = vsel %vm7404_vm14, %v1965_v12, %v3837_v16  ;;  %vm7405_vm6 = vmmov %vm7404_vm14  ;;  %vm7412_vm14 = vcmp.ne.s32.totalorder %v7240_v9, 0 }
 0x299   : > { %v1963_v7 = vmax.f32 %v1931_v13, 0.0  ;;  %v2317_v50 = vsel %vm7406_vm3, %v2285_v61, %v3842_v57  ;;  %vm7407_vm7 = vmmov %vm7406_vm3  ;;  %v1981_v12 = vsel %vm7412_vm14, %v5496_v41, 0.0  ;;  %v7418_v61 = vld [vmem:[#allocation2_spill] sm:$0xff]  ;;  %vm7419_vm14 = vcmp.ne.s32.totalorder %v7259_v38, 0 }
 0x29a   : > { %vm7413_vm3 = vmmov %vm7405_vm6 }
 0x29b   : > { %v1964_v21 = vsel %vm7401_vm0, %v1963_v7, 0.0  ;;  %v3983_v31 = vpack.i.bf16 %v1963_v7, %v5984_v19  ;;  %v2026_v18 = vsel %vm7403_vm13, %v1963_v7, 0.0  ;;  %vm7408_vm0 = vcmask 785408  }
 0x29c   : > { %v3988_v42 = vpack.i.bf16 %v2027_v10, %v2026_v18  ;;  %v2284_v2 = vsel %vm7405_vm6, %v1964_v21, %v3836_v58  ;;  %vm7409_vm1 = vmmov %vm7408_vm0  ;;  %vm7411_vm13 = vcmp.ne.s32.totalorder %v7238_v35, 0 }
 0x29d   : > { %3984 = vrot.lane.b32.xlu2 %v3983_v31, %s4004_s25  ;;  %v2316_v13 = vsel %vm7407_vm7, %v2284_v2, %v3841_v56  ;;  %vm7410_vm15 = vmmov %vm7408_vm0  ;;  %v1980_v57 = vsel %vm7411_vm13, %v5465_v6, 0.0  ;;  %v3925_v6 = vpop.permute.xlu2 %3924  ;;  %v7420_v2 = vld [vmem:[#allocation112_spill] sm:$0xff] }
 0x29e   : > { %3989 = vrot.lane.b32.xlu0 %v3988_v42, %s4005_s26  ;;  %v2348_v54 = vpack.c.bf16 %v2317_v50, %v2316_v13  ;;  %vm7417_vm13 = vmmov %vm7408_vm0  ;;  %v3927_v41 = vunpack.i.h.bf16 %v3925_v6  ;;  %v3926_v35 = vunpack.i.l.bf16 %v3925_v6  ;;  %v1982_v42 = vsel %vm7419_vm14, %v7418_v61, 0.0  ;;  %v7421_v50 = vld [vmem:[#allocation13_spill] sm:$0xff] }
 0x29f   : > { %v3915_v7 = vpop.permute.xlu0 %3914  ;;  %vm7427_vm14 = vcmp.ne.s32.totalorder %v7283_v28, 0 }
 0x2a0   : > { %3414 = vmatmul.msk.bf16.vlgmr.msrb.gmra.mxu3 %vm7408_vm0, %v2348_v54  ;;  %3478 = vmatmul.msk.bf16.vlgmr.msrb.gmra.mxu0 %vm7409_vm1, %v2348_v54  ;;  %v3917_v16 = vunpack.i.h.bf16 %v3915_v7  ;;  %v3916_v30 = vunpack.i.l.bf16 %v3915_v7  ;;  %vm7414_vm1 = vmmov %vm7407_vm7 }
 0x2a1   : > { %3518 = vmatmul.msk.bf16.vlgmr.msrb.gmra.mxu1 %vm7410_vm15, %v2348_v54  ;;  %vm7415_vm15 = vmmov %vm7414_vm1 }
 0x2a2   : > { %v2300_v56 = vsel %vm7405_vm6, %v1980_v57, %v3916_v30  ;;  %v2301_v44 = vsel %vm7413_vm3, %v1981_v12, %v3917_v16  ;;  %vm7416_vm7 = vmmov %vm7408_vm0  ;;  %vm7422_vm6 = vcmp.ne.s32.totalorder %v7421_v50, 0 }
 0x2a3   : > { %v1983_v13 = vsel %vm7422_vm6, %v7420_v2, 0.0  ;;  %vm7428_vm6 = vcmp.ne.s32.totalorder %v7285_v23, 0 }
 0x2a4   : > { %v2303_v16 = vsel %vm7413_vm3, %v1983_v13, %v3927_v41  ;;  %v1985_v6 = vsel %vm7428_vm6, %v5633_v27, 0.0 }
 0x2a8   : > { %v3920_v37 = vpop.permute.xlu1 %3919 }
 0x2a9   : > { %v3922_v58 = vunpack.i.h.bf16 %v3920_v37  ;;  %v3921_v10 = vunpack.i.l.bf16 %v3920_v37 }
 0x2ab   : > { %v2332_v21 = vsel %vm7414_vm1, %v2300_v56, %v3921_v10  ;;  %v2333_v31 = vsel %vm7415_vm15, %v2301_v44, %v3922_v58  ;;  %vm7423_vm1 = vmmov %vm7413_vm3 }
 0x2ac   : > { %v6049_v18 = vpack.c.bf16 %v2333_v31, %v2332_v21  ;;  %v2302_v30 = vsel %vm7423_vm1, %v1982_v42, %v3926_v35  ;;  %v7426_v21 = vld [vmem:[#allocation15_spill] sm:$0xff]  ;;  %vm7429_vm3 = vmmov %vm7408_vm0 }
 0x2ad   : > { %v1984_v31 = vsel %vm7427_vm14, %v7426_v21, 0.0  ;;  %vm7433_vm14 = vmmov %vm7429_vm3 }
 0x2ae   : > { %vm7434_vm6 = vmmov %vm7429_vm3 }
 0x2b0   : > { %3415 = vmatmul.msk.bf16.gmra.mxu3 %vm7416_vm7, %v5594_v0  ;;  %3479 = vmatmul.msk.bf16.gmra.mxu0 %vm7408_vm0, %v5594_v0  ;;  %vm7424_vm7 = vmmov %vm7415_vm15  ;;  %v3940_v12 = vpop.permute.xlu2 %3939 }
 0x2b1   : > { %3519 = vmatmul.msk.bf16.gmra.mxu1 %vm7417_vm13, %v5594_v0  ;;  %vm7425_vm13 = vmmov %vm7408_vm0  ;;  %v3942_v56 = vunpack.i.h.bf16 %v3940_v12  ;;  %v3941_v44 = vunpack.i.l.bf16 %v3940_v12 }
 0x2b8   : > { %v3930_v9 = vpop.permute.xlu0 %3929 }
 0x2b9   : > { %v3932_v54 = vunpack.i.h.bf16 %v3930_v9  ;;  %v3931_v7 = vunpack.i.l.bf16 %v3930_v9 }
 0x2bb   : > { %v2334_v0 = vsel %vm7415_vm15, %v2302_v30, %v3931_v7  ;;  %v2335_v37 = vsel %vm7424_vm7, %v2303_v16, %v3932_v54  ;;  %vm7430_vm15 = vmmov %vm7423_vm1 }
 0x2bc   : > { %v6067_v57 = vpack.c.bf16 %v2335_v37, %v2334_v0 }
 0x2bf   : > { %v3935_v58 = vpop.permute.xlu1 %3934 }
 0x2c0   : > { %v3937_v38 = vunpack.i.h.bf16 %v3935_v58  ;;  %v3936_v10 = vunpack.i.l.bf16 %v3935_v58  ;;  %3416 = vmatmul.msk.bf16.gmra.mxu3 %vm7408_vm0, %v5701_v48  ;;  %3480 = vmatmul.msk.bf16.gmra.mxu0 %vm7425_vm13, %v5701_v48  ;;  %vm7431_vm0 = vmmov %vm7424_vm7 }
 0x2c1   : > { %3520 = vmatmul.msk.bf16.gmra.mxu1 %vm7429_vm3, %v5701_v48  ;;  %vm7432_vm13 = vmmov %vm7429_vm3  ;;  %vm7435_vm3 = vcmp.ne.s32.totalorder %v4121_v32, 0 }
 0x2c2   : > { %v2305_v41 = vsel %vm7423_vm1, %v1985_v6, %v3937_v38  ;;  %v2304_v35 = vsel %vm7430_vm15, %v1984_v31, %v3936_v10  ;;  %v1986_v2 = vsel %vm7435_vm3, %v5672_v59, 0.0  ;;  %vm7436_vm1 = vcmp.ne.s32.totalorder %v4123_v33, 0  ;;  %vm7440_vm3 = vmmov %vm7434_vm6 }
 0x2c3   : > { %v2336_v9 = vsel %vm7424_vm7, %v2304_v35, %v3941_v44  ;;  %v2337_v61 = vsel %vm7431_vm0, %v2305_v41, %v3942_v56  ;;  %v1987_v50 = vsel %vm7436_vm1, %v5708_v47, 0.0  ;;  %vm7437_vm7 = vmmov %vm7430_vm15  ;;  %vm7441_vm1 = vcmp.ne.s32.totalorder %v7330_v11, 0 }
 0x2c4   : > { %v6085_v42 = vpack.c.bf16 %v2337_v61, %v2336_v9  ;;  %v1988_v37 = vsel %vm7441_vm1, %v5735_v63, 0.0  ;;  %vm7446_vm1 = vcmp.ne.s32.totalorder %v7357_v15, 0 }
 0x2c5   : > { %v1990_v41 = vsel %vm7446_vm1, %v5825_v53, 0.0  ;;  %vm7451_vm1 = vmmov %vm7440_vm3 }
 0x2c7   : > { %v3955_v32 = vpop.permute.xlu2 %3954 }
 0x2c8   : > { %v3957_v33 = vunpack.i.h.bf16 %v3955_v32  ;;  %v3956_v59 = vunpack.i.l.bf16 %v3955_v32 }
 0x2cf   : > { %v3945_v27 = vpop.permute.xlu0 %3944 }
 0x2d0   : > { %3417 = vmatmul.msk.bf16.gmra.mxu3 %vm7432_vm13, %v5770_v51  ;;  %3481 = vmatmul.msk.bf16.gmra.mxu0 %vm7433_vm14, %v5770_v51  ;;  %v3947_v48 = vunpack.i.h.bf16 %v3945_v27  ;;  %v3946_v28 = vunpack.i.l.bf16 %v3945_v27  ;;  %vm7438_vm13 = vmmov %vm7431_vm0 }
 0x2d1   : > { %3521 = vmatmul.msk.bf16.gmra.mxu1 %vm7434_vm6, %v5770_v51  ;;  %vm7439_vm14 = vmmov %vm7434_vm6 }
 0x2d2   : > { %v2307_v7 = vsel %vm7430_vm15, %v1987_v50, %v3947_v48  ;;  %v2306_v16 = vsel %vm7437_vm7, %v1986_v2, %v3946_v28  ;;  %vm7442_vm15 = vcmp.ne.s32.totalorder %v7332_v17, 0 }
 0x2d3   : > { %v1989_v12 = vsel %vm7442_vm15, %v5783_v55, 0.0  ;;  %vm7447_vm15 = vcmp.ne.s32.totalorder %v7359_v24, 0 }
 0x2d4   : > { %v2309_v10 = vsel %vm7437_vm7, %v1989_v12, %v3957_v33  ;;  %v1991_v35 = vsel %vm7447_vm15, %v5847_v62, 0.0  ;;  %vm7452_vm15 = vmmov %vm7451_vm1 }
 0x2d8   : > { %v3950_v23 = vpop.permute.xlu1 %3949 }
 0x2d9   : > { %v3952_v13 = vunpack.i.h.bf16 %v3950_v23  ;;  %v3951_v54 = vunpack.i.l.bf16 %v3950_v23 }
 0x2db   : > { %v2338_v51 = vsel %vm7431_vm0, %v2306_v16, %v3951_v54  ;;  %v2339_v30 = vsel %vm7438_vm13, %v2307_v7, %v3952_v13  ;;  %vm7443_vm0 = vmmov %vm7437_vm7 }
 0x2dc   : > { %v6103_v0 = vpack.c.bf16 %v2339_v30, %v2338_v51  ;;  %v2308_v56 = vsel %vm7443_vm0, %v1988_v37, %v3956_v59  ;;  %vm7448_vm7 = vmmov %vm7440_vm3 }
 0x2e0   : > { %3418 = vmatmul.msk.bf16.gmra.mxu3 %vm7439_vm14, %v5819_v4  ;;  %3482 = vmatmul.msk.bf16.gmra.mxu0 %vm7434_vm6, %v5819_v4  ;;  %vm7444_vm14 = vmmov %vm7438_vm13  ;;  %v3970_v31 = vpop.permute.xlu2 %3969 }
 0x2e1   : > { %3522 = vmatmul.msk.bf16.gmra.mxu1 %vm7440_vm3, %v5819_v4  ;;  %vm7445_vm6 = vmmov %vm7440_vm3  ;;  %v3972_v55 = vunpack.i.h.bf16 %v3970_v31  ;;  %v3971_v17 = vunpack.i.l.bf16 %v3970_v31 }
 0x2e8   : > { %v3960_v47 = vpop.permute.xlu0 %3959 }
 0x2e9   : > { %v3962_v58 = vunpack.i.h.bf16 %v3960_v47  ;;  %v3961_v38 = vunpack.i.l.bf16 %v3960_v47 }
 0x2eb   : > { %v2340_v4 = vsel %vm7438_vm13, %v2308_v56, %v3961_v38  ;;  %v2341_v44 = vsel %vm7444_vm14, %v2309_v10, %v3962_v58  ;;  %vm7449_vm13 = vmmov %vm7443_vm0 }
 0x2ec   : > { %v6121_v21 = vpack.c.bf16 %v2341_v44, %v2340_v4  ;;  %v6199_v44 = vld [vmem:[%s6647_s4] ss:$0 sm:$0xff] }
 0x2ef   : > { %v3965_v6 = vpop.permute.xlu1 %3964 }
 0x2f0   : > { %v3967_v11 = vunpack.i.h.bf16 %v3965_v6  ;;  %v3966_v63 = vunpack.i.l.bf16 %v3965_v6  ;;  %3419 = vmatmul.msk.bf16.gmra.mxu3 %vm7445_vm6, %v5907_v14  ;;  %3483 = vmatmul.msk.bf16.gmra.mxu0 %vm7440_vm3, %v5907_v14  ;;  %vm7450_vm6 = vmmov %vm7444_vm14 }
 0x2f1   : > { %3523 = vmatmul.msk.bf16.gmra.mxu1 %vm7448_vm7, %v5907_v14  ;;  %vm7453_vm7 = vcmp.ne.s32.totalorder %v7388_v22, 0 }
 0x2f2   : > { %v2311_v9 = vsel %vm7443_vm0, %v1991_v35, %v3967_v11  ;;  %v2310_v61 = vsel %vm7449_vm13, %v1990_v41, %v3966_v63  ;;  %v1992_v24 = vsel %vm7453_vm7, %v5886_v25, 0.0  ;;  %vm7454_vm0 = vcmp.ne.s32.totalorder %v7390_v3, 0 }
 0x2f3   : > { %v2342_v27 = vsel %vm7444_vm14, %v2310_v61, %v3971_v17  ;;  %v2343_v48 = vsel %vm7450_vm6, %v2311_v9, %v3972_v55  ;;  %v1993_v23 = vsel %vm7454_vm0, %v5916_v39, 0.0  ;;  %vm7455_vm14 = vmmov %vm7449_vm13  ;;  %vm7458_vm7 = vcmp.ne.s32.totalorder %v7402_v8, 0 }
 0x2f4   : > { %v6139_v28 = vpack.c.bf16 %v2343_v48, %v2342_v27  ;;  %v1994_v39 = vsel %vm7458_vm7, %v5952_v29, 0.0  ;;  %vm7459_vm0 = vcmp.ne.s32.totalorder %v7398_v60, 0  ;;  %v7489_v27 = vld [vmem:[#allocation57_spill] sm:$0xff] }
 0x2f5   : > { %v1995_v3 = vsel %vm7459_vm0, %v5984_v19, 0.0 }
 0x2f7   : > { %v3985_v7 = vpop.permute.xlu2 %3984 }
 0x2f8   : > { %v3987_v30 = vunpack.i.h.bf16 %v3985_v7  ;;  %v3986_v22 = vunpack.i.l.bf16 %v3985_v7 }
 0x2fa   : > { %v2315_v59 = vsel %vm7455_vm14, %v1995_v3, %v3987_v30 }
 0x2ff   : > { %v3975_v53 = vpop.permute.xlu0 %3974 }
 0x300   : > { %3420 = vmatmul.msk.bf16.gmra.mxu3 %vm7440_vm3, %v5967_v5  ;;  %3484 = vmatmul.msk.bf16.gmra.mxu0 %vm7451_vm1, %v5967_v5  ;;  %v3977_v62 = vunpack.i.h.bf16 %v3975_v53  ;;  %v3976_v14 = vunpack.i.l.bf16 %v3975_v53  ;;  %vm7456_vm3 = vmmov %vm7450_vm6 }
 0x301   : > { %3524 = vmatmul.msk.bf16.gmra.mxu1 %vm7452_vm15, %v5967_v5  ;;  %vm7457_vm15 = vmmov %vm7451_vm1 }
 0x302   : > { %v2313_v13 = vsel %vm7449_vm13, %v1993_v23, %v3977_v62  ;;  %v2312_v54 = vsel %vm7455_vm14, %v1992_v24, %v3976_v14  ;;  %vm7460_vm13 = vmmov %vm7451_vm1  ;;  %v7474_v23 = vld [vmem:[#allocation52_spill] sm:$0xff] }
 0x303   : > { %vm7464_vm7 = vmmov %vm7460_vm13 }
 0x304   : > { %vm7465_vm0 = vmmov %vm7464_vm7 }
 0x308   : > { %v3980_v15 = vpop.permute.xlu1 %3979 }
 0x309   : > { %v3982_v2 = vunpack.i.h.bf16 %v3980_v15  ;;  %v3981_v50 = vunpack.i.l.bf16 %v3980_v15 }
 0x30b   : > { %v2344_v5 = vsel %vm7450_vm6, %v2312_v54, %v3981_v50  ;;  %v2345_v16 = vsel %vm7456_vm3, %v2313_v13, %v3982_v2  ;;  %vm7461_vm6 = vmmov %vm7455_vm14  ;;  %vm7467_vm14 = vcmp.lt.s32.totalorder %v4044_v1, 1 }
 0x30c   : > { %v6157_v51 = vpack.c.bf16 %v2345_v16, %v2344_v5  ;;  %v2314_v47 = vsel %vm7461_vm6, %v1994_v39, %v3986_v22 }
 0x310   : > { %v3990_v25 = vpop.permute.xlu0 %3989  ;;  %3421 = vmatmul.msk.bf16.gmra.mxu3 %vm7451_vm1, %v6010_v49  ;;  %3485 = vmatmul.msk.bf16.gmra.mxu0 %vm7457_vm15, %v6010_v49  ;;  %vm7462_vm1 = vmmov %vm7456_vm3 }
 0x311   : > { %v3992_v32 = vunpack.i.h.bf16 %v3990_v25  ;;  %v3991_v33 = vunpack.i.l.bf16 %v3990_v25  ;;  %3525 = vmatmul.msk.bf16.gmra.mxu1 %vm7460_vm13, %v6010_v49  ;;  %vm7463_vm15 = vmmov %vm7460_vm13  ;;  %vm7466_vm13 = vcmp.lt.s32.totalorder %v4044_v1, 7 }
 0x312   : > { %vm7469_vm6 = vmmov %vm7466_vm13 }
 0x313   : > { %v2346_v37 = vsel %vm7456_vm3, %v2314_v47, %v3991_v33  ;;  %v2347_v12 = vsel %vm7462_vm1, %v2315_v59, %v3992_v32  ;;  %vm7470_vm3 = vmmov %vm7465_vm0  ;;  %v7480_v47 = vld [vmem:[#allocation59_spill] sm:$0xff] }
 0x314   : > { %v6175_v58 = vpack.c.bf16 %v2347_v12, %v2346_v37  ;;  %vm7471_vm1 = vmmov %vm7465_vm0 }
 0x31d   : > { %v6177_v29 = vpop.f32.mrf.mxu0 }
 0x31e   : > { %v6179_v8 = vpop.f32.mrf.mxu1  ;;  %v2957_v60 = vrot.slane %v6177_v29, 1 }
 0x320   : > { %3422 = vmatmul.msk.bf16.gmra.mxu3 %vm7463_vm15, %v6049_v18  ;;  %3486 = vmatmul.msk.bf16.gmra.mxu0 %vm7464_vm7, %v6049_v18  ;;  %vm7473_vm15 = vmmov %vm7465_vm0 }
 0x321   : > { %3526 = vmatmul.msk.bf16.gmra.mxu1 %vm7465_vm0, %v6049_v18  ;;  %vm7478_vm7 = vmmov %vm7469_vm6 }
 0x323   : > { %v6187_v19 = vpop.f32.mrf.mxu3 }
 0x324   : > { %v2829_v18 = vrot.slane %v6187_v19, 7 }
 0x325   : > { %v2622_v49 = vpop.f32.mrf.mxu0 }
 0x326   : > { %v2958_v38 = vrot.slane %v2622_v49, 1  ;;  %v2751_v10 = vpop.f32.mrf.mxu1 }
 0x327   : > { %v2752_v11 = vadd.f32 %v6199_v44, %v2751_v10 }
 0x328   : > { %v6194_v56 = vsel %vm7466_vm13, %v2957_v60, %v2958_v38  ;;  %vm7485_vm13 = vmmov %vm7471_vm1 }
 0x32b   : > { %v2471_v4 = vpop.f32.mrf.mxu3 }
 0x32c   : > { %v2830_v31 = vrot.slane %v2471_v4, 7 }
 0x32d   : > { %v2625_v6 = vpop.f32.mrf.mxu0 }
 0x32e   : > { %v2891_v63 = vsel %vm7467_vm14, %v2829_v18, %v2830_v31  ;;  %v2959_v55 = vrot.slane %v2625_v6, 1  ;;  %v2754_v17 = vpop.f32.mrf.mxu1 }
 0x32f   : > { %v2894_v35 = vsel %vm5026_vm9, %v2891_v63, 0.0  ;;  %v2755_v50 = vadd.f32 %v6199_v44, %v2754_v17  ;;  %vm7477_vm9 = vcmask 261120  }
 0x330   : > { %v2926_v9 = vadd.f32 %v2894_v35, %v2752_v11  ;;  %v3018_v61 = vsel %vm7469_vm6, %v2958_v38, %v2959_v55  ;;  %3423 = vmatmul.msk.bf16.gmra.mxu3 %vm7470_vm3, %v6067_v57  ;;  %3487 = vmatmul.msk.bf16.gmra.mxu0 %vm7471_vm1, %v6067_v57  ;;  %vm7483_vm0 = vmmov %vm7477_vm9 }
 0x331   : > { %v3022_v48 = vsel %vm5034_vm2, %v3018_v61, 0.0  ;;  %3527 = vmatmul.msk.bf16.gmra.mxu1 %vm7473_vm15, %v6067_v57  ;;  %vm7475_vm2 = vmmov %vm7467_vm14 }
 0x332   : > { %v3054_v53 = vadd.f32 %v3022_v48, %v2926_v9  ;;  %vm7486_vm14 = vmmov %vm7471_vm1 }
 0x333   : > { %v2474_v62 = vpop.f32.mrf.mxu3  ;;  %vm7499_vm15 = vmmov %vm7483_vm0 }
 0x334   : > { %v3086_v14 = vmax.f32 %v3054_v53, 0.0  ;;  %v2831_v15 = vrot.slane %v2474_v62, 7 }
 0x335   : > { %v2627_v24 = vpop.f32.mrf.mxu0 }
 0x336   : > { %v3118_v2 = vadd.f32 %v7474_v23, %v3086_v14  ;;  %v2890_v13 = vsel %vm7475_vm2, %v2830_v31, %v2831_v15  ;;  %v2960_v57 = vrot.slane %v2627_v24, 1  ;;  %v2756_v54 = vpop.f32.mrf.mxu1 }
 0x337   : > { %v2895_v5 = vsel %vm5058_vm8, %v2890_v13, 0.0  ;;  %v2757_v12 = vadd.f32 %v6199_v44, %v2756_v54  ;;  %vm7481_vm8 = vmmov %vm7475_vm2 }
 0x338   : > { %3150 = vst.msk [vmem:[%s6223_s19 + $0x8] sm:$0xff] %vm7477_vm9, %v3118_v2  ;;  %v2927_v16 = vadd.f32 %v2895_v5, %v2755_v50  ;;  %v3017_v30 = vsel %vm7478_vm7, %v2959_v55, %v2960_v57 }
 0x339   : > { %v3023_v25 = vsel %vm5066_vm4, %v3017_v30, 0.0  ;;  %vm7484_vm4 = vmmov %vm7469_vm6  ;;  %v7495_v30 = vld [vmem:[#allocation58_spill] sm:$0xff] }
 0x33a   : > { %v3055_v39 = vadd.f32 %v3023_v25, %v2927_v16  ;;  %vm7488_vm6 = vmmov %vm7471_vm1 }
 0x33b   : > { %v2476_v3 = vpop.f32.mrf.mxu3  ;;  %vm7493_vm3 = vmmov %vm7484_vm4 }
 0x33c   : > { %v3087_v32 = vmax.f32 %v3055_v39, 0.0  ;;  %v2832_v33 = vrot.slane %v2476_v3, 7 }
 0x33d   : > { %v2630_v59 = vpop.f32.mrf.mxu0 }
 0x33e   : > { %v3119_v37 = vadd.f32 %v7480_v47, %v3087_v32  ;;  %v2889_v49 = vsel %vm7481_vm8, %v2831_v15, %v2832_v33  ;;  %v2961_v38 = vrot.slane %v2630_v59, 1  ;;  %v2759_v10 = vpop.f32.mrf.mxu1 }
 0x33f   : > { %v2896_v31 = vsel %vm5085_vm5, %v2889_v49, 0.0  ;;  %v2760_v53 = vadd.f32 %v6199_v44, %v2759_v10  ;;  %vm7490_vm5 = vmmov %vm7475_vm2 }
 0x340   : > { %3151 = vst.msk [vmem:[%s6223_s19 + $0x10] sm:$0xff] %vm7483_vm0, %v3119_v37  ;;  %v2928_v6 = vadd.f32 %v2896_v31, %v2757_v12  ;;  %v3016_v11 = vsel %vm7484_vm4, %v2960_v57, %v2961_v38  ;;  %3424 = vmatmul.msk.bf16.gmra.mxu3 %vm7485_vm13, %v6085_v42  ;;  %3488 = vmatmul.msk.bf16.gmra.mxu0 %vm7486_vm14, %v6085_v42  ;;  %v7503_v12 = vld [vmem:[#allocation95_spill] sm:$0xff]  ;;  %vm7511_vm14 = vmmov %vm7493_vm3 }
 0x341   : > { %v3024_v55 = vsel %vm5091_vm12, %v3016_v11, 0.0  ;;  %3528 = vmatmul.msk.bf16.gmra.mxu1 %vm7488_vm6, %v6085_v42  ;;  %vm7492_vm12 = vmmov %vm7483_vm0  ;;  %vm7504_vm7 = vnez %v7503_v12  ;;  %v7506_v11 = vld [vmem:[#allocation64_spill] sm:$0xff] }
 0x342   : > { %v3056_v17 = vadd.f32 %v3024_v55, %v2928_v6  ;;  %vm7507_vm0 = vmmov %vm7490_vm5 }
 0x343   : > { %v2479_v41 = vpop.f32.mrf.mxu3  ;;  %vm7510_vm13 = vmmov %vm7492_vm12 }
 0x344   : > { %v3088_v35 = vmax.f32 %v3056_v17, 0.0  ;;  %v2833_v9 = vrot.slane %v2479_v41, 7 }
 0x345   : > { %v2632_v61 = vpop.f32.mrf.mxu0 }
 0x346   : > { %v3120_v48 = vadd.f32 %v7489_v27, %v3088_v35  ;;  %v2888_v62 = vsel %vm7490_vm5, %v2832_v33, %v2833_v9  ;;  %v2962_v14 = vrot.slane %v2632_v61, 1  ;;  %v2761_v15 = vpop.f32.mrf.mxu1  ;;  %v7497_v33 = vld [vmem:[#allocation56_spill] sm:$0xff]  ;;  %vm7515_vm5 = vmmov %vm7507_vm0 }
 0x347   : > { %v2897_v23 = vsel %vm5120_vm10, %v2888_v62, 0.0  ;;  %v2762_v25 = vadd.f32 %v6199_v44, %v2761_v15  ;;  %vm7496_vm10 = vmmov %vm7475_vm2  ;;  %vm7498_vm1 = vnez %v7497_v33 }
 0x348   : > { %3152 = vst.msk [vmem:[%s6223_s19 + $0x18] sm:$0xff] %vm7492_vm12, %v3120_v48  ;;  %v2929_v42 = vadd.f32 %v2897_v23, %v2760_v53  ;;  %v3015_v2 = vsel %vm7493_vm3, %v2961_v38, %v2962_v14  ;;  %vm7501_vm2 = vmmov %vm7488_vm6  ;;  %v7512_v48 = vld [vmem:[#allocation96_spill] sm:$0xff] }
 0x349   : > { %v3025_v13 = vsel %vm5128_vm11, %v3015_v2, 0.0  ;;  %vm7500_vm11 = vmmov %vm7493_vm3  ;;  %vm7513_vm6 = vnez %v7512_v48 }
 0x34a   : > { %v3057_v57 = vadd.f32 %v3025_v13, %v2929_v42  ;;  %vm7502_vm9 = vmmov %vm7501_vm2  ;;  %v7514_v42 = vld [vmem:[#allocation65_spill] sm:$0xff] }
 0x34b   : > { %v2481_v54 = vpop.f32.mrf.mxu3  ;;  %vm7505_vm8 = vmmov %vm7501_vm2 }
 0x34c   : > { %v3089_v7 = vmax.f32 %v3057_v57, 0.0  ;;  %v2834_v5 = vrot.slane %v2481_v54, 7  ;;  %vm7518_vm3 = vmmov %vm7510_vm13 }
 0x34d   : > { %v2635_v16 = vpop.f32.mrf.mxu0 }
 0x34e   : > { %v3121_v22 = vadd.f32 %v7495_v30, %v3089_v7  ;;  %v2887_v39 = vsel %vm7496_vm10, %v2833_v9, %v2834_v5  ;;  %v2963_v3 = vrot.slane %v2635_v16, 1  ;;  %v2764_v32 = vpop.f32.mrf.mxu1  ;;  %v7508_v9 = vld [vmem:[#allocation62_spill] sm:$0xff]  ;;  %v7516_v7 = vld [vmem:[#allocation63_spill] sm:$0xff]  ;;  %vm7519_vm10 = vmmov %vm7500_vm11 }
 0x34f   : > { %v2898_v59 = vsel %vm7498_vm1, %v2887_v39, 0.0  ;;  %v2765_v55 = vadd.f32 %v6199_v44, %v2764_v32  ;;  %vm7509_vm4 = vnez %v7508_v9  ;;  %vm7517_vm12 = vnez %v7516_v7  ;;  %vm7520_vm1 = vmmov %vm7501_vm2 }
 0x350   : > { %3153 = vst.msk [vmem:[%s6223_s19 + $0x20] sm:$0xff] %vm7499_vm15, %v3121_v22  ;;  %v2930_v47 = vadd.f32 %v2898_v59, %v2762_v25  ;;  %v3014_v37 = vsel %vm7500_vm11, %v2962_v14, %v2963_v3  ;;  %3425 = vmatmul.msk.bf16.gmra.mxu3 %vm7501_vm2, %v6103_v0  ;;  %3489 = vmatmul.msk.bf16.gmra.mxu0 %vm7502_vm9, %v6103_v0  ;;  %vm7521_vm15 = vmmov %vm7520_vm1  ;;  %v7522_v22 = vld [vmem:[#allocation97_spill] sm:$0xff] }
 0x351   : > { %v3026_v49 = vsel %vm7504_vm7, %v3014_v37, 0.0  ;;  %3529 = vmatmul.msk.bf16.gmra.mxu1 %vm7505_vm8, %v6103_v0  ;;  %vm7523_vm11 = vnez %v7522_v22  ;;  %vm7524_vm2 = vmmov %vm7520_vm1 }
 0x352   : > { %v3058_v38 = vadd.f32 %v3026_v49, %v2930_v47  ;;  %v7525_v47 = vld [vmem:[#allocation66_spill] sm:$0xff]  ;;  %vm7526_vm9 = vmmov %vm7507_vm0 }
 0x353   : > { %v2484_v10 = vpop.f32.mrf.mxu3  ;;  %vm7529_vm8 = vmmov %vm7518_vm3 }
 0x354   : > { %v3090_v4 = vmax.f32 %v3058_v38, 0.0  ;;  %v2835_v31 = vrot.slane %v2484_v10, 7 }
 0x355   : > { %v2637_v6 = vpop.f32.mrf.mxu0 }
 0x356   : > { %v3122_v63 = vadd.f32 %v7506_v11, %v3090_v4  ;;  %v2886_v17 = vsel %vm7507_vm0, %v2834_v5, %v2835_v31  ;;  %v2964_v41 = vrot.slane %v2637_v6, 1  ;;  %v2766_v35 = vpop.f32.mrf.mxu1  ;;  %v7527_v4 = vld [vmem:[#allocation60_spill] sm:$0xff]  ;;  %vm7530_vm0 = vmmov %vm7519_vm10  ;;  %v7531_v11 = vld [vmem:[#allocation98_spill] sm:$0xff] }
 0x357   : > { %v2899_v61 = vsel %vm7509_vm4, %v2886_v17, 0.0  ;;  %v2767_v50 = vadd.f32 %v6199_v44, %v2766_v35  ;;  %vm7528_vm7 = vnez %v7527_v4  ;;  %vm7532_vm4 = vnez %v7531_v11  ;;  %v7551_v4 = vld [vmem:[#allocation70_spill] sm:$0xff] }
 0x358   : > { %3154 = vst.msk [vmem:[%s6223_s19 + $0x28] sm:$0xff] %vm7510_vm13, %v3122_v63  ;;  %v2931_v0 = vadd.f32 %v2899_v61, %v2765_v55  ;;  %v3013_v27 = vsel %vm7511_vm14, %v2963_v3, %v2964_v41  ;;  %v7533_v61 = vld [vmem:[#allocation71_spill] sm:$0xff]  ;;  %vm7534_vm13 = vmmov %vm7515_vm5 }
 0x359   : > { %v3027_v53 = vsel %vm7513_vm6, %v3013_v27, 0.0  ;;  %vm7537_vm6 = vmmov %vm7518_vm3 }
 0x35a   : > { %v3059_v62 = vadd.f32 %v3027_v53, %v2931_v0 }
 0x35b   : > { %v2486_v14 = vpop.f32.mrf.mxu3 }
 0x35c   : > { %v3091_v15 = vmax.f32 %v3059_v62, 0.0  ;;  %v2836_v24 = vrot.slane %v2486_v14, 7  ;;  %v7535_v14 = vld [vmem:[#allocation61_spill] sm:$0xff] }
 0x35d   : > { %v2640_v23 = vpop.f32.mrf.mxu0  ;;  %vm7536_vm14 = vnez %v7535_v14  ;;  %v7562_v14 = vld [vmem:[#allocation76_spill] sm:$0xff] }
 0x35e   : > { %v3123_v2 = vadd.f32 %v7514_v42, %v3091_v15  ;;  %v2885_v13 = vsel %vm7515_vm5, %v2835_v31, %v2836_v24  ;;  %v2965_v57 = vrot.slane %v2640_v23, 1  ;;  %v2769_v54 = vpop.f32.mrf.mxu1  ;;  %vm7538_vm5 = vmmov %vm7530_vm0  ;;  %v7541_v42 = vld [vmem:[#allocation99_spill] sm:$0xff] }
 0x35f   : > { %v2900_v5 = vsel %vm7517_vm12, %v2885_v13, 0.0  ;;  %v2770_v12 = vadd.f32 %v6199_v44, %v2769_v54  ;;  %vm7539_vm12 = vmmov %vm7520_vm1 }
 0x360   : > { %3155 = vst.msk [vmem:[%s6223_s19 + $0x30] sm:$0xff] %vm7518_vm3, %v3123_v2  ;;  %v2932_v16 = vadd.f32 %v2900_v5, %v2767_v50  ;;  %v3012_v30 = vsel %vm7519_vm10, %v2964_v41, %v2965_v57  ;;  %3426 = vmatmul.msk.bf16.gmra.mxu3 %vm7520_vm1, %v6121_v21  ;;  %3490 = vmatmul.msk.bf16.gmra.mxu0 %vm7521_vm15, %v6121_v21  ;;  %vm7540_vm3 = vmmov %vm7520_vm1  ;;  %vm7542_vm10 = vnez %v7541_v42  ;;  %v7543_v5 = vld [vmem:[#allocation69_spill] sm:$0xff] }
 0x361   : > { %v3028_v25 = vsel %vm7523_vm11, %v3012_v30, 0.0  ;;  %3530 = vmatmul.msk.bf16.gmra.mxu1 %vm7524_vm2, %v6121_v21  ;;  %vm7544_vm15 = vmmov %vm7526_vm9 }
 0x362   : > { %v3060_v39 = vadd.f32 %v3028_v25, %v2932_v16  ;;  %vm7547_vm2 = vmmov %vm7537_vm6 }
 0x363   : > { %v2489_v3 = vpop.f32.mrf.mxu3 }
 0x364   : > { %v3092_v32 = vmax.f32 %v3060_v39, 0.0  ;;  %v2837_v33 = vrot.slane %v2489_v3, 7  ;;  %v7545_v3 = vld [vmem:[#allocation72_spill] sm:$0xff] }
 0x365   : > { %v2642_v59 = vpop.f32.mrf.mxu0  ;;  %vm7546_vm11 = vnez %v7545_v3 }
 0x366   : > { %v3124_v37 = vadd.f32 %v7525_v47, %v3092_v32  ;;  %v2884_v49 = vsel %vm7526_vm9, %v2836_v24, %v2837_v33  ;;  %v2966_v38 = vrot.slane %v2642_v59, 1  ;;  %v2771_v10 = vpop.f32.mrf.mxu1  ;;  %vm7548_vm9 = vmmov %vm7530_vm0  ;;  %v7549_v59 = vld [vmem:[#allocation100_spill] sm:$0xff] }
 0x367   : > { %v2901_v31 = vsel %vm7528_vm7, %v2884_v49, 0.0  ;;  %v2772_v27 = vadd.f32 %v6199_v44, %v2771_v10  ;;  %vm7550_vm7 = vnez %v7549_v59 }
 0x368   : > { %3156 = vst.msk [vmem:[%s6223_s19 + $0x38] sm:$0xff] %vm7529_vm8, %v3124_v37  ;;  %v2933_v21 = vadd.f32 %v2901_v31, %v2770_v12  ;;  %v3011_v6 = vsel %vm7530_vm0, %v2965_v57, %v2966_v38  ;;  %vm7552_vm8 = vmmov %vm7534_vm13 }
 0x369   : > { %v3029_v63 = vsel %vm7532_vm4, %v3011_v6, 0.0  ;;  %vm7555_vm4 = vmmov %vm7547_vm2 }
 0x36a   : > { %v3061_v55 = vadd.f32 %v3029_v63, %v2933_v21 }
 0x36b   : > { %v2491_v17 = vpop.f32.mrf.mxu3 }
 0x36c   : > { %v3093_v41 = vmax.f32 %v3061_v55, 0.0  ;;  %v2838_v35 = vrot.slane %v2491_v17, 7  ;;  %v7553_v55 = vld [vmem:[#allocation73_spill] sm:$0xff] }
 0x36d   : > { %v2645_v9 = vpop.f32.mrf.mxu0  ;;  %vm7554_vm0 = vnez %v7553_v55 }
 0x36e   : > { %v3125_v0 = vadd.f32 %v7533_v61, %v3093_v41  ;;  %v2883_v48 = vsel %vm7534_vm13, %v2837_v33, %v2838_v35  ;;  %v2967_v53 = vrot.slane %v2645_v9, 1  ;;  %v2774_v62 = vpop.f32.mrf.mxu1  ;;  %vm7556_vm13 = vmmov %vm7538_vm5  ;;  %v7559_v9 = vld [vmem:[#allocation101_spill] sm:$0xff] }
 0x36f   : > { %v2902_v15 = vsel %vm7536_vm14, %v2883_v48, 0.0  ;;  %v2775_v30 = vadd.f32 %v6199_v44, %v2774_v62  ;;  %vm7557_vm14 = vmmov %vm7520_vm1 }
 0x370   : > { %3157 = vst.msk [vmem:[%s6223_s19 + $0x40] sm:$0xff] %vm7537_vm6, %v3125_v0  ;;  %v2934_v24 = vadd.f32 %v2902_v15, %v2772_v27  ;;  %v3010_v23 = vsel %vm7538_vm5, %v2966_v38, %v2967_v53  ;;  %3427 = vmatmul.msk.bf16.gmra.mxu3 %vm7539_vm12, %v6139_v28  ;;  %3491 = vmatmul.msk.bf16.gmra.mxu0 %vm7540_vm3, %v6139_v28  ;;  %vm7558_vm6 = vmmov %vm7520_vm1  ;;  %vm7560_vm5 = vnez %v7559_v9 }
 0x371   : > { %v3030_v2 = vsel %vm7542_vm10, %v3010_v23, 0.0  ;;  %3531 = vmatmul.msk.bf16.gmra.mxu1 %vm7520_vm1, %v6139_v28  ;;  %vm7561_vm12 = vmmov %vm7520_vm1 }
 0x372   : > { %v3062_v50 = vadd.f32 %v3030_v2, %v2934_v24  ;;  %vm7563_vm3 = vmmov %vm7552_vm8 }
 0x373   : > { %v2494_v13 = vpop.f32.mrf.mxu3  ;;  %vm7566_vm1 = vmmov %vm7547_vm2 }
 0x374   : > { %v3094_v57 = vmax.f32 %v3062_v50, 0.0  ;;  %v2839_v54 = vrot.slane %v2494_v13, 7  ;;  %v7564_v50 = vld [vmem:[#allocation102_spill] sm:$0xff] }
 0x375   : > { %v2647_v7 = vpop.f32.mrf.mxu0  ;;  %vm7565_vm10 = vnez %v7564_v50 }
 0x376   : > { %v3126_v16 = vadd.f32 %v7543_v5, %v3094_v57  ;;  %v2882_v22 = vsel %vm7544_vm15, %v2838_v35, %v2839_v54  ;;  %v2968_v25 = vrot.slane %v2647_v7, 1  ;;  %v2776_v39 = vpop.f32.mrf.mxu1  ;;  %vm7567_vm15 = vmmov %vm7548_vm9 }
 0x377   : > { %v2903_v32 = vsel %vm7546_vm11, %v2882_v22, 0.0  ;;  %v2777_v21 = vadd.f32 %v6199_v44, %v2776_v39  ;;  %v7570_v39 = vld [vmem:[#allocation77_spill] sm:$0xff] }
 0x378   : > { %3158 = vst.msk [vmem:[%s6223_s19 + $0x48] sm:$0xff] %vm7547_vm2, %v3126_v16  ;;  %v2935_v28 = vadd.f32 %v2903_v32, %v2775_v30  ;;  %v3009_v33 = vsel %vm7548_vm9, %v2967_v53, %v2968_v25  ;;  %vm7571_vm2 = vmmov %vm7563_vm3 }
 0x379   : > { %v3031_v47 = vsel %vm7550_vm7, %v3009_v33, 0.0  ;;  %vm7574_vm7 = vmmov %vm7566_vm1 }
 0x37a   : > { %v3063_v37 = vadd.f32 %v3031_v47, %v2935_v28  ;;  %v7572_v47 = vld [vmem:[#allocation86_spill] sm:$0xff] }
 0x37b   : > { %v2496_v12 = vpop.f32.mrf.mxu3  ;;  %vm7573_vm9 = vnez %v7572_v47 }
 0x37c   : > { %v3095_v49 = vmax.f32 %v3063_v37, 0.0  ;;  %v2840_v38 = vrot.slane %v2496_v12, 7 }
 0x37d   : > { %v2650_v10 = vpop.f32.mrf.mxu0 }
 0x37e   : > { %v3127_v31 = vadd.f32 %v7551_v4, %v3095_v49  ;;  %v2881_v6 = vsel %vm7552_vm8, %v2839_v54, %v2840_v38  ;;  %v2969_v11 = vrot.slane %v2650_v10, 1  ;;  %v2779_v63 = vpop.f32.mrf.mxu1  ;;  %v7568_v54 = vld [vmem:[#allocation103_spill] sm:$0xff]  ;;  %vm7575_vm8 = vmmov %vm7556_vm13 }
 0x37f   : > { %v2904_v17 = vsel %vm7554_vm0, %v2881_v6, 0.0  ;;  %v2780_v24 = vadd.f32 %v6199_v44, %v2779_v63  ;;  %vm7569_vm11 = vnez %v7568_v54  ;;  %vm7576_vm0 = vmmov %vm7558_vm6  ;;  %v7581_v63 = vld [vmem:[#allocation78_spill] sm:$0xff]  ;;  %v7591_v54 = vld [vmem:[#allocation80_spill] sm:$0xff] }
 0x380   : > { %3159 = vst.msk [vmem:[%s6223_s19 + $0x50] sm:$0xff] %vm7555_vm4, %v3127_v31  ;;  %v2936_v41 = vadd.f32 %v2904_v17, %v2777_v21  ;;  %v3008_v35 = vsel %vm7556_vm13, %v2968_v25, %v2969_v11  ;;  %3428 = vmatmul.msk.bf16.gmra.mxu3 %vm7557_vm14, %v6157_v51  ;;  %3492 = vmatmul.msk.bf16.gmra.mxu0 %vm7558_vm6, %v6157_v51  ;;  %vm7577_vm4 = vmmov %vm7576_vm0 }
 0x381   : > { %v3032_v61 = vsel %vm7560_vm5, %v3008_v35, 0.0  ;;  %3532 = vmatmul.msk.bf16.gmra.mxu1 %vm7561_vm12, %v6157_v51  ;;  %vm7580_vm14 = vmmov %vm7576_vm0 }
 0x382   : > { %v3064_v0 = vadd.f32 %v3032_v61, %v2936_v41  ;;  %vm7582_vm6 = vmmov %vm7571_vm2  ;;  %v7583_v61 = vld [vmem:[#allocation79_spill] sm:$0xff] }
 0x383   : > { %v2499_v27 = vpop.f32.mrf.mxu3  ;;  %vm7584_vm5 = vnez %v7583_v61  ;;  %vm7585_vm12 = vmmov %vm7566_vm1 }
 0x384   : > { %v3096_v48 = vmax.f32 %v3064_v0, 0.0  ;;  %v2841_v53 = vrot.slane %v2499_v27, 7 }
 0x385   : > { %v2652_v62 = vpop.f32.mrf.mxu0 }
 0x386   : > { %v3128_v15 = vadd.f32 %v7562_v14, %v3096_v48  ;;  %v2880_v23 = vsel %vm7563_vm3, %v2840_v38, %v2841_v53  ;;  %v2970_v42 = vrot.slane %v2652_v62, 1  ;;  %v2781_v2 = vpop.f32.mrf.mxu1  ;;  %v7578_v38 = vld [vmem:[#allocation104_spill] sm:$0xff]  ;;  %vm7586_vm3 = vmmov %vm7575_vm8  ;;  %v7587_v48 = vld [vmem:[#allocation105_spill] sm:$0xff] }
 0x387   : > { %v2905_v13 = vsel %vm7565_vm10, %v2880_v23, 0.0  ;;  %v2782_v32 = vadd.f32 %v6199_v44, %v2781_v2  ;;  %vm7579_vm13 = vnez %v7578_v38  ;;  %vm7588_vm10 = vnez %v7587_v48  ;;  %v7599_v38 = vld [vmem:[#allocation4_spill] sm:$0xff]  ;;  %v7607_v48 = vld [vmem:[#allocation5_spill] sm:$0xff] }
 0x388   : > { %3160 = vst.msk [vmem:[%s6223_s19 + $0x58] sm:$0xff] %vm7566_vm1, %v3128_v15  ;;  %v2937_v51 = vadd.f32 %v2905_v13, %v2780_v24  ;;  %v3007_v57 = vsel %vm7567_vm15, %v2969_v11, %v2970_v42  ;;  %vm7590_vm1 = vmmov %vm7571_vm2  ;;  %vm7592_vm15 = vnez %v7591_v54 }
 0x389   : > { %v3033_v7 = vsel %vm7569_vm11, %v3007_v57, 0.0  ;;  %vm7593_vm11 = vmmov %vm7574_vm7 }
 0x38a   : > { %v3065_v5 = vadd.f32 %v3033_v7, %v2937_v51 }
 0x38b   : > { %v2501_v16 = vpop.f32.mrf.mxu3 }
 0x38c   : > { %v3097_v30 = vmax.f32 %v3065_v5, 0.0  ;;  %v2842_v22 = vrot.slane %v2501_v16, 7 }
 0x38d   : > { %v2655_v25 = vpop.f32.mrf.mxu0 }
 0x38e   : > { %v3129_v3 = vadd.f32 %v7570_v39, %v3097_v30  ;;  %v2879_v28 = vsel %vm7571_vm2, %v2841_v53, %v2842_v22  ;;  %v2971_v33 = vrot.slane %v2655_v25, 1  ;;  %v2784_v59 = vpop.f32.mrf.mxu1  ;;  %vm7594_vm2 = vmmov %vm7586_vm3  ;;  %v7595_v30 = vld [vmem:[#allocation106_spill] sm:$0xff] }
 0x38f   : > { %v2906_v37 = vsel %vm7573_vm9, %v2879_v28, 0.0  ;;  %v2785_v17 = vadd.f32 %v6199_v44, %v2784_v59  ;;  %vm7596_vm9 = vnez %v7595_v30  ;;  %v7615_v30 = vld [vmem:[#allocation109_spill] sm:$0xff] }
 0x390   : > { %3161 = vst.msk [vmem:[%s6223_s19 + $0x60] sm:$0xff] %vm7574_vm7, %v3129_v3  ;;  %v2938_v12 = vadd.f32 %v2906_v37, %v2782_v32  ;;  %v3006_v49 = vsel %vm7575_vm8, %v2970_v42, %v2971_v33  ;;  %3429 = vmatmul.msk.bf16.gmra.mxu3 %vm7576_vm0, %v6175_v58  ;;  %3493 = vmatmul.msk.bf16.gmra.mxu0 %vm7577_vm4, %v6175_v58  ;;  %v7589_v42 = vld [vmem:[#allocation81_spill] sm:$0xff]  ;;  %vm7598_vm7 = vmmov %vm7590_vm1  ;;  %vm7600_vm8 = vnez %v7599_v38 }
 0x391   : > { %v3034_v10 = vsel %vm7579_vm13, %v3006_v49, 0.0  ;;  %3533 = vmatmul.msk.bf16.gmra.mxu1 %vm7580_vm14, %v6175_v58  ;;  %vm7601_vm0 = vmmov %vm7593_vm11 }
 0x392   : > { %v3066_v4 = vadd.f32 %v3034_v10, %v2938_v12  ;;  %vm7602_vm4 = vmmov %vm7594_vm2 }
 0x393   : > { %v2504_v31 = vpop.f32.mrf.mxu3  ;;  %vm7606_vm14 = vmmov %vm7590_vm1 }
 0x394   : > { %v3098_v21 = vmax.f32 %v3066_v4, 0.0  ;;  %v2843_v6 = vrot.slane %v2504_v31, 7 }
 0x395   : > { %v2657_v11 = vpop.f32.mrf.mxu0 }
 0x396   : > { %v3130_v55 = vadd.f32 %v7581_v63, %v3098_v21  ;;  %v2878_v41 = vsel %vm7582_vm6, %v2842_v22, %v2843_v6  ;;  %v2972_v35 = vrot.slane %v2657_v11, 1  ;;  %v2786_v9 = vpop.f32.mrf.mxu1  ;;  %v7603_v21 = vld [vmem:[#allocation107_spill] sm:$0xff]  ;;  %vm7608_vm6 = vnez %v7607_v48 }
 0x397   : > { %v2907_v0 = vsel %vm7584_vm5, %v2878_v41, 0.0  ;;  %v2787_v50 = vadd.f32 %v6199_v44, %v2786_v9  ;;  %vm7604_vm13 = vnez %v7603_v21  ;;  %vm7609_vm5 = vmmov %vm7601_vm0  ;;  %v7623_v21 = vld [vmem:[#allocation3_spill] sm:$0xff] }
 0x398   : > { %3162 = vst.msk [vmem:[%s6223_s19 + $0x68] sm:$0xff] %vm7585_vm12, %v3130_v55  ;;  %v2939_v58 = vadd.f32 %v2907_v0, %v2785_v17  ;;  %v3005_v27 = vsel %vm7586_vm3, %v2971_v33, %v2972_v35  ;;  %v7597_v33 = vld [vmem:[#allocation83_spill] sm:$0xff]  ;;  %vm7610_vm12 = vmmov %vm7594_vm2 }
 0x399   : > { %v3035_v53 = vsel %vm7588_vm10, %v3005_v27, 0.0  ;;  %vm7614_vm10 = vmmov %vm7590_vm1 }
 0x39a   : > { %v3067_v62 = vadd.f32 %v3035_v53, %v2939_v58 }
 0x39b   : > { %v2506_v14 = vpop.f32.mrf.mxu3 }
 0x39c   : > { %v3099_v15 = vmax.f32 %v3067_v62, 0.0  ;;  %v2844_v24 = vrot.slane %v2506_v14, 7 }
 0x39d   : > { %v2660_v23 = vpop.f32.mrf.mxu0 }
 0x39e   : > { %v3131_v2 = vadd.f32 %v7589_v42, %v3099_v15  ;;  %v2877_v13 = vsel %vm7590_vm1, %v2843_v6, %v2844_v24  ;;  %v2973_v51 = vrot.slane %v2660_v23, 1  ;;  %v2789_v57 = vpop.f32.mrf.mxu1  ;;  %v7611_v15 = vld [vmem:[#allocation108_spill] sm:$0xff]  ;;  %vm7616_vm1 = vnez %v7615_v30 }
 0x39f   : > { %v2908_v7 = vsel %vm7592_vm15, %v2877_v13, 0.0  ;;  %v2790_v47 = vadd.f32 %v6199_v44, %v2789_v57  ;;  %vm7612_vm3 = vnez %v7611_v15  ;;  %vm7617_vm15 = vmmov %vm7601_vm0  ;;  %v7631_v15 = vld [vmem:[#allocation16_spill] sm:$0xff] }
 0x3a0   : > { %3163 = vst.msk [vmem:[%s6223_s19 + $0x70] sm:$0xff] %vm7593_vm11, %v3131_v2  ;;  %v2940_v5 = vadd.f32 %v2908_v7, %v2787_v50  ;;  %v3004_v16 = vsel %vm7594_vm2, %v2972_v35, %v2973_v51  ;;  %v7605_v35 = vld [vmem:[#allocation10_spill] sm:$0xff]  ;;  %vm7618_vm11 = vmmov %vm7594_vm2 }
 0x3a1   : > { %v3036_v22 = vsel %vm7596_vm9, %v3004_v16, 0.0  ;;  %vm7622_vm9 = vmmov %vm7598_vm7 }
 0x3a2   : > { %v3068_v25 = vadd.f32 %v3036_v22, %v2940_v5 }
 0x3a3   : > { %v2509_v39 = vpop.f32.mrf.mxu3 }
 0x3a4   : > { %v3100_v3 = vmax.f32 %v3068_v25, 0.0  ;;  %v2845_v32 = vrot.slane %v2509_v39, 7 }
 0x3a5   : > { %v2662_v28 = vpop.f32.mrf.mxu0 }
 0x3a6   : > { %v3132_v59 = vadd.f32 %v7597_v33, %v3100_v3  ;;  %v2876_v37 = vsel %vm7598_vm7, %v2844_v24, %v2845_v32  ;;  %v2974_v12 = vrot.slane %v2662_v28, 1  ;;  %v2791_v49 = vpop.f32.mrf.mxu1  ;;  %v7619_v3 = vld [vmem:[#allocation110_spill] sm:$0xff]  ;;  %vm7624_vm7 = vnez %v7623_v21 }
 0x3a7   : > { %v2909_v10 = vsel %vm7600_vm8, %v2876_v37, 0.0  ;;  %v2792_v61 = vadd.f32 %v6199_v44, %v2791_v49  ;;  %vm7620_vm2 = vnez %v7619_v3  ;;  %vm7625_vm8 = vmmov %vm7601_vm0 }
 0x3a8   : > { %3164 = vst.msk [vmem:[%s6223_s19 + $0x78] sm:$0xff] %vm7601_vm0, %v3132_v59  ;;  %v2941_v4 = vadd.f32 %v2909_v10, %v2790_v47  ;;  %v3003_v31 = vsel %vm7602_vm4, %v2973_v51, %v2974_v12  ;;  %v7613_v51 = vld [vmem:[#allocation11_spill] sm:$0xff]  ;;  %vm7626_vm0 = vmmov %vm7602_vm4 }
 0x3a9   : > { %v3037_v6 = vsel %vm7604_vm13, %v3003_v31, 0.0  ;;  %vm7630_vm13 = vmmov %vm7622_vm9 }
 0x3aa   : > { %v3069_v11 = vadd.f32 %v3037_v6, %v2941_v4 }
 0x3ab   : > { %v2511_v63 = vpop.f32.mrf.mxu3 }
 0x3ac   : > { %v3101_v55 = vmax.f32 %v3069_v11, 0.0  ;;  %v2846_v17 = vrot.slane %v2511_v63, 7 }
 0x3ad   : > { %v2665_v41 = vpop.f32.mrf.mxu0 }
 0x3ae   : > { %v3133_v9 = vadd.f32 %v7605_v35, %v3101_v55  ;;  %v2875_v0 = vsel %vm7606_vm14, %v2845_v32, %v2846_v17  ;;  %v2975_v58 = vrot.slane %v2665_v41, 1  ;;  %v2794_v27 = vpop.f32.mrf.mxu1  ;;  %v7627_v55 = vld [vmem:[#allocation111_spill] sm:$0xff]  ;;  %vm7632_vm14 = vnez %v7631_v15 }
 0x3af   : > { %v2910_v53 = vsel %vm7608_vm6, %v2875_v0, 0.0  ;;  %v2795_v54 = vadd.f32 %v6199_v44, %v2794_v27  ;;  %vm7628_vm4 = vnez %v7627_v55  ;;  %vm7633_vm6 = vmmov %vm7609_vm5 }
 0x3b0   : > { %3165 = vst.msk [vmem:[%s6223_s19 + $0x80] sm:$0xff] %vm7609_vm5, %v3133_v9  ;;  %v2942_v62 = vadd.f32 %v2910_v53, %v2792_v61  ;;  %v3002_v14 = vsel %vm7610_vm12, %v2974_v12, %v2975_v58  ;;  %v7621_v12 = vld [vmem:[#allocation8_spill] sm:$0xff]  ;;  %vm7634_vm5 = vmmov %vm7626_vm0 }
 0x3b1   : > { %v3038_v24 = vsel %vm7612_vm3, %v3002_v14, 0.0  ;;  %vm7638_vm3 = vmmov %vm7622_vm9 }
 0x3b2   : > { %v3070_v23 = vadd.f32 %v3038_v24, %v2942_v62 }
 0x3b3   : > { %v2514_v42 = vpop.f32.mrf.mxu3 }
 0x3b4   : > { %v3102_v2 = vmax.f32 %v3070_v23, 0.0  ;;  %v2847_v50 = vrot.slane %v2514_v42, 7 }
 0x3b5   : > { %v2667_v13 = vpop.f32.mrf.mxu0 }
 0x3b6   : > { %v3134_v57 = vadd.f32 %v7613_v51, %v3102_v2  ;;  %v2874_v7 = vsel %vm7614_vm10, %v2846_v17, %v2847_v50  ;;  %v2976_v5 = vrot.slane %v2667_v13, 1  ;;  %v2796_v16 = vpop.f32.mrf.mxu1  ;;  %v7635_v2 = vld [vmem:[#allocation23_spill] sm:$0xff]  ;;  %vm7639_vm10 = vnez %v7255_v52 }
 0x3b7   : > { %v2911_v22 = vsel %vm7616_vm1, %v2874_v7, 0.0  ;;  %v2797_v38 = vadd.f32 %v6199_v44, %v2796_v16  ;;  %vm7636_vm12 = vnez %v7635_v2  ;;  %vm7640_vm1 = vmmov %vm7633_vm6 }
 0x3b8   : > { %3166 = vst.msk [vmem:[%s6223_s19 + $0x88] sm:$0xff] %vm7617_vm15, %v3134_v57  ;;  %v2943_v25 = vadd.f32 %v2911_v22, %v2795_v54  ;;  %v3001_v39 = vsel %vm7618_vm11, %v2975_v58, %v2976_v5  ;;  %v7629_v58 = vld [vmem:[#allocation9_spill] sm:$0xff]  ;;  %vm7641_vm15 = vmmov %vm7626_vm0 }
 0x3b9   : > { %v3039_v32 = vsel %vm7620_vm2, %v3001_v39, 0.0  ;;  %vm7645_vm2 = vmmov %vm7638_vm3 }
 0x3ba   : > { %v3071_v28 = vadd.f32 %v3039_v32, %v2943_v25 }
 0x3bb   : > { %v2516_v33 = vpop.f32.mrf.mxu3 }
 0x3bc   : > { %v3103_v59 = vmax.f32 %v3071_v28, 0.0  ;;  %v2848_v47 = vrot.slane %v2516_v33, 7  ;;  %v7642_v33 = vld [vmem:[#allocation26_spill] sm:$0xff] }
 0x3bd   : > { %v2670_v37 = vpop.f32.mrf.mxu0  ;;  %vm7643_vm11 = vnez %v7642_v33  ;;  %v7664_v33 = vld [vmem:[#allocation29_spill] sm:$0xff] }
 0x3be   : > { %v3135_v49 = vadd.f32 %v7621_v12, %v3103_v59  ;;  %v2873_v10 = vsel %vm7622_vm9, %v2847_v50, %v2848_v47  ;;  %v2977_v4 = vrot.slane %v2670_v37, 1  ;;  %v2799_v31 = vpop.f32.mrf.mxu1 }
 0x3bf   : > { %v2912_v6 = vsel %vm7624_vm7, %v2873_v10, 0.0  ;;  %v2800_v48 = vadd.f32 %v6199_v44, %v2799_v31  ;;  %v7644_v10 = vld [vmem:[#allocation17_spill] sm:$0xff]  ;;  %vm7648_vm7 = vmmov %vm7640_vm1 }
 0x3c0   : > { %3167 = vst.msk [vmem:[%s6223_s19 + $0x90] sm:$0xff] %vm7625_vm8, %v3135_v49  ;;  %v2944_v11 = vadd.f32 %v2912_v6, %v2797_v38  ;;  %v3000_v63 = vsel %vm7626_vm0, %v2976_v5, %v2977_v4  ;;  %v7637_v5 = vld [vmem:[#allocation14_spill] sm:$0xff]  ;;  %vm7649_vm8 = vmmov %vm7626_vm0 }
 0x3c1   : > { %v3040_v17 = vsel %vm7628_vm4, %v3000_v63, 0.0  ;;  %vm7653_vm4 = vmmov %vm7645_vm2 }
 0x3c2   : > { %v3072_v41 = vadd.f32 %v3040_v17, %v2944_v11  ;;  %v7646_v11 = vld [vmem:[#allocation12_spill] sm:$0xff] }
 0x3c3   : > { %v2519_v35 = vpop.f32.mrf.mxu3  ;;  %vm7647_vm9 = vnez %v7646_v11 }
 0x3c4   : > { %v3104_v9 = vmax.f32 %v3072_v41, 0.0  ;;  %v2849_v61 = vrot.slane %v2519_v35, 7  ;;  %v7650_v41 = vld [vmem:[#allocation6_spill] sm:$0xff] }
 0x3c5   : > { %v2672_v0 = vpop.f32.mrf.mxu0  ;;  %vm7651_vm0 = vnez %v7650_v41 }
 0x3c6   : > { %v3136_v27 = vadd.f32 %v7629_v58, %v3104_v9  ;;  %v2872_v53 = vsel %vm7630_vm13, %v2848_v47, %v2849_v61  ;;  %v2978_v62 = vrot.slane %v2672_v0, 1  ;;  %v2801_v14 = vpop.f32.mrf.mxu1 }
 0x3c7   : > { %v2913_v24 = vsel %vm7632_vm14, %v2872_v53, 0.0  ;;  %v2802_v30 = vadd.f32 %v6199_v44, %v2801_v14  ;;  %vm7656_vm14 = vmmov %vm7640_vm1 }
 0x3c8   : > { %3168 = vst.msk [vmem:[%s6223_s19 + $0x98] sm:$0xff] %vm7633_vm6, %v3136_v27  ;;  %v2945_v23 = vadd.f32 %v2913_v24, %v2800_v48  ;;  %v2999_v42 = vsel %vm7634_vm5, %v2977_v4, %v2978_v62  ;;  %v7652_v48 = vld [vmem:[#allocation24_spill] sm:$0xff]  ;;  %vm7657_vm6 = vmmov %vm7634_vm5  ;;  %vm7658_vm5 = vnez %v7281_v34 }
 0x3c9   : > { %v3041_v50 = vsel %vm7636_vm12, %v2999_v42, 0.0  ;;  %vm7660_vm12 = vmmov %vm7645_vm2 }
 0x3ca   : > { %v3073_v13 = vadd.f32 %v3041_v50, %v2945_v23  ;;  %v7654_v23 = vld [vmem:[#allocation7_spill] sm:$0xff] }
 0x3cb   : > { %v2521_v51 = vpop.f32.mrf.mxu3  ;;  %vm7655_vm13 = vnez %v7654_v23 }
 0x3cc   : > { %v3105_v57 = vmax.f32 %v3073_v13, 0.0  ;;  %v2850_v54 = vrot.slane %v2521_v51, 7 }
 0x3cd   : > { %v2675_v7 = vpop.f32.mrf.mxu0 }
 0x3ce   : > { %v3137_v16 = vadd.f32 %v7637_v5, %v3105_v57  ;;  %v2871_v22 = vsel %vm7638_vm3, %v2849_v61, %v2850_v54  ;;  %v2979_v25 = vrot.slane %v2675_v7, 1  ;;  %v2804_v39 = vpop.f32.mrf.mxu1  ;;  %vm7661_vm3 = vnez %v7289_v20 }
 0x3cf   : > { %v2914_v3 = vsel %vm7639_vm10, %v2871_v22, 0.0  ;;  %v2805_v52 = vadd.f32 %v6199_v44, %v2804_v39  ;;  %vm7662_vm10 = vmmov %vm7640_vm1 }
 0x3d0   : > { %3169 = vst.msk [vmem:[%s6223_s19 + $0xa0] sm:$0xff] %vm7640_vm1, %v3137_v16  ;;  %v2946_v32 = vadd.f32 %v2914_v3, %v2802_v30  ;;  %v2998_v28 = vsel %vm7641_vm15, %v2978_v62, %v2979_v25  ;;  %v7659_v16 = vld [vmem:[#allocation18_spill] sm:$0xff]  ;;  %vm7663_vm1 = vmmov %vm7657_vm6  ;;  %vm7665_vm15 = vnez %v7664_v33 }
 0x3d1   : > { %v3042_v59 = vsel %vm7643_vm11, %v2998_v28, 0.0  ;;  %vm7667_vm11 = vmmov %vm7645_vm2 }
 0x3d2   : > { %v3074_v47 = vadd.f32 %v3042_v59, %v2946_v32 }
 0x3d3   : > { %v2524_v37 = vpop.f32.mrf.mxu3 }
 0x3d4   : > { %v3106_v12 = vmax.f32 %v3074_v47, 0.0  ;;  %v2851_v49 = vrot.slane %v2524_v37, 7 }
 0x3d5   : > { %v2677_v38 = vpop.f32.mrf.mxu0 }
 0x3d6   : > { %v3138_v4 = vadd.f32 %v7644_v10, %v3106_v12  ;;  %v2870_v31 = vsel %vm7645_vm2, %v2850_v54, %v2851_v49  ;;  %v2980_v21 = vrot.slane %v2677_v38, 1  ;;  %v2806_v6 = vpop.f32.mrf.mxu1  ;;  %v7666_v10 = vld [vmem:[#allocation19_spill] sm:$0xff] }
 0x3d7   : > { %v2915_v63 = vsel %vm7647_vm9, %v2870_v31, 0.0  ;;  %v2807_v62 = vadd.f32 %v6199_v44, %v2806_v6  ;;  %v7668_v6 = vld [vmem:[#allocation30_spill] sm:$0xff]  ;;  %vm7670_vm9 = vmmov %vm7648_vm7 }
 0x3d8   : > { %3170 = vst.msk [vmem:[%s6223_s19 + $0xa8] sm:$0xff] %vm7648_vm7, %v3138_v4  ;;  %v2947_v55 = vadd.f32 %v2915_v63, %v2805_v52  ;;  %v2997_v17 = vsel %vm7649_vm8, %v2979_v25, %v2980_v21  ;;  %vm7669_vm2 = vnez %v7668_v6  ;;  %vm7671_vm7 = vmmov %vm7663_vm1 }
 0x3d9   : > { %v3043_v35 = vsel %vm7651_vm0, %v2997_v17, 0.0  ;;  %v7672_v17 = vld [vmem:[#allocation20_spill] sm:$0xff]  ;;  %vm7675_vm0 = vmmov %vm7653_vm4 }
 0x3da   : > { %v3075_v9 = vadd.f32 %v3043_v35, %v2947_v55  ;;  %vm7673_vm8 = vnez %v7672_v17 }
 0x3db   : > { %v2526_v61 = vpop.f32.mrf.mxu3 }
 0x3dc   : > { %v3107_v0 = vmax.f32 %v3075_v9, 0.0  ;;  %v2852_v58 = vrot.slane %v2526_v61, 7 }
 0x3dd   : > { %v2680_v27 = vpop.f32.mrf.mxu0 }
 0x3de   : > { %v3139_v53 = vadd.f32 %v7652_v48, %v3107_v0  ;;  %v2869_v14 = vsel %vm7653_vm4, %v2851_v49, %v2852_v58  ;;  %v2981_v15 = vrot.slane %v2680_v27, 1  ;;  %v2809_v24 = vpop.f32.mrf.mxu1  ;;  %v7674_v27 = vld [vmem:[#allocation31_spill] sm:$0xff] }
 0x3df   : > { %v2916_v42 = vsel %vm7655_vm13, %v2869_v14, 0.0  ;;  %v2810_v22 = vadd.f32 %v6199_v44, %v2809_v24  ;;  %v7676_v24 = vld [vmem:[#allocation22_spill] sm:$0xff]  ;;  %vm7678_vm13 = vmmov %vm7670_vm9 }
 0x3e0   : > { %3171 = vst.msk [vmem:[%s6223_s19 + $0xb0] sm:$0xff] %vm7656_vm14, %v3139_v53  ;;  %v2948_v2 = vadd.f32 %v2916_v42, %v2807_v62  ;;  %v2996_v50 = vsel %vm7657_vm6, %v2980_v21, %v2981_v15  ;;  %vm7677_vm4 = vnez %v7676_v24  ;;  %vm7679_vm14 = vmmov %vm7663_vm1 }
 0x3e1   : > { %v3044_v13 = vsel %vm7658_vm5, %v2996_v50, 0.0  ;;  %v7680_v50 = vld [vmem:[#allocation34_spill] sm:$0xff]  ;;  %vm7683_vm5 = vmmov %vm7675_vm0 }
 0x3e2   : > { %v3076_v51 = vadd.f32 %v3044_v13, %v2948_v2  ;;  %vm7681_vm6 = vnez %v7680_v50 }
 0x3e3   : > { %v2529_v57 = vpop.f32.mrf.mxu3 }
 0x3e4   : > { %v3108_v54 = vmax.f32 %v3076_v51, 0.0  ;;  %v2853_v7 = vrot.slane %v2529_v57, 7 }
 0x3e5   : > { %v2682_v5 = vpop.f32.mrf.mxu0 }
 0x3e6   : > { %v3140_v30 = vadd.f32 %v7659_v16, %v3108_v54  ;;  %v2868_v25 = vsel %vm7660_vm12, %v2852_v58, %v2853_v7  ;;  %v2982_v39 = vrot.slane %v2682_v5, 1  ;;  %v2811_v3 = vpop.f32.mrf.mxu1  ;;  %v7682_v16 = vld [vmem:[#allocation32_spill] sm:$0xff] }
 0x3e7   : > { %v2917_v32 = vsel %vm7661_vm3, %v2868_v25, 0.0  ;;  %v2812_v20 = vadd.f32 %v6199_v44, %v2811_v3  ;;  %vm7686_vm3 = vmmov %vm7670_vm9 }
 0x3e8   : > { %3172 = vst.msk [vmem:[%s6223_s19 + $0xb8] sm:$0xff] %vm7662_vm10, %v3140_v30  ;;  %v2949_v34 = vadd.f32 %v2917_v32, %v2810_v22  ;;  %v2995_v28 = vsel %vm7663_vm1, %v2981_v15, %v2982_v39  ;;  %v7684_v32 = vld [vmem:[#allocation35_spill] sm:$0xff]  ;;  %vm7687_vm10 = vmmov %vm7663_vm1 }
 0x3e9   : > { %v3045_v59 = vsel %vm7665_vm15, %v2995_v28, 0.0  ;;  %vm7685_vm12 = vnez %v7684_v32  ;;  %vm7691_vm15 = vmmov %vm7675_vm0 }
 0x3ea   : > { %v3077_v47 = vadd.f32 %v3045_v59, %v2949_v34  ;;  %v7688_v59 = vld [vmem:[#allocation113_spill] sm:$0xff] }
 0x3eb   : > { %v2531_v37 = vpop.f32.mrf.mxu3  ;;  %vm7689_vm1 = vnez %v7688_v59 }
 0x3ec   : > { %v3109_v12 = vmax.f32 %v3077_v47, 0.0  ;;  %v2854_v49 = vrot.slane %v2531_v37, 7 }
 0x3ed   : > { %v2685_v38 = vpop.f32.mrf.mxu0 }
 0x3ee   : > { %v3141_v4 = vadd.f32 %v7666_v10, %v3109_v12  ;;  %v2867_v52 = vsel %vm7667_vm11, %v2853_v7, %v2854_v49  ;;  %v2983_v31 = vrot.slane %v2685_v38, 1  ;;  %v2814_v21 = vpop.f32.mrf.mxu1 }
 0x3ef   : > { %v2918_v11 = vsel %vm7669_vm2, %v2867_v52, 0.0  ;;  %v2815_v53 = vadd.f32 %v6199_v44, %v2814_v21  ;;  %vm7694_vm2 = vmmov %vm7686_vm3 }
 0x3f0   : > { %3173 = vst.msk [vmem:[%s6223_s19 + $0xc0] sm:$0xff] %vm7670_vm9, %v3141_v4  ;;  %v2950_v63 = vadd.f32 %v2918_v11, %v2812_v20  ;;  %v2994_v55 = vsel %vm7671_vm7, %v2982_v39, %v2983_v31  ;;  %v7690_v4 = vld [vmem:[#allocation33_spill] sm:$0xff]  ;;  %v7692_v11 = vld [vmem:[#allocation27_spill] sm:$0xff]  ;;  %vm7695_vm9 = vmmov %vm7671_vm7 }
 0x3f1   : > { %v3046_v41 = vsel %vm7673_vm8, %v2994_v55, 0.0  ;;  %vm7693_vm11 = vnez %v7692_v11  ;;  %vm7699_vm8 = vmmov %vm7675_vm0  ;;  %v7722_v11 = vld [vmem:[#allocation50_spill] sm:$0xff] }
 0x3f2   : > { %v3078_v35 = vadd.f32 %v3046_v41, %v2950_v63  ;;  %v7696_v41 = vld [vmem:[#allocation28_spill] sm:$0xff] }
 0x3f3   : > { %v2534_v9 = vpop.f32.mrf.mxu3  ;;  %vm7697_vm7 = vnez %v7696_v41 }
 0x3f4   : > { %v3110_v61 = vmax.f32 %v3078_v35, 0.0  ;;  %v2855_v0 = vrot.slane %v2534_v9, 7 }
 0x3f5   : > { %v2687_v58 = vpop.f32.mrf.mxu0 }
 0x3f6   : > { %v3142_v48 = vadd.f32 %v7674_v27, %v3110_v61  ;;  %v2866_v62 = vsel %vm7675_vm0, %v2854_v49, %v2855_v0  ;;  %v2984_v14 = vrot.slane %v2687_v58, 1  ;;  %v2816_v15 = vpop.f32.mrf.mxu1  ;;  %vm7700_vm0 = vnez %v7353_v43 }
 0x3f7   : > { %v2919_v23 = vsel %vm7677_vm4, %v2866_v62, 0.0  ;;  %v2817_v22 = vadd.f32 %v6199_v44, %v2816_v15  ;;  %vm7701_vm4 = vmmov %vm7694_vm2 }
 0x3f8   : > { %3174 = vst.msk [vmem:[%s6223_s19 + $0xc8] sm:$0xff] %vm7678_vm13, %v3142_v48  ;;  %v2951_v42 = vadd.f32 %v2919_v23, %v2815_v53  ;;  %v2993_v2 = vsel %vm7679_vm14, %v2983_v31, %v2984_v14  ;;  %v7698_v48 = vld [vmem:[#allocation44_spill] sm:$0xff]  ;;  %vm7702_vm13 = vmmov %vm7695_vm9  ;;  %vm7703_vm14 = vnez %v7355_v40 }
 0x3f9   : > { %v3047_v13 = vsel %vm7681_vm6, %v2993_v2, 0.0  ;;  %vm7705_vm6 = vmmov %vm7683_vm5 }
 0x3fa   : > { %v3079_v51 = vadd.f32 %v3047_v13, %v2951_v42 }
 0x3fb   : > { %v2536_v57 = vpop.f32.mrf.mxu3 }
 0x3fc   : > { %v3111_v54 = vmax.f32 %v3079_v51, 0.0  ;;  %v2856_v7 = vrot.slane %v2536_v57, 7 }
 0x3fd   : > { %v2690_v5 = vpop.f32.mrf.mxu0 }
 0x3fe   : > { %v3143_v30 = vadd.f32 %v7682_v16, %v3111_v54  ;;  %v2865_v25 = vsel %vm7683_vm5, %v2855_v0, %v2856_v7  ;;  %v2985_v39 = vrot.slane %v2690_v5, 1  ;;  %v2819_v3 = vpop.f32.mrf.mxu1  ;;  %v7704_v5 = vld [vmem:[#allocation40_spill] sm:$0xff]  ;;  %vm7706_vm5 = vnez %v7366_v45 }
 0x3ff   : > { %v2920_v34 = vsel %vm7685_vm12, %v2865_v25, 0.0  ;;  %v2820_v52 = vadd.f32 %v6199_v44, %v2819_v3  ;;  %vm7707_vm12 = vmmov %vm7694_vm2 }
 0x400   : > { %3175 = vst.msk [vmem:[%s6223_s19 + $0xd0] sm:$0xff] %vm7686_vm3, %v3143_v30  ;;  %v2952_v28 = vadd.f32 %v2920_v34, %v2817_v22  ;;  %v2992_v33 = vsel %vm7687_vm10, %v2984_v14, %v2985_v39  ;;  %vm7708_vm3 = vmmov %vm7695_vm9  ;;  %vm7709_vm10 = vnez %v7372_v46 }
 0x401   : > { %v3048_v47 = vsel %vm7689_vm1, %v2992_v33, 0.0  ;;  %vm7710_vm1 = vmmov %vm7708_vm3 }
 0x402   : > { %v3080_v37 = vadd.f32 %v3048_v47, %v2952_v28  ;;  %v2750_v47 = vadd.f32 %v6199_v44, %v6179_v8  ;;  %v7714_v8 = vld [vmem:[#allocation49_spill] sm:$0xff] }
 0x403   : > { %v2539_v12 = vpop.f32.mrf.mxu3 }
 0x404   : > { %v3112_v49 = vmax.f32 %v3080_v37, 0.0  ;;  %v2857_v38 = vrot.slane %v2539_v12, 7  ;;  %v7711_v12 = vld [vmem:[#allocation43_spill] sm:$0xff] }
 0x405   : > { %v2692_v10 = vpop.f32.mrf.mxu0 }
 0x406   : > { %v3144_v20 = vadd.f32 %v7690_v4, %v3112_v49  ;;  %v2864_v31 = vsel %vm7691_vm15, %v2856_v7, %v2857_v38  ;;  %v2986_v21 = vrot.slane %v2692_v10, 1  ;;  %v2821_v6 = vpop.f32.mrf.mxu1  ;;  %vm7712_vm15 = vmmov %vm7705_vm6  ;;  %v7718_v4 = vld [vmem:[#allocation88_spill] sm:$0xff] }
 0x407   : > { %v2921_v63 = vsel %vm7693_vm11, %v2864_v31, 0.0  ;;  %v2822_v62 = vadd.f32 %v6199_v44, %v2821_v6  ;;  %vm7713_vm11 = vmmov %vm7705_vm6 }
 0x408   : > { %3176 = vst.msk [vmem:[%s6223_s19 + $0xd8] sm:$0xff] %vm7694_vm2, %v3144_v20  ;;  %v2953_v55 = vadd.f32 %v2921_v63, %v2820_v52  ;;  %v2991_v17 = vsel %vm7695_vm9, %v2985_v39, %v2986_v21  ;;  %vm7715_vm2 = vnez %v7714_v8  ;;  %vm7716_vm9 = vnez %v7378_v36 }
 0x409   : > { %v3049_v35 = vsel %vm7697_vm7, %v2991_v17, 0.0  ;;  %vm7717_vm7 = vmmov %vm7701_vm4 }
 0x40a   : > { %v3081_v9 = vadd.f32 %v3049_v35, %v2953_v55 }
 0x40b   : > { %v2541_v61 = vpop.f32.mrf.mxu3 }
 0x40c   : > { %v3113_v0 = vmax.f32 %v3081_v9, 0.0  ;;  %v2858_v58 = vrot.slane %v2541_v61, 7 }
 0x40d   : > { %v2695_v27 = vpop.f32.mrf.mxu0 }
 0x40e   : > { %v3145_v53 = vadd.f32 %v7698_v48, %v3113_v0  ;;  %v2863_v14 = vsel %vm7699_vm8, %v2857_v38, %v2858_v58  ;;  %v2987_v15 = vrot.slane %v2695_v27, 1  ;;  %v2824_v2 = vpop.f32.mrf.mxu1  ;;  %vm7719_vm8 = vnez %v7718_v4 }
 0x40f   : > { %v2922_v24 = vsel %vm7700_vm0, %v2863_v14, 0.0  ;;  %v2825_v43 = vadd.f32 %v6199_v44, %v2824_v2  ;;  %v3021_v20 = vsel %vm7719_vm8, %v6194_v56, 0.0  ;;  %vm7720_vm0 = vnez %v7380_v26 }
 0x410   : > { %3177 = vst.msk [vmem:[%s6223_s19 + $0xe0] sm:$0xff] %vm7701_vm4, %v3145_v53  ;;  %v2954_v23 = vadd.f32 %v2922_v24, %v2822_v62  ;;  %v2990_v42 = vsel %vm7702_vm13, %v2986_v21, %v2987_v15  ;;  %v7721_v21 = vld [vmem:[#allocation51_spill] sm:$0xff]  ;;  %vm7723_vm13 = vmmov %vm7701_vm4 }
 0x411   : > { %v3050_v50 = vsel %vm7703_vm14, %v2990_v42, 0.0 }
 0x412   : > { %v3082_v13 = vadd.f32 %v3050_v50, %v2954_v23 }
 0x413   : > { %v2544_v51 = vpop.f32.mrf.mxu3 }
 0x414   : > { %v3114_v57 = vmax.f32 %v3082_v13, 0.0  ;;  %v2859_v54 = vrot.slane %v2544_v51, 7 }
 0x415   : > { %v2697_v7 = vpop.f32.mrf.mxu0 }
 0x416   : > { %v3146_v16 = vadd.f32 %v7704_v5, %v3114_v57  ;;  %v2862_v30 = vsel %vm7705_vm6, %v2858_v58, %v2859_v54  ;;  %v2988_v22 = vrot.slane %v2697_v7, 1  ;;  %v2826_v34 = vpop.f32.mrf.mxu1 }
 0x417   : > { %v2923_v25 = vsel %vm7706_vm5, %v2862_v30, 0.0  ;;  %v2827_v45 = vadd.f32 %v6199_v44, %v2826_v34 }
 0x418   : > { %3178 = vst.msk [vmem:[%s6223_s19 + $0xe8] sm:$0xff] %vm7707_vm12, %v3146_v16  ;;  %v2955_v40 = vadd.f32 %v2923_v25, %v2825_v43  ;;  %v2989_v39 = vsel %vm7708_vm3, %v2987_v15, %v2988_v22  ;;  %v3020_v37 = vsel %vm7710_vm1, %v2988_v22, %v2957_v60 }
 0x419   : > { %v3051_v3 = vsel %vm7709_vm10, %v2989_v39, 0.0  ;;  %v3052_v19 = vsel %vm7720_vm0, %v3020_v37, 0.0 }
 0x41a   : > { %v3083_v32 = vadd.f32 %v3051_v3, %v2955_v40 }
 0x41b   : > { %v2546_v28 = vpop.f32.mrf.mxu3 }
 0x41c   : > { %v3115_v33 = vmax.f32 %v3083_v32, 0.0  ;;  %v2860_v59 = vrot.slane %v2546_v28, 7 }
 0x41e   : > { %v3147_v49 = vadd.f32 %v7711_v12, %v3115_v33  ;;  %v2861_v46 = vsel %vm7712_vm15, %v2859_v54, %v2860_v59  ;;  %v2892_v38 = vsel %vm7713_vm11, %v2860_v59, %v2829_v18 }
 0x41f   : > { %v2893_v44 = vsel %vm7715_vm2, %v2892_v38, 0.0  ;;  %v2924_v29 = vsel %vm7716_vm9, %v2861_v46, 0.0 }
 0x420   : > { %3179 = vst.msk [vmem:[%s6223_s19 + $0xf0] sm:$0xff] %vm7717_vm7, %v3147_v49  ;;  %v2925_v60 = vadd.f32 %v2893_v44, %v2750_v47  ;;  %v2956_v10 = vadd.f32 %v2924_v29, %v2827_v45 }
 0x422   : > { %v3053_v1 = vadd.f32 %v3021_v20, %v2925_v60  ;;  %v3084_v52 = vadd.f32 %v3052_v19, %v2956_v10 }
 0x424   : > { %v3085_v18 = vmax.f32 %v3053_v1, 0.0  ;;  %v3116_v31 = vmax.f32 %v3084_v52, 0.0 }
 0x426   : > { %v3117_v6 = vadd.f32 %v7721_v21, %v3085_v18  ;;  %v3148_v36 = vadd.f32 %v7722_v11, %v3116_v31 }
 0x428   : > { %3149 = vst.msk [vmem:[%s6223_s19] sm:$0xff] %vm7701_vm4, %v3117_v6 }
 0x429   : > { %3180 = vst.msk [vmem:[%s6223_s19 + $0xf8] sm:$0xff] %vm7723_vm13, %v3148_v36 }
 0x42a PF: > { %s15_s18 = sadd.s32 1, %s4002_s18  }
 0x42b   : > { %p12_p4 = scmp.ge.s32.totalorder %s15_s18, 4  }
 0x42d   :  { %14 = sbr.rel (!%p12_p4) target bundleno = 1 (0x1), region = 74 }

</bundles_post_ra>
